<compile_context>
chip_gen: v6e
topology: v6e:2x2x1
jax: 0.10.0
libtpu: 0.0.40
codegen_flags: <defaults>
</compile_context>

<pallas_src>
import numpy as np

import jax
import jax.numpy as jnp
from jax.experimental import pallas as pl
from jax.experimental.pallas import tpu as pltpu

# ----------------------------- configuration -------------------------------
B = 2              # batch
CHANNELS = 4       # image channels
IMG = 16           # spatial size
CNN_MULTI = 8      # cnn_multi (small)
MLP_HIDDEN = 64    # mlp_hidden (small)
H_SIZE = 64        # h_size (small)
LATENT_N = 8       # number of categorical latents
LATENT_C = 8       # classes per latent
K_CONV = 4         # conv kernel
S_CONV = 2         # conv stride
K_DECONV = 4       # deconv kernel == stride (non-overlapping output blocks)

CONV1_OUT = (IMG - K_CONV) // S_CONV + 1          # 7
CONV2_OUT = (CONV1_OUT - K_CONV) // S_CONV + 1    # 2
N_PATCH = B * CONV1_OUT * CONV1_OUT               # 98 conv1 patches (rows)
PATCH_F = CHANNELS * K_CONV * K_CONV              # 64 conv1 patch features
N_OFF = K_CONV * K_CONV                           # 16 conv2 kernel offsets
N_POS2 = CONV2_OUT * CONV2_OUT                    # 4  conv2 output positions
E_DIM = 2 * CNN_MULTI * N_POS2                    # 64 embedder features
Z_FLAT = LATENT_N * LATENT_C                      # 64
DC1_POS = K_DECONV * K_DECONV                     # 16 deconv1 spatial positions
DC2_BLK = CHANNELS * K_DECONV * K_DECONV          # 64 deconv2 output block


# --------------------- constant row-duplication matrix ----------------------
def _build_dup_matrix():
    """0/1 matrix mapping conv1 output rows (b, h1, w1) to the duplicated row
    layout (kh2, kw2, oh2, ow2, b) needed so every conv2 kernel offset sees a
    contiguous 8-row block inside the kernel."""
    dup = np.zeros((N_OFF * N_POS2 * B, N_PATCH), np.float32)
    for kh2 in range(K_CONV):
        for kw2 in range(K_CONV):
            p = kh2 * K_CONV + kw2
            for oh2 in range(CONV2_OUT):
                for ow2 in range(CONV2_OUT):
                    s = oh2 * CONV2_OUT + ow2
                    for b in range(B):
                        r = (p * N_POS2 + s) * B + b
                        h1 = S_CONV * oh2 + kh2
                        w1 = S_CONV * ow2 + kw2
                        c = (b * CONV1_OUT + h1) * CONV1_OUT + w1
                        dup[r, c] = 1.0
    return dup


# --------------------------- fused Pallas kernel ----------------------------
def _fused_forward_kernel(
        pats_ref, dup_ref, h_ref, g_ref,
        w1_ref, b1_ref, w2_ref, b2_ref,
        weh_ref, wee_ref, be1_ref, we2_ref, be2_ref,
        wdh_ref, wdz_ref, bd1_ref, wd2_ref, bd2_ref,
        wt1_ref, bt1_ref, wt2_ref, bt2_ref,
        zlog_ref, zprob_ref, zhot_ref, mean_ref):
    """Whole Autoencoder forward in one kernel (all operands VMEM resident)."""
    f32 = jnp.float32

    def elu(v):  # ELU(alpha=1): v if v > 0 else exp(v) - 1
        return jnp.where(v > 0.0, v, jnp.exp(jnp.minimum(v, 0.0)) - 1.0)

    def mm(a, b):
        return jnp.dot(a, b, preferred_element_type=f32)

    # ---- Embedder conv1: im2col patches (host) x weight matrix ------------
    c1 = elu(mm(pats_ref[...], w1_ref[...]) + b1_ref[...])        # (98, 8)
    # duplicate rows so each conv2 kernel offset owns a contiguous block
    y1 = mm(dup_ref[...], c1)                                     # (128, 8)

    # ---- Embedder conv2 as a sum over its 16 kernel offsets ---------------
    rows2 = N_POS2 * B                                            # 8
    a2 = jnp.broadcast_to(b2_ref[...], (rows2, 2 * CNN_MULTI))
    for p in range(N_OFF):
        a2 = a2 + mm(y1[p * rows2:(p + 1) * rows2, :], w2_ref[p])
    e2 = elu(a2)                                                  # (8, 16) rows=(s, b)

    # ---- LinearEncoder layer 1 over cat(h, e) ------------------------------
    h = h_ref[...]                                                # (B, 64)
    enc1 = mm(h, weh_ref[...]) + be1_ref[...]
    for s in range(N_POS2):
        enc1 = enc1 + mm(e2[s * B:(s + 1) * B, :], wee_ref[s])
    enc1 = elu(enc1)                                              # (B, 64)

    zlog = mm(enc1, we2_ref[...]) + be2_ref[...]                  # (B, 64) = (n, c)
    zlog_ref[...] = zlog

    # ---- OneHotCategoricalStraightThru sample (Gumbel-max) + probs --------
    pert = zlog + g_ref[...]
    dec1 = mm(h, wdh_ref[...]) + bd1_ref[...]                     # decoder L1 acc
    for n in range(LATENT_N):
        sl = slice(n * LATENT_C, (n + 1) * LATENT_C)
        lg = zlog[:, sl]
        m = jnp.max(lg, axis=-1, keepdims=True)
        ex = jnp.exp(lg - m)
        zprob_ref[:, sl] = ex / jnp.sum(ex, axis=-1, keepdims=True)
        pg = pert[:, sl]
        # ties have probability ~0 under continuous Gumbel perturbation
        hot = (pg >= jnp.max(pg, axis=-1, keepdims=True)).astype(f32)
        zhot_ref[:, sl] = hot
        dec1 = dec1 + mm(hot, wdz_ref[sl, :])
    dec1 = elu(dec1)                                              # (B, 64)

    # ---- Decoder MLP + deconv1 (1x1 spatial input -> plain matmul) --------
    d2 = mm(dec1, wd2_ref[...]) + bd2_ref[...]                    # (B, 16)
    t1 = elu(mm(d2, wt1_ref[...]) + bt1_ref[...])                 # (B, 128)=(i,j,c)

    # ---- deconv2 (stride == kernel): one matmul per deconv1 spatial pos ----
    for s in range(DC1_POS):
        xs = t1[:, s * CNN_MULTI:(s + 1) * CNN_MULTI]             # (B, 8)
        mean_ref[:, s * DC2_BLK:(s + 1) * DC2_BLK] = (
            mm(xs, wt2_ref[...]) + bt2_ref[...])


_OUT_SHAPES = (
    jax.ShapeDtypeStruct((B, Z_FLAT), jnp.float32),               # z_logits
    jax.ShapeDtypeStruct((B, Z_FLAT), jnp.float32),               # probs
    jax.ShapeDtypeStruct((B, Z_FLAT), jnp.float32),               # one-hot z
    jax.ShapeDtypeStruct((B, DC1_POS * DC2_BLK), jnp.float32),    # mean slab
)


def _fused_call(pats, h, g, kp):
    args = (pats, kp["dup"], h, g,
            kp["w1"], kp["b1"], kp["w2"], kp["b2"],
            kp["weh"], kp["wee"], kp["be1"], kp["we2"], kp["be2"],
            kp["wdh"], kp["wdz"], kp["bd1"], kp["wd2"], kp["bd2"],
            kp["wt1"], kp["bt1"], kp["wt2"], kp["bt2"])
    vmem = pl.BlockSpec(memory_space=pltpu.MemorySpace.VMEM)
    return pl.pallas_call(
        _fused_forward_kernel,
        out_shape=_OUT_SHAPES,
        in_specs=[vmem] * len(args),
        out_specs=tuple(pl.BlockSpec(memory_space=pltpu.MemorySpace.VMEM)
                        for _ in _OUT_SHAPES),
    )(*args)


# ------------------------------- parameters ---------------------------------
def init_params(key):
    """PyTorch-layout parameters (Conv2d: (Cout,Cin,kh,kw); ConvT: (Cin,Cout,kh,kw);
    linears stored transposed to (in, out))."""
    ks = jax.random.split(key, 16)
    s = 0.05

    def nrm(k, shape):
        return s * jax.random.normal(k, shape, dtype=jnp.float32)

    return dict(
        conv1_w=nrm(ks[0], (CNN_MULTI, CHANNELS, K_CONV, K_CONV)),
        conv1_b=nrm(ks[1], (CNN_MULTI,)),
        conv2_w=nrm(ks[2], (2 * CNN_MULTI, CNN_MULTI, K_CONV, K_CONV)),
        conv2_b=nrm(ks[3], (2 * CNN_MULTI,)),
        enc1_w=nrm(ks[4], (H_SIZE + E_DIM, MLP_HIDDEN)),
        enc1_b=nrm(ks[5], (MLP_HIDDEN,)),
        enc2_w=nrm(ks[6], (MLP_HIDDEN, Z_FLAT)),
        enc2_b=nrm(ks[7], (Z_FLAT,)),
        dec1_w=nrm(ks[8], (H_SIZE + Z_FLAT, MLP_HIDDEN)),
        dec1_b=nrm(ks[9], (MLP_HIDDEN,)),
        dec2_w=nrm(ks[10], (MLP_HIDDEN, 2 * CNN_MULTI)),
        dec2_b=nrm(ks[11], (2 * CNN_MULTI,)),
        deconv1_w=nrm(ks[12], (2 * CNN_MULTI, CNN_MULTI, K_DECONV, K_DECONV)),
        deconv1_b=nrm(ks[13], (CNN_MULTI,)),
        deconv2_w=nrm(ks[14], (CNN_MULTI, CHANNELS, K_DECONV, K_DECONV)),
        deconv2_b=nrm(ks[15], (CHANNELS,)),
    )


def prepare_kernel_params(params):
    """One-time conversion of PyTorch-layout params into kernel-ready slabs
    (done once, outside the jitted hot path -- no per-call pad/reshape)."""
    w1 = params["conv1_w"].reshape(CNN_MULTI, PATCH_F).T             # (64, 8)
    b1 = params["conv1_b"].reshape(1, CNN_MULTI)
    w2 = (params["conv2_w"]                                          # (16, 8, 16)
          .transpose(2, 3, 1, 0)
          .reshape(N_OFF, CNN_MULTI, 2 * CNN_MULTI))
    b2 = params["conv2_b"].reshape(1, 2 * CNN_MULTI)
    weh = params["enc1_w"][:H_SIZE, :]                               # (64, 64)
    wee = (params["enc1_w"][H_SIZE:, :]                              # rows = c*4+s
           .reshape(2 * CNN_MULTI, N_POS2, MLP_HIDDEN)
           .transpose(1, 0, 2))                                      # (4, 16, 64)
    be1 = params["enc1_b"].reshape(1, MLP_HIDDEN)
    we2 = params["enc2_w"]                                           # (64, 64)
    be2 = params["enc2_b"].reshape(1, Z_FLAT)
    wdh = params["dec1_w"][:H_SIZE, :]                               # (64, 64)
    wdz = params["dec1_w"][H_SIZE:, :]                               # (64, 64)
    bd1 = params["dec1_b"].reshape(1, MLP_HIDDEN)
    wd2 = params["dec2_w"]                                           # (64, 16)
    bd2 = params["dec2_b"].reshape(1, 2 * CNN_MULTI)
    wt1 = (params["deconv1_w"]                                       # (16, 128)
           .transpose(0, 2, 3, 1)
           .reshape(2 * CNN_MULTI, DC1_POS * CNN_MULTI))
    bt1 = jnp.tile(params["deconv1_b"], DC1_POS).reshape(1, DC1_POS * CNN_MULTI)
    wt2 = params["deconv2_w"].reshape(CNN_MULTI, DC2_BLK)            # (8, 64)
    bt2 = jnp.repeat(params["deconv2_b"], K_DECONV * K_DECONV).reshape(1, DC2_BLK)
    dup = jnp.asarray(_build_dup_matrix())                           # (128, 98)
    return dict(w1=w1, b1=b1, w2=w2, b2=b2, weh=weh, wee=wee, be1=be1,
                we2=we2, be2=be2, wdh=wdh, wdz=wdz, bd1=bd1, wd2=wd2,
                bd2=bd2, wt1=wt1, bt1=bt1, wt2=wt2, bt2=bt2, dup=dup)


# -------------------------------- forward -----------------------------------
@jax.jit
def autoencoder_forward(kparams, x, h, sample_key):
    """Returns (x_dist=(mean, scale), z, z_dist=(logits, probs))."""
    bx = x.shape[0]
    assert bx == B, "kernel is specialized for the module-level batch size"

    # conv1 im2col as ONE fused op; feature order = (c_in, kh, kw), matching
    # the PyTorch weight.reshape(Cout, Cin*k*k) unfolding used above.
    pats = jax.lax.conv_general_dilated_patches(
        x, (K_CONV, K_CONV), (S_CONV, S_CONV), padding="VALID")     # (B, 64, 7, 7)
    pats = pats.transpose(0, 2, 3, 1).reshape(bx * CONV1_OUT * CONV1_OUT, PATCH_F)

    # Gumbel-max == categorical sampling on logits (same distribution as
    # jax.random.categorical); noise generated on host, argmax in-kernel.
    g = jax.random.gumbel(sample_key, (bx, Z_FLAT), dtype=jnp.float32)

    zlog, zprob, zhot, mean_slab = _fused_call(pats, h, g, kparams)

    z_logits = zlog.reshape(bx, LATENT_N, LATENT_C)
    probs = zprob.reshape(bx, LATENT_N, LATENT_C)
    # straight-through estimator: forward value == one-hot sample
    z = (zhot + zprob - jax.lax.stop_gradient(zprob)).reshape(bx, LATENT_N, LATENT_C)

    # single host-side re-layout of the lane-dense decoder slab back to NCHW
    mean = (mean_slab
            .reshape(bx, K_DECONV, K_DECONV, CHANNELS, K_DECONV, K_DECONV)
            .transpose(0, 3, 1, 4, 2, 5)
            .reshape(bx, CHANNELS, IMG, IMG))

    x_dist = (mean, jnp.ones_like(mean))        # Normal(mean, scale=1)
    z_dist = (z_logits, probs)                  # OneHotCategorical(logits=...)
    return x_dist, z, z_dist


# --------------------------------- main --------------------------------------
if __name__ == "__main__":
    root = jax.random.PRNGKey(0)
    k_params, k_x, k_h, k_sample = jax.random.split(root, 4)

    params = init_params(k_params)
    kparams = prepare_kernel_params(params)      # one-time weight prep
    x = jax.random.normal(k_x, (B, CHANNELS, IMG, IMG), dtype=jnp.float32)
    h = jax.random.normal(k_h, (B, H_SIZE), dtype=jnp.float32)

    (x_mean, x_scale), z, (z_logits, z_probs) = autoencoder_forward(
        kparams, x, h, k_sample)
    jax.block_until_ready((x_mean, x_scale, z, z_logits, z_probs))

    assert x_mean.shape == (B, CHANNELS, IMG, IMG)
    assert x_scale.shape == (B, CHANNELS, IMG, IMG)
    assert z.shape == (B, LATENT_N, LATENT_C)
    assert z_logits.shape == (B, LATENT_N, LATENT_C)
    assert z_probs.shape == (B, LATENT_N, LATENT_C)
    assert bool(jnp.all(jnp.isfinite(x_mean)))
    assert bool(jnp.all(jnp.isfinite(z_logits)))
    print("KERNEL_OK")
</pallas_src>

<mosaic_0001>
module attributes {stable_mosaic.version = 11 : i64} {
  func.func @_fused_forward_kernel(%arg0: memref<98x64xf32, #tpu.memory_space<vmem>>, %arg1: memref<128x98xf32, #tpu.memory_space<vmem>>, %arg2: memref<2x64xf32, #tpu.memory_space<vmem>>, %arg3: memref<2x64xf32, #tpu.memory_space<vmem>>, %arg4: memref<64x8xf32, #tpu.memory_space<vmem>>, %arg5: memref<1x8xf32, #tpu.memory_space<vmem>>, %arg6: memref<16x8x16xf32, #tpu.memory_space<vmem>>, %arg7: memref<1x16xf32, #tpu.memory_space<vmem>>, %arg8: memref<64x64xf32, #tpu.memory_space<vmem>>, %arg9: memref<4x16x64xf32, #tpu.memory_space<vmem>>, %arg10: memref<1x64xf32, #tpu.memory_space<vmem>>, %arg11: memref<64x64xf32, #tpu.memory_space<vmem>>, %arg12: memref<1x64xf32, #tpu.memory_space<vmem>>, %arg13: memref<64x64xf32, #tpu.memory_space<vmem>>, %arg14: memref<64x64xf32, #tpu.memory_space<vmem>>, %arg15: memref<1x64xf32, #tpu.memory_space<vmem>>, %arg16: memref<64x16xf32, #tpu.memory_space<vmem>>, %arg17: memref<1x16xf32, #tpu.memory_space<vmem>>, %arg18: memref<16x128xf32, #tpu.memory_space<vmem>>, %arg19: memref<1x128xf32, #tpu.memory_space<vmem>>, %arg20: memref<8x64xf32, #tpu.memory_space<vmem>>, %arg21: memref<1x64xf32, #tpu.memory_space<vmem>>, %arg22: memref<2x64xf32, #tpu.memory_space<vmem>>, %arg23: memref<2x64xf32, #tpu.memory_space<vmem>>, %arg24: memref<2x64xf32, #tpu.memory_space<vmem>>, %arg25: memref<2x1024xf32, #tpu.memory_space<vmem>>) attributes {dimension_semantics = [], scalar_prefetch = 0 : i64, scratch_operands = 0 : i64, tpu.core_type = #tpu.core_type<tc>} {
    %c0 = arith.constant 0 : index
    %c0_0 = arith.constant 0 : index
    %0 = vector.load %arg0[%c0, %c0_0] : memref<98x64xf32, #tpu.memory_space<vmem>>, vector<98x64xf32>
    %c0_1 = arith.constant 0 : index
    %c0_2 = arith.constant 0 : index
    %1 = vector.load %arg4[%c0_1, %c0_2] : memref<64x8xf32, #tpu.memory_space<vmem>>, vector<64x8xf32>
    %cst = arith.constant dense<0.000000e+00> : vector<98x8xf32>
    %2 = tpu.matmul %0, %1, %cst {dimension_numbers = #tpu.dot_dimension_numbers<[1], [0], [0], [1], [0, 0, 1, 1], [], []>} : vector<98x64xf32>, vector<64x8xf32>, vector<98x8xf32> -> vector<98x8xf32>
    %c0_3 = arith.constant 0 : index
    %c0_4 = arith.constant 0 : index
    %3 = vector.load %arg5[%c0_3, %c0_4] : memref<1x8xf32, #tpu.memory_space<vmem>>, vector<1x8xf32>
    %4 = vector.broadcast %3 : vector<1x8xf32> to vector<98x8xf32>
    %5 = arith.addf %2, %4 : vector<98x8xf32>
    %cst_5 = arith.constant 0.000000e+00 : f32
    %6 = vector.broadcast %cst_5 : f32 to vector<98x8xf32>
    %7 = arith.cmpf ogt, %5, %6 : vector<98x8xf32>
    %cst_6 = arith.constant 0.000000e+00 : f32
    %8 = vector.broadcast %cst_6 : f32 to vector<98x8xf32>
    %9 = arith.minimumf %5, %8 : vector<98x8xf32>
    %10 = math.exp %9 : vector<98x8xf32>
    %cst_7 = arith.constant 1.000000e+00 : f32
    %11 = vector.broadcast %cst_7 : f32 to vector<98x8xf32>
    %12 = arith.subf %10, %11 : vector<98x8xf32>
    %13 = arith.select %7, %5, %12 : vector<98x8xi1>, vector<98x8xf32>
    %c0_8 = arith.constant 0 : index
    %c0_9 = arith.constant 0 : index
    %14 = vector.load %arg1[%c0_8, %c0_9] : memref<128x98xf32, #tpu.memory_space<vmem>>, vector<128x98xf32>
    %cst_10 = arith.constant dense<0.000000e+00> : vector<128x8xf32>
    %15 = tpu.matmul %14, %13, %cst_10 {dimension_numbers = #tpu.dot_dimension_numbers<[1], [0], [0], [1], [0, 0, 1, 1], [], []>} : vector<128x98xf32>, vector<98x8xf32>, vector<128x8xf32> -> vector<128x8xf32>
    %c0_11 = arith.constant 0 : index
    %c0_12 = arith.constant 0 : index
    %16 = vector.load %arg7[%c0_11, %c0_12] : memref<1x16xf32, #tpu.memory_space<vmem>>, vector<1x16xf32>
    %17 = vector.shape_cast %16 : vector<1x16xf32> to vector<1x16xf32>
    %18 = vector.broadcast %17 : vector<1x16xf32> to vector<8x16xf32>
    %19 = vector.extract_strided_slice %15 {offsets = [0, 0], sizes = [8, 8], strides = [1, 1]} : vector<128x8xf32> to vector<8x8xf32>
    %c0_13 = arith.constant 0 : index
    %c0_14 = arith.constant 0 : index
    %c0_15 = arith.constant 0 : index
    %20 = vector.load %arg6[%c0_13, %c0_14, %c0_15] : memref<16x8x16xf32, #tpu.memory_space<vmem>>, vector<1x8x16xf32>
    %21 = vector.shape_cast %20 : vector<1x8x16xf32> to vector<8x16xf32>
    %cst_16 = arith.constant dense<0.000000e+00> : vector<8x16xf32>
    %22 = tpu.matmul %19, %21, %cst_16 {dimension_numbers = #tpu.dot_dimension_numbers<[1], [0], [0], [1], [0, 0, 1, 1], [], []>} : vector<8x8xf32>, vector<8x16xf32>, vector<8x16xf32> -> vector<8x16xf32>
    %23 = arith.addf %18, %22 : vector<8x16xf32>
    %24 = vector.extract_strided_slice %15 {offsets = [8, 0], sizes = [8, 8], strides = [1, 1]} : vector<128x8xf32> to vector<8x8xf32>
    %c1 = arith.constant 1 : index
    %c0_17 = arith.constant 0 : index
    %c0_18 = arith.constant 0 : index
    %25 = vector.load %arg6[%c1, %c0_17, %c0_18] : memref<16x8x16xf32, #tpu.memory_space<vmem>>, vector<1x8x16xf32>
    %26 = vector.shape_cast %25 : vector<1x8x16xf32> to vector<8x16xf32>
    %cst_19 = arith.constant dense<0.000000e+00> : vector<8x16xf32>
    %27 = tpu.matmul %24, %26, %cst_19 {dimension_numbers = #tpu.dot_dimension_numbers<[1], [0], [0], [1], [0, 0, 1, 1], [], []>} : vector<8x8xf32>, vector<8x16xf32>, vector<8x16xf32> -> vector<8x16xf32>
    %28 = arith.addf %23, %27 : vector<8x16xf32>
    %29 = vector.extract_strided_slice %15 {offsets = [16, 0], sizes = [8, 8], strides = [1, 1]} : vector<128x8xf32> to vector<8x8xf32>
    %c2 = arith.constant 2 : index
    %c0_20 = arith.constant 0 : index
    %c0_21 = arith.constant 0 : index
    %30 = vector.load %arg6[%c2, %c0_20, %c0_21] : memref<16x8x16xf32, #tpu.memory_space<vmem>>, vector<1x8x16xf32>
    %31 = vector.shape_cast %30 : vector<1x8x16xf32> to vector<8x16xf32>
    %cst_22 = arith.constant dense<0.000000e+00> : vector<8x16xf32>
    %32 = tpu.matmul %29, %31, %cst_22 {dimension_numbers = #tpu.dot_dimension_numbers<[1], [0], [0], [1], [0, 0, 1, 1], [], []>} : vector<8x8xf32>, vector<8x16xf32>, vector<8x16xf32> -> vector<8x16xf32>
    %33 = arith.addf %28, %32 : vector<8x16xf32>
    %34 = vector.extract_strided_slice %15 {offsets = [24, 0], sizes = [8, 8], strides = [1, 1]} : vector<128x8xf32> to vector<8x8xf32>
    %c3 = arith.constant 3 : index
    %c0_23 = arith.constant 0 : index
    %c0_24 = arith.constant 0 : index
    %35 = vector.load %arg6[%c3, %c0_23, %c0_24] : memref<16x8x16xf32, #tpu.memory_space<vmem>>, vector<1x8x16xf32>
    %36 = vector.shape_cast %35 : vector<1x8x16xf32> to vector<8x16xf32>
    %cst_25 = arith.constant dense<0.000000e+00> : vector<8x16xf32>
    %37 = tpu.matmul %34, %36, %cst_25 {dimension_numbers = #tpu.dot_dimension_numbers<[1], [0], [0], [1], [0, 0, 1, 1], [], []>} : vector<8x8xf32>, vector<8x16xf32>, vector<8x16xf32> -> vector<8x16xf32>
    %38 = arith.addf %33, %37 : vector<8x16xf32>
    %39 = vector.extract_strided_slice %15 {offsets = [32, 0], sizes = [8, 8], strides = [1, 1]} : vector<128x8xf32> to vector<8x8xf32>
    %c4 = arith.constant 4 : index
    %c0_26 = arith.constant 0 : index
    %c0_27 = arith.constant 0 : index
    %40 = vector.load %arg6[%c4, %c0_26, %c0_27] : memref<16x8x16xf32, #tpu.memory_space<vmem>>, vector<1x8x16xf32>
    %41 = vector.shape_cast %40 : vector<1x8x16xf32> to vector<8x16xf32>
    %cst_28 = arith.constant dense<0.000000e+00> : vector<8x16xf32>
    %42 = tpu.matmul %39, %41, %cst_28 {dimension_numbers = #tpu.dot_dimension_numbers<[1], [0], [0], [1], [0, 0, 1, 1], [], []>} : vector<8x8xf32>, vector<8x16xf32>, vector<8x16xf32> -> vector<8x16xf32>
    %43 = arith.addf %38, %42 : vector<8x16xf32>
    %44 = vector.extract_strided_slice %15 {offsets = [40, 0], sizes = [8, 8], strides = [1, 1]} : vector<128x8xf32> to vector<8x8xf32>
    %c5 = arith.constant 5 : index
    %c0_29 = arith.constant 0 : index
    %c0_30 = arith.constant 0 : index
    %45 = vector.load %arg6[%c5, %c0_29, %c0_30] : memref<16x8x16xf32, #tpu.memory_space<vmem>>, vector<1x8x16xf32>
    %46 = vector.shape_cast %45 : vector<1x8x16xf32> to vector<8x16xf32>
    %cst_31 = arith.constant dense<0.000000e+00> : vector<8x16xf32>
    %47 = tpu.matmul %44, %46, %cst_31 {dimension_numbers = #tpu.dot_dimension_numbers<[1], [0], [0], [1], [0, 0, 1, 1], [], []>} : vector<8x8xf32>, vector<8x16xf32>, vector<8x16xf32> -> vector<8x16xf32>
    %48 = arith.addf %43, %47 : vector<8x16xf32>
    %49 = vector.extract_strided_slice %15 {offsets = [48, 0], sizes = [8, 8], strides = [1, 1]} : vector<128x8xf32> to vector<8x8xf32>
    %c6 = arith.constant 6 : index
    %c0_32 = arith.constant 0 : index
    %c0_33 = arith.constant 0 : index
    %50 = vector.load %arg6[%c6, %c0_32, %c0_33] : memref<16x8x16xf32, #tpu.memory_space<vmem>>, vector<1x8x16xf32>
    %51 = vector.shape_cast %50 : vector<1x8x16xf32> to vector<8x16xf32>
    %cst_34 = arith.constant dense<0.000000e+00> : vector<8x16xf32>
    %52 = tpu.matmul %49, %51, %cst_34 {dimension_numbers = #tpu.dot_dimension_numbers<[1], [0], [0], [1], [0, 0, 1, 1], [], []>} : vector<8x8xf32>, vector<8x16xf32>, vector<8x16xf32> -> vector<8x16xf32>
    %53 = arith.addf %48, %52 : vector<8x16xf32>
    %54 = vector.extract_strided_slice %15 {offsets = [56, 0], sizes = [8, 8], strides = [1, 1]} : vector<128x8xf32> to vector<8x8xf32>
    %c7 = arith.constant 7 : index
    %c0_35 = arith.constant 0 : index
    %c0_36 = arith.constant 0 : index
    %55 = vector.load %arg6[%c7, %c0_35, %c0_36] : memref<16x8x16xf32, #tpu.memory_space<vmem>>, vector<1x8x16xf32>
    %56 = vector.shape_cast %55 : vector<1x8x16xf32> to vector<8x16xf32>
    %cst_37 = arith.constant dense<0.000000e+00> : vector<8x16xf32>
    %57 = tpu.matmul %54, %56, %cst_37 {dimension_numbers = #tpu.dot_dimension_numbers<[1], [0], [0], [1], [0, 0, 1, 1], [], []>} : vector<8x8xf32>, vector<8x16xf32>, vector<8x16xf32> -> vector<8x16xf32>
    %58 = arith.addf %53, %57 : vector<8x16xf32>
    %59 = vector.extract_strided_slice %15 {offsets = [64, 0], sizes = [8, 8], strides = [1, 1]} : vector<128x8xf32> to vector<8x8xf32>
    %c8 = arith.constant 8 : index
    %c0_38 = arith.constant 0 : index
    %c0_39 = arith.constant 0 : index
    %60 = vector.load %arg6[%c8, %c0_38, %c0_39] : memref<16x8x16xf32, #tpu.memory_space<vmem>>, vector<1x8x16xf32>
    %61 = vector.shape_cast %60 : vector<1x8x16xf32> to vector<8x16xf32>
    %cst_40 = arith.constant dense<0.000000e+00> : vector<8x16xf32>
    %62 = tpu.matmul %59, %61, %cst_40 {dimension_numbers = #tpu.dot_dimension_numbers<[1], [0], [0], [1], [0, 0, 1, 1], [], []>} : vector<8x8xf32>, vector<8x16xf32>, vector<8x16xf32> -> vector<8x16xf32>
    %63 = arith.addf %58, %62 : vector<8x16xf32>
    %64 = vector.extract_strided_slice %15 {offsets = [72, 0], sizes = [8, 8], strides = [1, 1]} : vector<128x8xf32> to vector<8x8xf32>
    %c9 = arith.constant 9 : index
    %c0_41 = arith.constant 0 : index
    %c0_42 = arith.constant 0 : index
    %65 = vector.load %arg6[%c9, %c0_41, %c0_42] : memref<16x8x16xf32, #tpu.memory_space<vmem>>, vector<1x8x16xf32>
    %66 = vector.shape_cast %65 : vector<1x8x16xf32> to vector<8x16xf32>
    %cst_43 = arith.constant dense<0.000000e+00> : vector<8x16xf32>
    %67 = tpu.matmul %64, %66, %cst_43 {dimension_numbers = #tpu.dot_dimension_numbers<[1], [0], [0], [1], [0, 0, 1, 1], [], []>} : vector<8x8xf32>, vector<8x16xf32>, vector<8x16xf32> -> vector<8x16xf32>
    %68 = arith.addf %63, %67 : vector<8x16xf32>
    %69 = vector.extract_strided_slice %15 {offsets = [80, 0], sizes = [8, 8], strides = [1, 1]} : vector<128x8xf32> to vector<8x8xf32>
    %c10 = arith.constant 10 : index
    %c0_44 = arith.constant 0 : index
    %c0_45 = arith.constant 0 : index
    %70 = vector.load %arg6[%c10, %c0_44, %c0_45] : memref<16x8x16xf32, #tpu.memory_space<vmem>>, vector<1x8x16xf32>
    %71 = vector.shape_cast %70 : vector<1x8x16xf32> to vector<8x16xf32>
    %cst_46 = arith.constant dense<0.000000e+00> : vector<8x16xf32>
    %72 = tpu.matmul %69, %71, %cst_46 {dimension_numbers = #tpu.dot_dimension_numbers<[1], [0], [0], [1], [0, 0, 1, 1], [], []>} : vector<8x8xf32>, vector<8x16xf32>, vector<8x16xf32> -> vector<8x16xf32>
    %73 = arith.addf %68, %72 : vector<8x16xf32>
    %74 = vector.extract_strided_slice %15 {offsets = [88, 0], sizes = [8, 8], strides = [1, 1]} : vector<128x8xf32> to vector<8x8xf32>
    %c11 = arith.constant 11 : index
    %c0_47 = arith.constant 0 : index
    %c0_48 = arith.constant 0 : index
    %75 = vector.load %arg6[%c11, %c0_47, %c0_48] : memref<16x8x16xf32, #tpu.memory_space<vmem>>, vector<1x8x16xf32>
    %76 = vector.shape_cast %75 : vector<1x8x16xf32> to vector<8x16xf32>
    %cst_49 = arith.constant dense<0.000000e+00> : vector<8x16xf32>
    %77 = tpu.matmul %74, %76, %cst_49 {dimension_numbers = #tpu.dot_dimension_numbers<[1], [0], [0], [1], [0, 0, 1, 1], [], []>} : vector<8x8xf32>, vector<8x16xf32>, vector<8x16xf32> -> vector<8x16xf32>
    %78 = arith.addf %73, %77 : vector<8x16xf32>
    %79 = vector.extract_strided_slice %15 {offsets = [96, 0], sizes = [8, 8], strides = [1, 1]} : vector<128x8xf32> to vector<8x8xf32>
    %c12 = arith.constant 12 : index
    %c0_50 = arith.constant 0 : index
    %c0_51 = arith.constant 0 : index
    %80 = vector.load %arg6[%c12, %c0_50, %c0_51] : memref<16x8x16xf32, #tpu.memory_space<vmem>>, vector<1x8x16xf32>
    %81 = vector.shape_cast %80 : vector<1x8x16xf32> to vector<8x16xf32>
    %cst_52 = arith.constant dense<0.000000e+00> : vector<8x16xf32>
    %82 = tpu.matmul %79, %81, %cst_52 {dimension_numbers = #tpu.dot_dimension_numbers<[1], [0], [0], [1], [0, 0, 1, 1], [], []>} : vector<8x8xf32>, vector<8x16xf32>, vector<8x16xf32> -> vector<8x16xf32>
    %83 = arith.addf %78, %82 : vector<8x16xf32>
    %84 = vector.extract_strided_slice %15 {offsets = [104, 0], sizes = [8, 8], strides = [1, 1]} : vector<128x8xf32> to vector<8x8xf32>
    %c13 = arith.constant 13 : index
    %c0_53 = arith.constant 0 : index
    %c0_54 = arith.constant 0 : index
    %85 = vector.load %arg6[%c13, %c0_53, %c0_54] : memref<16x8x16xf32, #tpu.memory_space<vmem>>, vector<1x8x16xf32>
    %86 = vector.shape_cast %85 : vector<1x8x16xf32> to vector<8x16xf32>
    %cst_55 = arith.constant dense<0.000000e+00> : vector<8x16xf32>
    %87 = tpu.matmul %84, %86, %cst_55 {dimension_numbers = #tpu.dot_dimension_numbers<[1], [0], [0], [1], [0, 0, 1, 1], [], []>} : vector<8x8xf32>, vector<8x16xf32>, vector<8x16xf32> -> vector<8x16xf32>
    %88 = arith.addf %83, %87 : vector<8x16xf32>
    %89 = vector.extract_strided_slice %15 {offsets = [112, 0], sizes = [8, 8], strides = [1, 1]} : vector<128x8xf32> to vector<8x8xf32>
    %c14 = arith.constant 14 : index
    %c0_56 = arith.constant 0 : index
    %c0_57 = arith.constant 0 : index
    %90 = vector.load %arg6[%c14, %c0_56, %c0_57] : memref<16x8x16xf32, #tpu.memory_space<vmem>>, vector<1x8x16xf32>
    %91 = vector.shape_cast %90 : vector<1x8x16xf32> to vector<8x16xf32>
    %cst_58 = arith.constant dense<0.000000e+00> : vector<8x16xf32>
    %92 = tpu.matmul %89, %91, %cst_58 {dimension_numbers = #tpu.dot_dimension_numbers<[1], [0], [0], [1], [0, 0, 1, 1], [], []>} : vector<8x8xf32>, vector<8x16xf32>, vector<8x16xf32> -> vector<8x16xf32>
    %93 = arith.addf %88, %92 : vector<8x16xf32>
    %94 = vector.extract_strided_slice %15 {offsets = [120, 0], sizes = [8, 8], strides = [1, 1]} : vector<128x8xf32> to vector<8x8xf32>
    %c15 = arith.constant 15 : index
    %c0_59 = arith.constant 0 : index
    %c0_60 = arith.constant 0 : index
    %95 = vector.load %arg6[%c15, %c0_59, %c0_60] : memref<16x8x16xf32, #tpu.memory_space<vmem>>, vector<1x8x16xf32>
    %96 = vector.shape_cast %95 : vector<1x8x16xf32> to vector<8x16xf32>
    %cst_61 = arith.constant dense<0.000000e+00> : vector<8x16xf32>
    %97 = tpu.matmul %94, %96, %cst_61 {dimension_numbers = #tpu.dot_dimension_numbers<[1], [0], [0], [1], [0, 0, 1, 1], [], []>} : vector<8x8xf32>, vector<8x16xf32>, vector<8x16xf32> -> vector<8x16xf32>
    %98 = arith.addf %93, %97 : vector<8x16xf32>
    %cst_62 = arith.constant 0.000000e+00 : f32
    %99 = vector.broadcast %cst_62 : f32 to vector<8x16xf32>
    %100 = arith.cmpf ogt, %98, %99 : vector<8x16xf32>
    %cst_63 = arith.constant 0.000000e+00 : f32
    %101 = vector.broadcast %cst_63 : f32 to vector<8x16xf32>
    %102 = arith.minimumf %98, %101 : vector<8x16xf32>
    %103 = math.exp %102 : vector<8x16xf32>
    %cst_64 = arith.constant 1.000000e+00 : f32
    %104 = vector.broadcast %cst_64 : f32 to vector<8x16xf32>
    %105 = arith.subf %103, %104 : vector<8x16xf32>
    %106 = arith.select %100, %98, %105 : vector<8x16xi1>, vector<8x16xf32>
    %c0_65 = arith.constant 0 : index
    %c0_66 = arith.constant 0 : index
    %107 = vector.load %arg2[%c0_65, %c0_66] : memref<2x64xf32, #tpu.memory_space<vmem>>, vector<2x64xf32>
    %c0_67 = arith.constant 0 : index
    %c0_68 = arith.constant 0 : index
    %108 = vector.load %arg8[%c0_67, %c0_68] : memref<64x64xf32, #tpu.memory_space<vmem>>, vector<64x64xf32>
    %cst_69 = arith.constant dense<0.000000e+00> : vector<2x64xf32>
    %109 = tpu.matmul %107, %108, %cst_69 {dimension_numbers = #tpu.dot_dimension_numbers<[1], [0], [0], [1], [0, 0, 1, 1], [], []>} : vector<2x64xf32>, vector<64x64xf32>, vector<2x64xf32> -> vector<2x64xf32>
    %c0_70 = arith.constant 0 : index
    %c0_71 = arith.constant 0 : index
    %110 = vector.load %arg10[%c0_70, %c0_71] : memref<1x64xf32, #tpu.memory_space<vmem>>, vector<1x64xf32>
    %111 = vector.broadcast %110 : vector<1x64xf32> to vector<2x64xf32>
    %112 = arith.addf %109, %111 : vector<2x64xf32>
    %113 = vector.extract_strided_slice %106 {offsets = [0, 0], sizes = [2, 16], strides = [1, 1]} : vector<8x16xf32> to vector<2x16xf32>
    %c0_72 = arith.constant 0 : index
    %c0_73 = arith.constant 0 : index
    %c0_74 = arith.constant 0 : index
    %114 = vector.load %arg9[%c0_72, %c0_73, %c0_74] : memref<4x16x64xf32, #tpu.memory_space<vmem>>, vector<1x16x64xf32>
    %115 = vector.shape_cast %114 : vector<1x16x64xf32> to vector<16x64xf32>
    %cst_75 = arith.constant dense<0.000000e+00> : vector<2x64xf32>
    %116 = tpu.matmul %113, %115, %cst_75 {dimension_numbers = #tpu.dot_dimension_numbers<[1], [0], [0], [1], [0, 0, 1, 1], [], []>} : vector<2x16xf32>, vector<16x64xf32>, vector<2x64xf32> -> vector<2x64xf32>
    %117 = arith.addf %112, %116 : vector<2x64xf32>
    %118 = vector.extract_strided_slice %106 {offsets = [2, 0], sizes = [2, 16], strides = [1, 1]} : vector<8x16xf32> to vector<2x16xf32>
    %c1_76 = arith.constant 1 : index
    %c0_77 = arith.constant 0 : index
    %c0_78 = arith.constant 0 : index
    %119 = vector.load %arg9[%c1_76, %c0_77, %c0_78] : memref<4x16x64xf32, #tpu.memory_space<vmem>>, vector<1x16x64xf32>
    %120 = vector.shape_cast %119 : vector<1x16x64xf32> to vector<16x64xf32>
    %cst_79 = arith.constant dense<0.000000e+00> : vector<2x64xf32>
    %121 = tpu.matmul %118, %120, %cst_79 {dimension_numbers = #tpu.dot_dimension_numbers<[1], [0], [0], [1], [0, 0, 1, 1], [], []>} : vector<2x16xf32>, vector<16x64xf32>, vector<2x64xf32> -> vector<2x64xf32>
    %122 = arith.addf %117, %121 : vector<2x64xf32>
    %123 = vector.extract_strided_slice %106 {offsets = [4, 0], sizes = [2, 16], strides = [1, 1]} : vector<8x16xf32> to vector<2x16xf32>
    %c2_80 = arith.constant 2 : index
    %c0_81 = arith.constant 0 : index
    %c0_82 = arith.constant 0 : index
    %124 = vector.load %arg9[%c2_80, %c0_81, %c0_82] : memref<4x16x64xf32, #tpu.memory_space<vmem>>, vector<1x16x64xf32>
    %125 = vector.shape_cast %124 : vector<1x16x64xf32> to vector<16x64xf32>
    %cst_83 = arith.constant dense<0.000000e+00> : vector<2x64xf32>
    %126 = tpu.matmul %123, %125, %cst_83 {dimension_numbers = #tpu.dot_dimension_numbers<[1], [0], [0], [1], [0, 0, 1, 1], [], []>} : vector<2x16xf32>, vector<16x64xf32>, vector<2x64xf32> -> vector<2x64xf32>
    %127 = arith.addf %122, %126 : vector<2x64xf32>
    %128 = vector.extract_strided_slice %106 {offsets = [6, 0], sizes = [2, 16], strides = [1, 1]} : vector<8x16xf32> to vector<2x16xf32>
    %c3_84 = arith.constant 3 : index
    %c0_85 = arith.constant 0 : index
    %c0_86 = arith.constant 0 : index
    %129 = vector.load %arg9[%c3_84, %c0_85, %c0_86] : memref<4x16x64xf32, #tpu.memory_space<vmem>>, vector<1x16x64xf32>
    %130 = vector.shape_cast %129 : vector<1x16x64xf32> to vector<16x64xf32>
    %cst_87 = arith.constant dense<0.000000e+00> : vector<2x64xf32>
    %131 = tpu.matmul %128, %130, %cst_87 {dimension_numbers = #tpu.dot_dimension_numbers<[1], [0], [0], [1], [0, 0, 1, 1], [], []>} : vector<2x16xf32>, vector<16x64xf32>, vector<2x64xf32> -> vector<2x64xf32>
    %132 = arith.addf %127, %131 : vector<2x64xf32>
    %cst_88 = arith.constant 0.000000e+00 : f32
    %133 = vector.broadcast %cst_88 : f32 to vector<2x64xf32>
    %134 = arith.cmpf ogt, %132, %133 : vector<2x64xf32>
    %cst_89 = arith.constant 0.000000e+00 : f32
    %135 = vector.broadcast %cst_89 : f32 to vector<2x64xf32>
    %136 = arith.minimumf %132, %135 : vector<2x64xf32>
    %137 = math.exp %136 : vector<2x64xf32>
    %cst_90 = arith.constant 1.000000e+00 : f32
    %138 = vector.broadcast %cst_90 : f32 to vector<2x64xf32>
    %139 = arith.subf %137, %138 : vector<2x64xf32>
    %140 = arith.select %134, %132, %139 : vector<2x64xi1>, vector<2x64xf32>
    %c0_91 = arith.constant 0 : index
    %c0_92 = arith.constant 0 : index
    %141 = vector.load %arg11[%c0_91, %c0_92] : memref<64x64xf32, #tpu.memory_space<vmem>>, vector<64x64xf32>
    %cst_93 = arith.constant dense<0.000000e+00> : vector<2x64xf32>
    %142 = tpu.matmul %140, %141, %cst_93 {dimension_numbers = #tpu.dot_dimension_numbers<[1], [0], [0], [1], [0, 0, 1, 1], [], []>} : vector<2x64xf32>, vector<64x64xf32>, vector<2x64xf32> -> vector<2x64xf32>
    %c0_94 = arith.constant 0 : index
    %c0_95 = arith.constant 0 : index
    %143 = vector.load %arg12[%c0_94, %c0_95] : memref<1x64xf32, #tpu.memory_space<vmem>>, vector<1x64xf32>
    %144 = vector.broadcast %143 : vector<1x64xf32> to vector<2x64xf32>
    %145 = arith.addf %142, %144 : vector<2x64xf32>
    %c0_96 = arith.constant 0 : index
    %c0_97 = arith.constant 0 : index
    %146 = vector.load %arg22[%c0_96, %c0_97] : memref<2x64xf32, #tpu.memory_space<vmem>>, vector<2x64xf32>
    tpu.vector_store %arg22[%c0_96, %c0_97], %145 {strides = array<i32>} : memref<2x64xf32, #tpu.memory_space<vmem>>, vector<2x64xf32>,
    %c0_98 = arith.constant 0 : index
    %c0_99 = arith.constant 0 : index
    %147 = vector.load %arg3[%c0_98, %c0_99] : memref<2x64xf32, #tpu.memory_space<vmem>>, vector<2x64xf32>
    %148 = arith.addf %145, %147 : vector<2x64xf32>
    %c0_100 = arith.constant 0 : index
    %c0_101 = arith.constant 0 : index
    %149 = vector.load %arg13[%c0_100, %c0_101] : memref<64x64xf32, #tpu.memory_space<vmem>>, vector<64x64xf32>
    %cst_102 = arith.constant dense<0.000000e+00> : vector<2x64xf32>
    %150 = tpu.matmul %107, %149, %cst_102 {dimension_numbers = #tpu.dot_dimension_numbers<[1], [0], [0], [1], [0, 0, 1, 1], [], []>} : vector<2x64xf32>, vector<64x64xf32>, vector<2x64xf32> -> vector<2x64xf32>
    %c0_103 = arith.constant 0 : index
    %c0_104 = arith.constant 0 : index
    %151 = vector.load %arg15[%c0_103, %c0_104] : memref<1x64xf32, #tpu.memory_space<vmem>>, vector<1x64xf32>
    %152 = vector.broadcast %151 : vector<1x64xf32> to vector<2x64xf32>
    %153 = arith.addf %150, %152 : vector<2x64xf32>
    %154 = vector.extract_strided_slice %145 {offsets = [0, 0], sizes = [2, 8], strides = [1, 1]} : vector<2x64xf32> to vector<2x8xf32>
    %cst_105 = arith.constant dense<0xFF800000> : vector<2xf32>
    %155 = vector.multi_reduction <maximumf>, %154, %cst_105 [1] : vector<2x8xf32> to vector<2xf32>
    %156 = vector.shape_cast %155 : vector<2xf32> to vector<2x1xf32>
    %157 = vector.broadcast %156 : vector<2x1xf32> to vector<2x8xf32>
    %158 = arith.subf %154, %157 : vector<2x8xf32>
    %159 = math.exp %158 : vector<2x8xf32>
    %cst_106 = arith.constant dense<0.000000e+00> : vector<2xf32>
    %160 = vector.multi_reduction <add>, %159, %cst_106 [1] : vector<2x8xf32> to vector<2xf32>
    %161 = vector.shape_cast %160 : vector<2xf32> to vector<2x1xf32>
    %162 = vector.broadcast %161 : vector<2x1xf32> to vector<2x8xf32>
    %163 = arith.divf %159, %162 : vector<2x8xf32>
    %c0_107 = arith.constant 0 : index
    %c0_108 = arith.constant 0 : index
    %164 = vector.load %arg23[%c0_107, %c0_108] : memref<2x64xf32, #tpu.memory_space<vmem>>, vector<2x8xf32>
    tpu.vector_store %arg23[%c0_107, %c0_108], %163 {strides = array<i32>} : memref<2x64xf32, #tpu.memory_space<vmem>>, vector<2x8xf32>,
    %165 = vector.extract_strided_slice %148 {offsets = [0, 0], sizes = [2, 8], strides = [1, 1]} : vector<2x64xf32> to vector<2x8xf32>
    %cst_109 = arith.constant dense<0xFF800000> : vector<2xf32>
    %166 = vector.multi_reduction <maximumf>, %165, %cst_109 [1] : vector<2x8xf32> to vector<2xf32>
    %167 = vector.shape_cast %166 : vector<2xf32> to vector<2x1xf32>
    %168 = vector.broadcast %167 : vector<2x1xf32> to vector<2x8xf32>
    %169 = arith.cmpf oge, %165, %168 : vector<2x8xf32>
    %170 = arith.extui %169 : vector<2x8xi1> to vector<2x8xi32>
    %171 = arith.sitofp %170 : vector<2x8xi32> to vector<2x8xf32>
    %c0_110 = arith.constant 0 : index
    %c0_111 = arith.constant 0 : index
    %172 = vector.load %arg24[%c0_110, %c0_111] : memref<2x64xf32, #tpu.memory_space<vmem>>, vector<2x8xf32>
    tpu.vector_store %arg24[%c0_110, %c0_111], %171 {strides = array<i32>} : memref<2x64xf32, #tpu.memory_space<vmem>>, vector<2x8xf32>,
    %c0_112 = arith.constant 0 : index
    %c0_113 = arith.constant 0 : index
    %173 = vector.load %arg14[%c0_112, %c0_113] : memref<64x64xf32, #tpu.memory_space<vmem>>, vector<8x64xf32>
    %cst_114 = arith.constant dense<0.000000e+00> : vector<2x64xf32>
    %174 = tpu.matmul %171, %173, %cst_114 {dimension_numbers = #tpu.dot_dimension_numbers<[1], [0], [0], [1], [0, 0, 1, 1], [], []>} : vector<2x8xf32>, vector<8x64xf32>, vector<2x64xf32> -> vector<2x64xf32>
    %175 = arith.addf %153, %174 : vector<2x64xf32>
    %176 = vector.extract_strided_slice %145 {offsets = [0, 8], sizes = [2, 8], strides = [1, 1]} : vector<2x64xf32> to vector<2x8xf32>
    %cst_115 = arith.constant dense<0xFF800000> : vector<2xf32>
    %177 = vector.multi_reduction <maximumf>, %176, %cst_115 [1] : vector<2x8xf32> to vector<2xf32>
    %178 = vector.shape_cast %177 : vector<2xf32> to vector<2x1xf32>
    %179 = vector.broadcast %178 : vector<2x1xf32> to vector<2x8xf32>
    %180 = arith.subf %176, %179 : vector<2x8xf32>
    %181 = math.exp %180 : vector<2x8xf32>
    %cst_116 = arith.constant dense<0.000000e+00> : vector<2xf32>
    %182 = vector.multi_reduction <add>, %181, %cst_116 [1] : vector<2x8xf32> to vector<2xf32>
    %183 = vector.shape_cast %182 : vector<2xf32> to vector<2x1xf32>
    %184 = vector.broadcast %183 : vector<2x1xf32> to vector<2x8xf32>
    %185 = arith.divf %181, %184 : vector<2x8xf32>
    %c0_117 = arith.constant 0 : index
    %c8_118 = arith.constant 8 : index
    %186 = vector.load %arg23[%c0_117, %c8_118] : memref<2x64xf32, #tpu.memory_space<vmem>>, vector<2x8xf32>
    tpu.vector_store %arg23[%c0_117, %c8_118], %185 {strides = array<i32>} : memref<2x64xf32, #tpu.memory_space<vmem>>, vector<2x8xf32>,
    %187 = vector.extract_strided_slice %148 {offsets = [0, 8], sizes = [2, 8], strides = [1, 1]} : vector<2x64xf32> to vector<2x8xf32>
    %cst_119 = arith.constant dense<0xFF800000> : vector<2xf32>
    %188 = vector.multi_reduction <maximumf>, %187, %cst_119 [1] : vector<2x8xf32> to vector<2xf32>
    %189 = vector.shape_cast %188 : vector<2xf32> to vector<2x1xf32>
    %190 = vector.broadcast %189 : vector<2x1xf32> to vector<2x8xf32>
    %191 = arith.cmpf oge, %187, %190 : vector<2x8xf32>
    %192 = arith.extui %191 : vector<2x8xi1> to vector<2x8xi32>
    %193 = arith.sitofp %192 : vector<2x8xi32> to vector<2x8xf32>
    %c0_120 = arith.constant 0 : index
    %c8_121 = arith.constant 8 : index
    %194 = vector.load %arg24[%c0_120, %c8_121] : memref<2x64xf32, #tpu.memory_space<vmem>>, vector<2x8xf32>
    tpu.vector_store %arg24[%c0_120, %c8_121], %193 {strides = array<i32>} : memref<2x64xf32, #tpu.memory_space<vmem>>, vector<2x8xf32>,
    %c8_122 = arith.constant 8 : index
    %c0_123 = arith.constant 0 : index
    %195 = vector.load %arg14[%c8_122, %c0_123] : memref<64x64xf32, #tpu.memory_space<vmem>>, vector<8x64xf32>
    %cst_124 = arith.constant dense<0.000000e+00> : vector<2x64xf32>
    %196 = tpu.matmul %193, %195, %cst_124 {dimension_numbers = #tpu.dot_dimension_numbers<[1], [0], [0], [1], [0, 0, 1, 1], [], []>} : vector<2x8xf32>, vector<8x64xf32>, vector<2x64xf32> -> vector<2x64xf32>
    %197 = arith.addf %175, %196 : vector<2x64xf32>
    %198 = vector.extract_strided_slice %145 {offsets = [0, 16], sizes = [2, 8], strides = [1, 1]} : vector<2x64xf32> to vector<2x8xf32>
    %cst_125 = arith.constant dense<0xFF800000> : vector<2xf32>
    %199 = vector.multi_reduction <maximumf>, %198, %cst_125 [1] : vector<2x8xf32> to vector<2xf32>
    %200 = vector.shape_cast %199 : vector<2xf32> to vector<2x1xf32>
    %201 = vector.broadcast %200 : vector<2x1xf32> to vector<2x8xf32>
    %202 = arith.subf %198, %201 : vector<2x8xf32>
    %203 = math.exp %202 : vector<2x8xf32>
    %cst_126 = arith.constant dense<0.000000e+00> : vector<2xf32>
    %204 = vector.multi_reduction <add>, %203, %cst_126 [1] : vector<2x8xf32> to vector<2xf32>
    %205 = vector.shape_cast %204 : vector<2xf32> to vector<2x1xf32>
    %206 = vector.broadcast %205 : vector<2x1xf32> to vector<2x8xf32>
    %207 = arith.divf %203, %206 : vector<2x8xf32>
    %c0_127 = arith.constant 0 : index
    %c16 = arith.constant 16 : index
    %208 = vector.load %arg23[%c0_127, %c16] : memref<2x64xf32, #tpu.memory_space<vmem>>, vector<2x8xf32>
    tpu.vector_store %arg23[%c0_127, %c16], %207 {strides = array<i32>} : memref<2x64xf32, #tpu.memory_space<vmem>>, vector<2x8xf32>,
    %209 = vector.extract_strided_slice %148 {offsets = [0, 16], sizes = [2, 8], strides = [1, 1]} : vector<2x64xf32> to vector<2x8xf32>
    %cst_128 = arith.constant dense<0xFF800000> : vector<2xf32>
    %210 = vector.multi_reduction <maximumf>, %209, %cst_128 [1] : vector<2x8xf32> to vector<2xf32>
    %211 = vector.shape_cast %210 : vector<2xf32> to vector<2x1xf32>
    %212 = vector.broadcast %211 : vector<2x1xf32> to vector<2x8xf32>
    %213 = arith.cmpf oge, %209, %212 : vector<2x8xf32>
    %214 = arith.extui %213 : vector<2x8xi1> to vector<2x8xi32>
    %215 = arith.sitofp %214 : vector<2x8xi32> to vector<2x8xf32>
    %c0_129 = arith.constant 0 : index
    %c16_130 = arith.constant 16 : index
    %216 = vector.load %arg24[%c0_129, %c16_130] : memref<2x64xf32, #tpu.memory_space<vmem>>, vector<2x8xf32>
    tpu.vector_store %arg24[%c0_129, %c16_130], %215 {strides = array<i32>} : memref<2x64xf32, #tpu.memory_space<vmem>>, vector<2x8xf32>,
    %c16_131 = arith.constant 16 : index
    %c0_132 = arith.constant 0 : index
    %217 = vector.load %arg14[%c16_131, %c0_132] : memref<64x64xf32, #tpu.memory_space<vmem>>, vector<8x64xf32>
    %cst_133 = arith.constant dense<0.000000e+00> : vector<2x64xf32>
    %218 = tpu.matmul %215, %217, %cst_133 {dimension_numbers = #tpu.dot_dimension_numbers<[1], [0], [0], [1], [0, 0, 1, 1], [], []>} : vector<2x8xf32>, vector<8x64xf32>, vector<2x64xf32> -> vector<2x64xf32>
    %219 = arith.addf %197, %218 : vector<2x64xf32>
    %220 = vector.extract_strided_slice %145 {offsets = [0, 24], sizes = [2, 8], strides = [1, 1]} : vector<2x64xf32> to vector<2x8xf32>
    %cst_134 = arith.constant dense<0xFF800000> : vector<2xf32>
    %221 = vector.multi_reduction <maximumf>, %220, %cst_134 [1] : vector<2x8xf32> to vector<2xf32>
    %222 = vector.shape_cast %221 : vector<2xf32> to vector<2x1xf32>
    %223 = vector.broadcast %222 : vector<2x1xf32> to vector<2x8xf32>
    %224 = arith.subf %220, %223 : vector<2x8xf32>
    %225 = math.exp %224 : vector<2x8xf32>
    %cst_135 = arith.constant dense<0.000000e+00> : vector<2xf32>
    %226 = vector.multi_reduction <add>, %225, %cst_135 [1] : vector<2x8xf32> to vector<2xf32>
    %227 = vector.shape_cast %226 : vector<2xf32> to vector<2x1xf32>
    %228 = vector.broadcast %227 : vector<2x1xf32> to vector<2x8xf32>
    %229 = arith.divf %225, %228 : vector<2x8xf32>
    %c0_136 = arith.constant 0 : index
    %c24 = arith.constant 24 : index
    %230 = vector.load %arg23[%c0_136, %c24] : memref<2x64xf32, #tpu.memory_space<vmem>>, vector<2x8xf32>
    tpu.vector_store %arg23[%c0_136, %c24], %229 {strides = array<i32>} : memref<2x64xf32, #tpu.memory_space<vmem>>, vector<2x8xf32>,
    %231 = vector.extract_strided_slice %148 {offsets = [0, 24], sizes = [2, 8], strides = [1, 1]} : vector<2x64xf32> to vector<2x8xf32>
    %cst_137 = arith.constant dense<0xFF800000> : vector<2xf32>
    %232 = vector.multi_reduction <maximumf>, %231, %cst_137 [1] : vector<2x8xf32> to vector<2xf32>
    %233 = vector.shape_cast %232 : vector<2xf32> to vector<2x1xf32>
    %234 = vector.broadcast %233 : vector<2x1xf32> to vector<2x8xf32>
    %235 = arith.cmpf oge, %231, %234 : vector<2x8xf32>
    %236 = arith.extui %235 : vector<2x8xi1> to vector<2x8xi32>
    %237 = arith.sitofp %236 : vector<2x8xi32> to vector<2x8xf32>
    %c0_138 = arith.constant 0 : index
    %c24_139 = arith.constant 24 : index
    %238 = vector.load %arg24[%c0_138, %c24_139] : memref<2x64xf32, #tpu.memory_space<vmem>>, vector<2x8xf32>
    tpu.vector_store %arg24[%c0_138, %c24_139], %237 {strides = array<i32>} : memref<2x64xf32, #tpu.memory_space<vmem>>, vector<2x8xf32>,
    %c24_140 = arith.constant 24 : index
    %c0_141 = arith.constant 0 : index
    %239 = vector.load %arg14[%c24_140, %c0_141] : memref<64x64xf32, #tpu.memory_space<vmem>>, vector<8x64xf32>
    %cst_142 = arith.constant dense<0.000000e+00> : vector<2x64xf32>
    %240 = tpu.matmul %237, %239, %cst_142 {dimension_numbers = #tpu.dot_dimension_numbers<[1], [0], [0], [1], [0, 0, 1, 1], [], []>} : vector<2x8xf32>, vector<8x64xf32>, vector<2x64xf32> -> vector<2x64xf32>
    %241 = arith.addf %219, %240 : vector<2x64xf32>
    %242 = vector.extract_strided_slice %145 {offsets = [0, 32], sizes = [2, 8], strides = [1, 1]} : vector<2x64xf32> to vector<2x8xf32>
    %cst_143 = arith.constant dense<0xFF800000> : vector<2xf32>
    %243 = vector.multi_reduction <maximumf>, %242, %cst_143 [1] : vector<2x8xf32> to vector<2xf32>
    %244 = vector.shape_cast %243 : vector<2xf32> to vector<2x1xf32>
    %245 = vector.broadcast %244 : vector<2x1xf32> to vector<2x8xf32>
    %246 = arith.subf %242, %245 : vector<2x8xf32>
    %247 = math.exp %246 : vector<2x8xf32>
    %cst_144 = arith.constant dense<0.000000e+00> : vector<2xf32>
    %248 = vector.multi_reduction <add>, %247, %cst_144 [1] : vector<2x8xf32> to vector<2xf32>
    %249 = vector.shape_cast %248 : vector<2xf32> to vector<2x1xf32>
    %250 = vector.broadcast %249 : vector<2x1xf32> to vector<2x8xf32>
    %251 = arith.divf %247, %250 : vector<2x8xf32>
    %c0_145 = arith.constant 0 : index
    %c32 = arith.constant 32 : index
    %252 = vector.load %arg23[%c0_145, %c32] : memref<2x64xf32, #tpu.memory_space<vmem>>, vector<2x8xf32>
    tpu.vector_store %arg23[%c0_145, %c32], %251 {strides = array<i32>} : memref<2x64xf32, #tpu.memory_space<vmem>>, vector<2x8xf32>,
    %253 = vector.extract_strided_slice %148 {offsets = [0, 32], sizes = [2, 8], strides = [1, 1]} : vector<2x64xf32> to vector<2x8xf32>
    %cst_146 = arith.constant dense<0xFF800000> : vector<2xf32>
    %254 = vector.multi_reduction <maximumf>, %253, %cst_146 [1] : vector<2x8xf32> to vector<2xf32>
    %255 = vector.shape_cast %254 : vector<2xf32> to vector<2x1xf32>
    %256 = vector.broadcast %255 : vector<2x1xf32> to vector<2x8xf32>
    %257 = arith.cmpf oge, %253, %256 : vector<2x8xf32>
    %258 = arith.extui %257 : vector<2x8xi1> to vector<2x8xi32>
    %259 = arith.sitofp %258 : vector<2x8xi32> to vector<2x8xf32>
    %c0_147 = arith.constant 0 : index
    %c32_148 = arith.constant 32 : index
    %260 = vector.load %arg24[%c0_147, %c32_148] : memref<2x64xf32, #tpu.memory_space<vmem>>, vector<2x8xf32>
    tpu.vector_store %arg24[%c0_147, %c32_148], %259 {strides = array<i32>} : memref<2x64xf32, #tpu.memory_space<vmem>>, vector<2x8xf32>,
    %c32_149 = arith.constant 32 : index
    %c0_150 = arith.constant 0 : index
    %261 = vector.load %arg14[%c32_149, %c0_150] : memref<64x64xf32, #tpu.memory_space<vmem>>, vector<8x64xf32>
    %cst_151 = arith.constant dense<0.000000e+00> : vector<2x64xf32>
    %262 = tpu.matmul %259, %261, %cst_151 {dimension_numbers = #tpu.dot_dimension_numbers<[1], [0], [0], [1], [0, 0, 1, 1], [], []>} : vector<2x8xf32>, vector<8x64xf32>, vector<2x64xf32> -> vector<2x64xf32>
    %263 = arith.addf %241, %262 : vector<2x64xf32>
    %264 = vector.extract_strided_slice %145 {offsets = [0, 40], sizes = [2, 8], strides = [1, 1]} : vector<2x64xf32> to vector<2x8xf32>
    %cst_152 = arith.constant dense<0xFF800000> : vector<2xf32>
    %265 = vector.multi_reduction <maximumf>, %264, %cst_152 [1] : vector<2x8xf32> to vector<2xf32>
    %266 = vector.shape_cast %265 : vector<2xf32> to vector<2x1xf32>
    %267 = vector.broadcast %266 : vector<2x1xf32> to vector<2x8xf32>
    %268 = arith.subf %264, %267 : vector<2x8xf32>
    %269 = math.exp %268 : vector<2x8xf32>
    %cst_153 = arith.constant dense<0.000000e+00> : vector<2xf32>
    %270 = vector.multi_reduction <add>, %269, %cst_153 [1] : vector<2x8xf32> to vector<2xf32>
    %271 = vector.shape_cast %270 : vector<2xf32> to vector<2x1xf32>
    %272 = vector.broadcast %271 : vector<2x1xf32> to vector<2x8xf32>
    %273 = arith.divf %269, %272 : vector<2x8xf32>
    %c0_154 = arith.constant 0 : index
    %c40 = arith.constant 40 : index
    %274 = vector.load %arg23[%c0_154, %c40] : memref<2x64xf32, #tpu.memory_space<vmem>>, vector<2x8xf32>
    tpu.vector_store %arg23[%c0_154, %c40], %273 {strides = array<i32>} : memref<2x64xf32, #tpu.memory_space<vmem>>, vector<2x8xf32>,
    %275 = vector.extract_strided_slice %148 {offsets = [0, 40], sizes = [2, 8], strides = [1, 1]} : vector<2x64xf32> to vector<2x8xf32>
    %cst_155 = arith.constant dense<0xFF800000> : vector<2xf32>
    %276 = vector.multi_reduction <maximumf>, %275, %cst_155 [1] : vector<2x8xf32> to vector<2xf32>
    %277 = vector.shape_cast %276 : vector<2xf32> to vector<2x1xf32>
    %278 = vector.broadcast %277 : vector<2x1xf32> to vector<2x8xf32>
    %279 = arith.cmpf oge, %275, %278 : vector<2x8xf32>
    %280 = arith.extui %279 : vector<2x8xi1> to vector<2x8xi32>
    %281 = arith.sitofp %280 : vector<2x8xi32> to vector<2x8xf32>
    %c0_156 = arith.constant 0 : index
    %c40_157 = arith.constant 40 : index
    %282 = vector.load %arg24[%c0_156, %c40_157] : memref<2x64xf32, #tpu.memory_space<vmem>>, vector<2x8xf32>
    tpu.vector_store %arg24[%c0_156, %c40_157], %281 {strides = array<i32>} : memref<2x64xf32, #tpu.memory_space<vmem>>, vector<2x8xf32>,
    %c40_158 = arith.constant 40 : index
    %c0_159 = arith.constant 0 : index
    %283 = vector.load %arg14[%c40_158, %c0_159] : memref<64x64xf32, #tpu.memory_space<vmem>>, vector<8x64xf32>
    %cst_160 = arith.constant dense<0.000000e+00> : vector<2x64xf32>
    %284 = tpu.matmul %281, %283, %cst_160 {dimension_numbers = #tpu.dot_dimension_numbers<[1], [0], [0], [1], [0, 0, 1, 1], [], []>} : vector<2x8xf32>, vector<8x64xf32>, vector<2x64xf32> -> vector<2x64xf32>
    %285 = arith.addf %263, %284 : vector<2x64xf32>
    %286 = vector.extract_strided_slice %145 {offsets = [0, 48], sizes = [2, 8], strides = [1, 1]} : vector<2x64xf32> to vector<2x8xf32>
    %cst_161 = arith.constant dense<0xFF800000> : vector<2xf32>
    %287 = vector.multi_reduction <maximumf>, %286, %cst_161 [1] : vector<2x8xf32> to vector<2xf32>
    %288 = vector.shape_cast %287 : vector<2xf32> to vector<2x1xf32>
    %289 = vector.broadcast %288 : vector<2x1xf32> to vector<2x8xf32>
    %290 = arith.subf %286, %289 : vector<2x8xf32>
    %291 = math.exp %290 : vector<2x8xf32>
    %cst_162 = arith.constant dense<0.000000e+00> : vector<2xf32>
    %292 = vector.multi_reduction <add>, %291, %cst_162 [1] : vector<2x8xf32> to vector<2xf32>
    %293 = vector.shape_cast %292 : vector<2xf32> to vector<2x1xf32>
    %294 = vector.broadcast %293 : vector<2x1xf32> to vector<2x8xf32>
    %295 = arith.divf %291, %294 : vector<2x8xf32>
    %c0_163 = arith.constant 0 : index
    %c48 = arith.constant 48 : index
    %296 = vector.load %arg23[%c0_163, %c48] : memref<2x64xf32, #tpu.memory_space<vmem>>, vector<2x8xf32>
    tpu.vector_store %arg23[%c0_163, %c48], %295 {strides = array<i32>} : memref<2x64xf32, #tpu.memory_space<vmem>>, vector<2x8xf32>,
    %297 = vector.extract_strided_slice %148 {offsets = [0, 48], sizes = [2, 8], strides = [1, 1]} : vector<2x64xf32> to vector<2x8xf32>
    %cst_164 = arith.constant dense<0xFF800000> : vector<2xf32>
    %298 = vector.multi_reduction <maximumf>, %297, %cst_164 [1] : vector<2x8xf32> to vector<2xf32>
    %299 = vector.shape_cast %298 : vector<2xf32> to vector<2x1xf32>
    %300 = vector.broadcast %299 : vector<2x1xf32> to vector<2x8xf32>
    %301 = arith.cmpf oge, %297, %300 : vector<2x8xf32>
    %302 = arith.extui %301 : vector<2x8xi1> to vector<2x8xi32>
    %303 = arith.sitofp %302 : vector<2x8xi32> to vector<2x8xf32>
    %c0_165 = arith.constant 0 : index
    %c48_166 = arith.constant 48 : index
    %304 = vector.load %arg24[%c0_165, %c48_166] : memref<2x64xf32, #tpu.memory_space<vmem>>, vector<2x8xf32>
    tpu.vector_store %arg24[%c0_165, %c48_166], %303 {strides = array<i32>} : memref<2x64xf32, #tpu.memory_space<vmem>>, vector<2x8xf32>,
    %c48_167 = arith.constant 48 : index
    %c0_168 = arith.constant 0 : index
    %305 = vector.load %arg14[%c48_167, %c0_168] : memref<64x64xf32, #tpu.memory_space<vmem>>, vector<8x64xf32>
    %cst_169 = arith.constant dense<0.000000e+00> : vector<2x64xf32>
    %306 = tpu.matmul %303, %305, %cst_169 {dimension_numbers = #tpu.dot_dimension_numbers<[1], [0], [0], [1], [0, 0, 1, 1], [], []>} : vector<2x8xf32>, vector<8x64xf32>, vector<2x64xf32> -> vector<2x64xf32>
    %307 = arith.addf %285, %306 : vector<2x64xf32>
    %308 = vector.extract_strided_slice %145 {offsets = [0, 56], sizes = [2, 8], strides = [1, 1]} : vector<2x64xf32> to vector<2x8xf32>
    %cst_170 = arith.constant dense<0xFF800000> : vector<2xf32>
    %309 = vector.multi_reduction <maximumf>, %308, %cst_170 [1] : vector<2x8xf32> to vector<2xf32>
    %310 = vector.shape_cast %309 : vector<2xf32> to vector<2x1xf32>
    %311 = vector.broadcast %310 : vector<2x1xf32> to vector<2x8xf32>
    %312 = arith.subf %308, %311 : vector<2x8xf32>
    %313 = math.exp %312 : vector<2x8xf32>
    %cst_171 = arith.constant dense<0.000000e+00> : vector<2xf32>
    %314 = vector.multi_reduction <add>, %313, %cst_171 [1] : vector<2x8xf32> to vector<2xf32>
    %315 = vector.shape_cast %314 : vector<2xf32> to vector<2x1xf32>
    %316 = vector.broadcast %315 : vector<2x1xf32> to vector<2x8xf32>
    %317 = arith.divf %313, %316 : vector<2x8xf32>
    %c0_172 = arith.constant 0 : index
    %c56 = arith.constant 56 : index
    %318 = vector.load %arg23[%c0_172, %c56] : memref<2x64xf32, #tpu.memory_space<vmem>>, vector<2x8xf32>
    tpu.vector_store %arg23[%c0_172, %c56], %317 {strides = array<i32>} : memref<2x64xf32, #tpu.memory_space<vmem>>, vector<2x8xf32>,
    %319 = vector.extract_strided_slice %148 {offsets = [0, 56], sizes = [2, 8], strides = [1, 1]} : vector<2x64xf32> to vector<2x8xf32>
    %cst_173 = arith.constant dense<0xFF800000> : vector<2xf32>
    %320 = vector.multi_reduction <maximumf>, %319, %cst_173 [1] : vector<2x8xf32> to vector<2xf32>
    %321 = vector.shape_cast %320 : vector<2xf32> to vector<2x1xf32>
    %322 = vector.broadcast %321 : vector<2x1xf32> to vector<2x8xf32>
    %323 = arith.cmpf oge, %319, %322 : vector<2x8xf32>
    %324 = arith.extui %323 : vector<2x8xi1> to vector<2x8xi32>
    %325 = arith.sitofp %324 : vector<2x8xi32> to vector<2x8xf32>
    %c0_174 = arith.constant 0 : index
    %c56_175 = arith.constant 56 : index
    %326 = vector.load %arg24[%c0_174, %c56_175] : memref<2x64xf32, #tpu.memory_space<vmem>>, vector<2x8xf32>
    tpu.vector_store %arg24[%c0_174, %c56_175], %325 {strides = array<i32>} : memref<2x64xf32, #tpu.memory_space<vmem>>, vector<2x8xf32>,
    %c56_176 = arith.constant 56 : index
    %c0_177 = arith.constant 0 : index
    %327 = vector.load %arg14[%c56_176, %c0_177] : memref<64x64xf32, #tpu.memory_space<vmem>>, vector<8x64xf32>
    %cst_178 = arith.constant dense<0.000000e+00> : vector<2x64xf32>
    %328 = tpu.matmul %325, %327, %cst_178 {dimension_numbers = #tpu.dot_dimension_numbers<[1], [0], [0], [1], [0, 0, 1, 1], [], []>} : vector<2x8xf32>, vector<8x64xf32>, vector<2x64xf32> -> vector<2x64xf32>
    %329 = arith.addf %307, %328 : vector<2x64xf32>
    %cst_179 = arith.constant 0.000000e+00 : f32
    %330 = vector.broadcast %cst_179 : f32 to vector<2x64xf32>
    %331 = arith.cmpf ogt, %329, %330 : vector<2x64xf32>
    %cst_180 = arith.constant 0.000000e+00 : f32
    %332 = vector.broadcast %cst_180 : f32 to vector<2x64xf32>
    %333 = arith.minimumf %329, %332 : vector<2x64xf32>
    %334 = math.exp %333 : vector<2x64xf32>
    %cst_181 = arith.constant 1.000000e+00 : f32
    %335 = vector.broadcast %cst_181 : f32 to vector<2x64xf32>
    %336 = arith.subf %334, %335 : vector<2x64xf32>
    %337 = arith.select %331, %329, %336 : vector<2x64xi1>, vector<2x64xf32>
    %c0_182 = arith.constant 0 : index
    %c0_183 = arith.constant 0 : index
    %338 = vector.load %arg16[%c0_182, %c0_183] : memref<64x16xf32, #tpu.memory_space<vmem>>, vector<64x16xf32>
    %cst_184 = arith.constant dense<0.000000e+00> : vector<2x16xf32>
    %339 = tpu.matmul %337, %338, %cst_184 {dimension_numbers = #tpu.dot_dimension_numbers<[1], [0], [0], [1], [0, 0, 1, 1], [], []>} : vector<2x64xf32>, vector<64x16xf32>, vector<2x16xf32> -> vector<2x16xf32>
    %c0_185 = arith.constant 0 : index
    %c0_186 = arith.constant 0 : index
    %340 = vector.load %arg17[%c0_185, %c0_186] : memref<1x16xf32, #tpu.memory_space<vmem>>, vector<1x16xf32>
    %341 = vector.broadcast %340 : vector<1x16xf32> to vector<2x16xf32>
    %342 = arith.addf %339, %341 : vector<2x16xf32>
    %c0_187 = arith.constant 0 : index
    %c0_188 = arith.constant 0 : index
    %343 = vector.load %arg18[%c0_187, %c0_188] : memref<16x128xf32, #tpu.memory_space<vmem>>, vector<16x128xf32>
    %cst_189 = arith.constant dense<0.000000e+00> : vector<2x128xf32>
    %344 = tpu.matmul %342, %343, %cst_189 {dimension_numbers = #tpu.dot_dimension_numbers<[1], [0], [0], [1], [0, 0, 1, 1], [], []>} : vector<2x16xf32>, vector<16x128xf32>, vector<2x128xf32> -> vector<2x128xf32>
    %c0_190 = arith.constant 0 : index
    %c0_191 = arith.constant 0 : index
    %345 = vector.load %arg19[%c0_190, %c0_191] : memref<1x128xf32, #tpu.memory_space<vmem>>, vector<1x128xf32>
    %346 = vector.broadcast %345 : vector<1x128xf32> to vector<2x128xf32>
    %347 = arith.addf %344, %346 : vector<2x128xf32>
    %cst_192 = arith.constant 0.000000e+00 : f32
    %348 = vector.broadcast %cst_192 : f32 to vector<2x128xf32>
    %349 = arith.cmpf ogt, %347, %348 : vector<2x128xf32>
    %cst_193 = arith.constant 0.000000e+00 : f32
    %350 = vector.broadcast %cst_193 : f32 to vector<2x128xf32>
    %351 = arith.minimumf %347, %350 : vector<2x128xf32>
    %352 = math.exp %351 : vector<2x128xf32>
    %cst_194 = arith.constant 1.000000e+00 : f32
    %353 = vector.broadcast %cst_194 : f32 to vector<2x128xf32>
    %354 = arith.subf %352, %353 : vector<2x128xf32>
    %355 = arith.select %349, %347, %354 : vector<2x128xi1>, vector<2x128xf32>
    %356 = vector.extract_strided_slice %355 {offsets = [0, 0], sizes = [2, 8], strides = [1, 1]} : vector<2x128xf32> to vector<2x8xf32>
    %c0_195 = arith.constant 0 : index
    %c0_196 = arith.constant 0 : index
    %357 = vector.load %arg20[%c0_195, %c0_196] : memref<8x64xf32, #tpu.memory_space<vmem>>, vector<8x64xf32>
    %cst_197 = arith.constant dense<0.000000e+00> : vector<2x64xf32>
    %358 = tpu.matmul %356, %357, %cst_197 {dimension_numbers = #tpu.dot_dimension_numbers<[1], [0], [0], [1], [0, 0, 1, 1], [], []>} : vector<2x8xf32>, vector<8x64xf32>, vector<2x64xf32> -> vector<2x64xf32>
    %c0_198 = arith.constant 0 : index
    %c0_199 = arith.constant 0 : index
    %359 = vector.load %arg21[%c0_198, %c0_199] : memref<1x64xf32, #tpu.memory_space<vmem>>, vector<1x64xf32>
    %360 = vector.broadcast %359 : vector<1x64xf32> to vector<2x64xf32>
    %361 = arith.addf %358, %360 : vector<2x64xf32>
    %c0_200 = arith.constant 0 : index
    %c0_201 = arith.constant 0 : index
    %362 = vector.load %arg25[%c0_200, %c0_201] : memref<2x1024xf32, #tpu.memory_space<vmem>>, vector<2x64xf32>
    tpu.vector_store %arg25[%c0_200, %c0_201], %361 {strides = array<i32>} : memref<2x1024xf32, #tpu.memory_space<vmem>>, vector<2x64xf32>,
    %363 = vector.extract_strided_slice %355 {offsets = [0, 8], sizes = [2, 8], strides = [1, 1]} : vector<2x128xf32> to vector<2x8xf32>
    %c0_202 = arith.constant 0 : index
    %c0_203 = arith.constant 0 : index
    %364 = vector.load %arg20[%c0_202, %c0_203] : memref<8x64xf32, #tpu.memory_space<vmem>>, vector<8x64xf32>
    %cst_204 = arith.constant dense<0.000000e+00> : vector<2x64xf32>
    %365 = tpu.matmul %363, %364, %cst_204 {dimension_numbers = #tpu.dot_dimension_numbers<[1], [0], [0], [1], [0, 0, 1, 1], [], []>} : vector<2x8xf32>, vector<8x64xf32>, vector<2x64xf32> -> vector<2x64xf32>
    %c0_205 = arith.constant 0 : index
    %c0_206 = arith.constant 0 : index
    %366 = vector.load %arg21[%c0_205, %c0_206] : memref<1x64xf32, #tpu.memory_space<vmem>>, vector<1x64xf32>
    %367 = vector.broadcast %366 : vector<1x64xf32> to vector<2x64xf32>
    %368 = arith.addf %365, %367 : vector<2x64xf32>
    %c0_207 = arith.constant 0 : index
    %c64 = arith.constant 64 : index
    %369 = vector.load %arg25[%c0_207, %c64] : memref<2x1024xf32, #tpu.memory_space<vmem>>, vector<2x64xf32>
    tpu.vector_store %arg25[%c0_207, %c64], %368 {strides = array<i32>} : memref<2x1024xf32, #tpu.memory_space<vmem>>, vector<2x64xf32>,
    %370 = vector.extract_strided_slice %355 {offsets = [0, 16], sizes = [2, 8], strides = [1, 1]} : vector<2x128xf32> to vector<2x8xf32>
    %c0_208 = arith.constant 0 : index
    %c0_209 = arith.constant 0 : index
    %371 = vector.load %arg20[%c0_208, %c0_209] : memref<8x64xf32, #tpu.memory_space<vmem>>, vector<8x64xf32>
    %cst_210 = arith.constant dense<0.000000e+00> : vector<2x64xf32>
    %372 = tpu.matmul %370, %371, %cst_210 {dimension_numbers = #tpu.dot_dimension_numbers<[1], [0], [0], [1], [0, 0, 1, 1], [], []>} : vector<2x8xf32>, vector<8x64xf32>, vector<2x64xf32> -> vector<2x64xf32>
    %c0_211 = arith.constant 0 : index
    %c0_212 = arith.constant 0 : index
    %373 = vector.load %arg21[%c0_211, %c0_212] : memref<1x64xf32, #tpu.memory_space<vmem>>, vector<1x64xf32>
    %374 = vector.broadcast %373 : vector<1x64xf32> to vector<2x64xf32>
    %375 = arith.addf %372, %374 : vector<2x64xf32>
    %c0_213 = arith.constant 0 : index
    %c128 = arith.constant 128 : index
    %376 = vector.load %arg25[%c0_213, %c128] : memref<2x1024xf32, #tpu.memory_space<vmem>>, vector<2x64xf32>
    tpu.vector_store %arg25[%c0_213, %c128], %375 {strides = array<i32>} : memref<2x1024xf32, #tpu.memory_space<vmem>>, vector<2x64xf32>,
    %377 = vector.extract_strided_slice %355 {offsets = [0, 24], sizes = [2, 8], strides = [1, 1]} : vector<2x128xf32> to vector<2x8xf32>
    %c0_214 = arith.constant 0 : index
    %c0_215 = arith.constant 0 : index
    %378 = vector.load %arg20[%c0_214, %c0_215] : memref<8x64xf32, #tpu.memory_space<vmem>>, vector<8x64xf32>
    %cst_216 = arith.constant dense<0.000000e+00> : vector<2x64xf32>
    %379 = tpu.matmul %377, %378, %cst_216 {dimension_numbers = #tpu.dot_dimension_numbers<[1], [0], [0], [1], [0, 0, 1, 1], [], []>} : vector<2x8xf32>, vector<8x64xf32>, vector<2x64xf32> -> vector<2x64xf32>
    %c0_217 = arith.constant 0 : index
    %c0_218 = arith.constant 0 : index
    %380 = vector.load %arg21[%c0_217, %c0_218] : memref<1x64xf32, #tpu.memory_space<vmem>>, vector<1x64xf32>
    %381 = vector.broadcast %380 : vector<1x64xf32> to vector<2x64xf32>
    %382 = arith.addf %379, %381 : vector<2x64xf32>
    %c0_219 = arith.constant 0 : index
    %c192 = arith.constant 192 : index
    %383 = vector.load %arg25[%c0_219, %c192] : memref<2x1024xf32, #tpu.memory_space<vmem>>, vector<2x64xf32>
    tpu.vector_store %arg25[%c0_219, %c192], %382 {strides = array<i32>} : memref<2x1024xf32, #tpu.memory_space<vmem>>, vector<2x64xf32>,
    %384 = vector.extract_strided_slice %355 {offsets = [0, 32], sizes = [2, 8], strides = [1, 1]} : vector<2x128xf32> to vector<2x8xf32>
    %c0_220 = arith.constant 0 : index
    %c0_221 = arith.constant 0 : index
    %385 = vector.load %arg20[%c0_220, %c0_221] : memref<8x64xf32, #tpu.memory_space<vmem>>, vector<8x64xf32>
    %cst_222 = arith.constant dense<0.000000e+00> : vector<2x64xf32>
    %386 = tpu.matmul %384, %385, %cst_222 {dimension_numbers = #tpu.dot_dimension_numbers<[1], [0], [0], [1], [0, 0, 1, 1], [], []>} : vector<2x8xf32>, vector<8x64xf32>, vector<2x64xf32> -> vector<2x64xf32>
    %c0_223 = arith.constant 0 : index
    %c0_224 = arith.constant 0 : index
    %387 = vector.load %arg21[%c0_223, %c0_224] : memref<1x64xf32, #tpu.memory_space<vmem>>, vector<1x64xf32>
    %388 = vector.broadcast %387 : vector<1x64xf32> to vector<2x64xf32>
    %389 = arith.addf %386, %388 : vector<2x64xf32>
    %c0_225 = arith.constant 0 : index
    %c256 = arith.constant 256 : index
    %390 = vector.load %arg25[%c0_225, %c256] : memref<2x1024xf32, #tpu.memory_space<vmem>>, vector<2x64xf32>
    tpu.vector_store %arg25[%c0_225, %c256], %389 {strides = array<i32>} : memref<2x1024xf32, #tpu.memory_space<vmem>>, vector<2x64xf32>,
    %391 = vector.extract_strided_slice %355 {offsets = [0, 40], sizes = [2, 8], strides = [1, 1]} : vector<2x128xf32> to vector<2x8xf32>
    %c0_226 = arith.constant 0 : index
    %c0_227 = arith.constant 0 : index
    %392 = vector.load %arg20[%c0_226, %c0_227] : memref<8x64xf32, #tpu.memory_space<vmem>>, vector<8x64xf32>
    %cst_228 = arith.constant dense<0.000000e+00> : vector<2x64xf32>
    %393 = tpu.matmul %391, %392, %cst_228 {dimension_numbers = #tpu.dot_dimension_numbers<[1], [0], [0], [1], [0, 0, 1, 1], [], []>} : vector<2x8xf32>, vector<8x64xf32>, vector<2x64xf32> -> vector<2x64xf32>
    %c0_229 = arith.constant 0 : index
    %c0_230 = arith.constant 0 : index
    %394 = vector.load %arg21[%c0_229, %c0_230] : memref<1x64xf32, #tpu.memory_space<vmem>>, vector<1x64xf32>
    %395 = vector.broadcast %394 : vector<1x64xf32> to vector<2x64xf32>
    %396 = arith.addf %393, %395 : vector<2x64xf32>
    %c0_231 = arith.constant 0 : index
    %c320 = arith.constant 320 : index
    %397 = vector.load %arg25[%c0_231, %c320] : memref<2x1024xf32, #tpu.memory_space<vmem>>, vector<2x64xf32>
    tpu.vector_store %arg25[%c0_231, %c320], %396 {strides = array<i32>} : memref<2x1024xf32, #tpu.memory_space<vmem>>, vector<2x64xf32>,
    %398 = vector.extract_strided_slice %355 {offsets = [0, 48], sizes = [2, 8], strides = [1, 1]} : vector<2x128xf32> to vector<2x8xf32>
    %c0_232 = arith.constant 0 : index
    %c0_233 = arith.constant 0 : index
    %399 = vector.load %arg20[%c0_232, %c0_233] : memref<8x64xf32, #tpu.memory_space<vmem>>, vector<8x64xf32>
    %cst_234 = arith.constant dense<0.000000e+00> : vector<2x64xf32>
    %400 = tpu.matmul %398, %399, %cst_234 {dimension_numbers = #tpu.dot_dimension_numbers<[1], [0], [0], [1], [0, 0, 1, 1], [], []>} : vector<2x8xf32>, vector<8x64xf32>, vector<2x64xf32> -> vector<2x64xf32>
    %c0_235 = arith.constant 0 : index
    %c0_236 = arith.constant 0 : index
    %401 = vector.load %arg21[%c0_235, %c0_236] : memref<1x64xf32, #tpu.memory_space<vmem>>, vector<1x64xf32>
    %402 = vector.broadcast %401 : vector<1x64xf32> to vector<2x64xf32>
    %403 = arith.addf %400, %402 : vector<2x64xf32>
    %c0_237 = arith.constant 0 : index
    %c384 = arith.constant 384 : index
    %404 = vector.load %arg25[%c0_237, %c384] : memref<2x1024xf32, #tpu.memory_space<vmem>>, vector<2x64xf32>
    tpu.vector_store %arg25[%c0_237, %c384], %403 {strides = array<i32>} : memref<2x1024xf32, #tpu.memory_space<vmem>>, vector<2x64xf32>,
    %405 = vector.extract_strided_slice %355 {offsets = [0, 56], sizes = [2, 8], strides = [1, 1]} : vector<2x128xf32> to vector<2x8xf32>
    %c0_238 = arith.constant 0 : index
    %c0_239 = arith.constant 0 : index
    %406 = vector.load %arg20[%c0_238, %c0_239] : memref<8x64xf32, #tpu.memory_space<vmem>>, vector<8x64xf32>
    %cst_240 = arith.constant dense<0.000000e+00> : vector<2x64xf32>
    %407 = tpu.matmul %405, %406, %cst_240 {dimension_numbers = #tpu.dot_dimension_numbers<[1], [0], [0], [1], [0, 0, 1, 1], [], []>} : vector<2x8xf32>, vector<8x64xf32>, vector<2x64xf32> -> vector<2x64xf32>
    %c0_241 = arith.constant 0 : index
    %c0_242 = arith.constant 0 : index
    %408 = vector.load %arg21[%c0_241, %c0_242] : memref<1x64xf32, #tpu.memory_space<vmem>>, vector<1x64xf32>
    %409 = vector.broadcast %408 : vector<1x64xf32> to vector<2x64xf32>
    %410 = arith.addf %407, %409 : vector<2x64xf32>
    %c0_243 = arith.constant 0 : index
    %c448 = arith.constant 448 : index
    %411 = vector.load %arg25[%c0_243, %c448] : memref<2x1024xf32, #tpu.memory_space<vmem>>, vector<2x64xf32>
    tpu.vector_store %arg25[%c0_243, %c448], %410 {strides = array<i32>} : memref<2x1024xf32, #tpu.memory_space<vmem>>, vector<2x64xf32>,
    %412 = vector.extract_strided_slice %355 {offsets = [0, 64], sizes = [2, 8], strides = [1, 1]} : vector<2x128xf32> to vector<2x8xf32>
    %c0_244 = arith.constant 0 : index
    %c0_245 = arith.constant 0 : index
    %413 = vector.load %arg20[%c0_244, %c0_245] : memref<8x64xf32, #tpu.memory_space<vmem>>, vector<8x64xf32>
    %cst_246 = arith.constant dense<0.000000e+00> : vector<2x64xf32>
    %414 = tpu.matmul %412, %413, %cst_246 {dimension_numbers = #tpu.dot_dimension_numbers<[1], [0], [0], [1], [0, 0, 1, 1], [], []>} : vector<2x8xf32>, vector<8x64xf32>, vector<2x64xf32> -> vector<2x64xf32>
    %c0_247 = arith.constant 0 : index
    %c0_248 = arith.constant 0 : index
    %415 = vector.load %arg21[%c0_247, %c0_248] : memref<1x64xf32, #tpu.memory_space<vmem>>, vector<1x64xf32>
    %416 = vector.broadcast %415 : vector<1x64xf32> to vector<2x64xf32>
    %417 = arith.addf %414, %416 : vector<2x64xf32>
    %c0_249 = arith.constant 0 : index
    %c512 = arith.constant 512 : index
    %418 = vector.load %arg25[%c0_249, %c512] : memref<2x1024xf32, #tpu.memory_space<vmem>>, vector<2x64xf32>
    tpu.vector_store %arg25[%c0_249, %c512], %417 {strides = array<i32>} : memref<2x1024xf32, #tpu.memory_space<vmem>>, vector<2x64xf32>,
    %419 = vector.extract_strided_slice %355 {offsets = [0, 72], sizes = [2, 8], strides = [1, 1]} : vector<2x128xf32> to vector<2x8xf32>
    %c0_250 = arith.constant 0 : index
    %c0_251 = arith.constant 0 : index
    %420 = vector.load %arg20[%c0_250, %c0_251] : memref<8x64xf32, #tpu.memory_space<vmem>>, vector<8x64xf32>
    %cst_252 = arith.constant dense<0.000000e+00> : vector<2x64xf32>
    %421 = tpu.matmul %419, %420, %cst_252 {dimension_numbers = #tpu.dot_dimension_numbers<[1], [0], [0], [1], [0, 0, 1, 1], [], []>} : vector<2x8xf32>, vector<8x64xf32>, vector<2x64xf32> -> vector<2x64xf32>
    %c0_253 = arith.constant 0 : index
    %c0_254 = arith.constant 0 : index
    %422 = vector.load %arg21[%c0_253, %c0_254] : memref<1x64xf32, #tpu.memory_space<vmem>>, vector<1x64xf32>
    %423 = vector.broadcast %422 : vector<1x64xf32> to vector<2x64xf32>
    %424 = arith.addf %421, %423 : vector<2x64xf32>
    %c0_255 = arith.constant 0 : index
    %c576 = arith.constant 576 : index
    %425 = vector.load %arg25[%c0_255, %c576] : memref<2x1024xf32, #tpu.memory_space<vmem>>, vector<2x64xf32>
    tpu.vector_store %arg25[%c0_255, %c576], %424 {strides = array<i32>} : memref<2x1024xf32, #tpu.memory_space<vmem>>, vector<2x64xf32>,
    %426 = vector.extract_strided_slice %355 {offsets = [0, 80], sizes = [2, 8], strides = [1, 1]} : vector<2x128xf32> to vector<2x8xf32>
    %c0_256 = arith.constant 0 : index
    %c0_257 = arith.constant 0 : index
    %427 = vector.load %arg20[%c0_256, %c0_257] : memref<8x64xf32, #tpu.memory_space<vmem>>, vector<8x64xf32>
    %cst_258 = arith.constant dense<0.000000e+00> : vector<2x64xf32>
    %428 = tpu.matmul %426, %427, %cst_258 {dimension_numbers = #tpu.dot_dimension_numbers<[1], [0], [0], [1], [0, 0, 1, 1], [], []>} : vector<2x8xf32>, vector<8x64xf32>, vector<2x64xf32> -> vector<2x64xf32>
    %c0_259 = arith.constant 0 : index
    %c0_260 = arith.constant 0 : index
    %429 = vector.load %arg21[%c0_259, %c0_260] : memref<1x64xf32, #tpu.memory_space<vmem>>, vector<1x64xf32>
    %430 = vector.broadcast %429 : vector<1x64xf32> to vector<2x64xf32>
    %431 = arith.addf %428, %430 : vector<2x64xf32>
    %c0_261 = arith.constant 0 : index
    %c640 = arith.constant 640 : index
    %432 = vector.load %arg25[%c0_261, %c640] : memref<2x1024xf32, #tpu.memory_space<vmem>>, vector<2x64xf32>
    tpu.vector_store %arg25[%c0_261, %c640], %431 {strides = array<i32>} : memref<2x1024xf32, #tpu.memory_space<vmem>>, vector<2x64xf32>,
    %433 = vector.extract_strided_slice %355 {offsets = [0, 88], sizes = [2, 8], strides = [1, 1]} : vector<2x128xf32> to vector<2x8xf32>
    %c0_262 = arith.constant 0 : index
    %c0_263 = arith.constant 0 : index
    %434 = vector.load %arg20[%c0_262, %c0_263] : memref<8x64xf32, #tpu.memory_space<vmem>>, vector<8x64xf32>
    %cst_264 = arith.constant dense<0.000000e+00> : vector<2x64xf32>
    %435 = tpu.matmul %433, %434, %cst_264 {dimension_numbers = #tpu.dot_dimension_numbers<[1], [0], [0], [1], [0, 0, 1, 1], [], []>} : vector<2x8xf32>, vector<8x64xf32>, vector<2x64xf32> -> vector<2x64xf32>
    %c0_265 = arith.constant 0 : index
    %c0_266 = arith.constant 0 : index
    %436 = vector.load %arg21[%c0_265, %c0_266] : memref<1x64xf32, #tpu.memory_space<vmem>>, vector<1x64xf32>
    %437 = vector.broadcast %436 : vector<1x64xf32> to vector<2x64xf32>
    %438 = arith.addf %435, %437 : vector<2x64xf32>
    %c0_267 = arith.constant 0 : index
    %c704 = arith.constant 704 : index
    %439 = vector.load %arg25[%c0_267, %c704] : memref<2x1024xf32, #tpu.memory_space<vmem>>, vector<2x64xf32>
    tpu.vector_store %arg25[%c0_267, %c704], %438 {strides = array<i32>} : memref<2x1024xf32, #tpu.memory_space<vmem>>, vector<2x64xf32>,
    %440 = vector.extract_strided_slice %355 {offsets = [0, 96], sizes = [2, 8], strides = [1, 1]} : vector<2x128xf32> to vector<2x8xf32>
    %c0_268 = arith.constant 0 : index
    %c0_269 = arith.constant 0 : index
    %441 = vector.load %arg20[%c0_268, %c0_269] : memref<8x64xf32, #tpu.memory_space<vmem>>, vector<8x64xf32>
    %cst_270 = arith.constant dense<0.000000e+00> : vector<2x64xf32>
    %442 = tpu.matmul %440, %441, %cst_270 {dimension_numbers = #tpu.dot_dimension_numbers<[1], [0], [0], [1], [0, 0, 1, 1], [], []>} : vector<2x8xf32>, vector<8x64xf32>, vector<2x64xf32> -> vector<2x64xf32>
    %c0_271 = arith.constant 0 : index
    %c0_272 = arith.constant 0 : index
    %443 = vector.load %arg21[%c0_271, %c0_272] : memref<1x64xf32, #tpu.memory_space<vmem>>, vector<1x64xf32>
    %444 = vector.broadcast %443 : vector<1x64xf32> to vector<2x64xf32>
    %445 = arith.addf %442, %444 : vector<2x64xf32>
    %c0_273 = arith.constant 0 : index
    %c768 = arith.constant 768 : index
    %446 = vector.load %arg25[%c0_273, %c768] : memref<2x1024xf32, #tpu.memory_space<vmem>>, vector<2x64xf32>
    tpu.vector_store %arg25[%c0_273, %c768], %445 {strides = array<i32>} : memref<2x1024xf32, #tpu.memory_space<vmem>>, vector<2x64xf32>,
    %447 = vector.extract_strided_slice %355 {offsets = [0, 104], sizes = [2, 8], strides = [1, 1]} : vector<2x128xf32> to vector<2x8xf32>
    %c0_274 = arith.constant 0 : index
    %c0_275 = arith.constant 0 : index
    %448 = vector.load %arg20[%c0_274, %c0_275] : memref<8x64xf32, #tpu.memory_space<vmem>>, vector<8x64xf32>
    %cst_276 = arith.constant dense<0.000000e+00> : vector<2x64xf32>
    %449 = tpu.matmul %447, %448, %cst_276 {dimension_numbers = #tpu.dot_dimension_numbers<[1], [0], [0], [1], [0, 0, 1, 1], [], []>} : vector<2x8xf32>, vector<8x64xf32>, vector<2x64xf32> -> vector<2x64xf32>
    %c0_277 = arith.constant 0 : index
    %c0_278 = arith.constant 0 : index
    %450 = vector.load %arg21[%c0_277, %c0_278] : memref<1x64xf32, #tpu.memory_space<vmem>>, vector<1x64xf32>
    %451 = vector.broadcast %450 : vector<1x64xf32> to vector<2x64xf32>
    %452 = arith.addf %449, %451 : vector<2x64xf32>
    %c0_279 = arith.constant 0 : index
    %c832 = arith.constant 832 : index
    %453 = vector.load %arg25[%c0_279, %c832] : memref<2x1024xf32, #tpu.memory_space<vmem>>, vector<2x64xf32>
    tpu.vector_store %arg25[%c0_279, %c832], %452 {strides = array<i32>} : memref<2x1024xf32, #tpu.memory_space<vmem>>, vector<2x64xf32>,
    %454 = vector.extract_strided_slice %355 {offsets = [0, 112], sizes = [2, 8], strides = [1, 1]} : vector<2x128xf32> to vector<2x8xf32>
    %c0_280 = arith.constant 0 : index
    %c0_281 = arith.constant 0 : index
    %455 = vector.load %arg20[%c0_280, %c0_281] : memref<8x64xf32, #tpu.memory_space<vmem>>, vector<8x64xf32>
    %cst_282 = arith.constant dense<0.000000e+00> : vector<2x64xf32>
    %456 = tpu.matmul %454, %455, %cst_282 {dimension_numbers = #tpu.dot_dimension_numbers<[1], [0], [0], [1], [0, 0, 1, 1], [], []>} : vector<2x8xf32>, vector<8x64xf32>, vector<2x64xf32> -> vector<2x64xf32>
    %c0_283 = arith.constant 0 : index
    %c0_284 = arith.constant 0 : index
    %457 = vector.load %arg21[%c0_283, %c0_284] : memref<1x64xf32, #tpu.memory_space<vmem>>, vector<1x64xf32>
    %458 = vector.broadcast %457 : vector<1x64xf32> to vector<2x64xf32>
    %459 = arith.addf %456, %458 : vector<2x64xf32>
    %c0_285 = arith.constant 0 : index
    %c896 = arith.constant 896 : index
    %460 = vector.load %arg25[%c0_285, %c896] : memref<2x1024xf32, #tpu.memory_space<vmem>>, vector<2x64xf32>
    tpu.vector_store %arg25[%c0_285, %c896], %459 {strides = array<i32>} : memref<2x1024xf32, #tpu.memory_space<vmem>>, vector<2x64xf32>,
    %461 = vector.extract_strided_slice %355 {offsets = [0, 120], sizes = [2, 8], strides = [1, 1]} : vector<2x128xf32> to vector<2x8xf32>
    %c0_286 = arith.constant 0 : index
    %c0_287 = arith.constant 0 : index
    %462 = vector.load %arg20[%c0_286, %c0_287] : memref<8x64xf32, #tpu.memory_space<vmem>>, vector<8x64xf32>
    %cst_288 = arith.constant dense<0.000000e+00> : vector<2x64xf32>
    %463 = tpu.matmul %461, %462, %cst_288 {dimension_numbers = #tpu.dot_dimension_numbers<[1], [0], [0], [1], [0, 0, 1, 1], [], []>} : vector<2x8xf32>, vector<8x64xf32>, vector<2x64xf32> -> vector<2x64xf32>
    %c0_289 = arith.constant 0 : index
    %c0_290 = arith.constant 0 : index
    %464 = vector.load %arg21[%c0_289, %c0_290] : memref<1x64xf32, #tpu.memory_space<vmem>>, vector<1x64xf32>
    %465 = vector.broadcast %464 : vector<1x64xf32> to vector<2x64xf32>
    %466 = arith.addf %463, %465 : vector<2x64xf32>
    %c0_291 = arith.constant 0 : index
    %c960 = arith.constant 960 : index
    %467 = vector.load %arg25[%c0_291, %c960] : memref<2x1024xf32, #tpu.memory_space<vmem>>, vector<2x64xf32>
    tpu.vector_store %arg25[%c0_291, %c960], %466 {strides = array<i32>} : memref<2x1024xf32, #tpu.memory_space<vmem>>, vector<2x64xf32>,
    return
  }
}

</mosaic_0001>

<bundles_post_ra>
// kernel: autoencoder_forward.1
= control target key start
LH: loop header
LB: loop body
LE: loop exit
PB: predicated region body
PF: predicated region fallthrough
CT: control target
= control target key end

     0   :  { %v5619_v0 = vmov 0.0   ;;  %vm5620_vm0 = vmmov 0   ;;  %vm103_vm1 = vcmask 523264   ;;  %vm367_vm2 = vcmask 801792   ;;  %s6814_s4 = inlined_call_operand.vmem [shape: f32[64,8], index: 4, kind: input, shape index: {}]   ;;  %s6815_s0 = inlined_call_operand.vmem [shape: f32[98,64], index: 0, kind: input, shape index: {}]   ;;  %s6816_s1 = inlined_call_operand.vmem [shape: f32[128,98], index: 1, kind: input, shape index: {}]   ;;  %s6817_s6 = inlined_call_operand.vmem [shape: f32[16,8,16], index: 6, kind: input, shape index: {}]   ;;  %s6818_s5 = inlined_call_operand.vmem [shape: f32[1,8], index: 5, kind: input, shape index: {}]   ;;  %s6819_s8 = inlined_call_operand.vmem [shape: f32[64,64], index: 8, kind: input, shape index: {}]   ;;  %s6820_s9 = inlined_call_operand.vmem [shape: f32[4,16,64], index: 9, kind: input, shape index: {}]   ;;  %s6821_s2 = inlined_call_operand.vmem [shape: f32[2,64], index: 2, kind: input, shape index: {}]   ;;  %s6822_s7 = inlined_call_operand.vmem [shape: f32[1,16], index: 7, kind: input, shape index: {}]   ;;  %s6823_s11 = inlined_call_operand.vmem [shape: f32[64,64], index: 11, kind: input, shape index: {}]   ;;  %s6824_s10 = inlined_call_operand.vmem [shape: f32[1,64], index: 10, kind: input, shape index: {}]   ;;  %s6825_s13 = inlined_call_operand.vmem [shape: f32[64,64], index: 13, kind: input, shape index: {}]   ;;  %s6826_s12 = inlined_call_operand.vmem [shape: f32[1,64], index: 12, kind: input, shape index: {}]   ;;  %s6827_s3 = inlined_call_operand.vmem [shape: f32[2,64], index: 3, kind: input, shape index: {}]   ;;  %s6828_s22 = inlined_call_operand.vmem [shape: f32[2,64], index: 22, kind: output, shape index: {0}]   ;;  %s6829_s14 = inlined_call_operand.vmem [shape: f32[64,64], index: 14, kind: input, shape index: {}]   ;;  %s6830_s24 = inlined_call_operand.vmem [shape: f32[2,64], index: 24, kind: output, shape index: {2}]   ;;  %s6831_s15 = inlined_call_operand.vmem [shape: f32[1,64], index: 15, kind: input, shape index: {}]   ;;  %s6832_s16 = inlined_call_operand.vmem [shape: f32[64,16], index: 16, kind: input, shape index: {}]   ;;  %s6833_s18 = inlined_call_operand.vmem [shape: f32[16,128], index: 18, kind: input, shape index: {}]   ;;  %s6834_s23 = inlined_call_operand.vmem [shape: f32[2,64], index: 23, kind: output, shape index: {1}]   ;;  %s6835_s17 = inlined_call_operand.vmem [shape: f32[1,16], index: 17, kind: input, shape index: {}]   ;;  %s6836_s20 = inlined_call_operand.vmem [shape: f32[8,64], index: 20, kind: input, shape index: {}]   ;;  %s6837_s19 = inlined_call_operand.vmem [shape: f32[1,128], index: 19, kind: input, shape index: {}]   ;;  %s6838_s21 = inlined_call_operand.vmem [shape: f32[1,64], index: 21, kind: input, shape index: {}]   ;;  %s6839_s25 = inlined_call_operand.vmem [shape: f32[2,1024], index: 25, kind: output, shape index: {3}]  }
   0x1   :  { %6849 = sst [smem:[#allocation2_spill]] %s6814_s4  ;;  %5119 = vmatprep.subr.mxu0 %v5619_v0  ;;  %5135 = vmatprep.mubr.msk.f32.mxu0 %vm5620_vm0, %v5619_v0  ;;  %vm416_vm3 = vcmask 1041408  }
   0x2   :  { %6850 = sst [smem:[#allocation3_spill]] %s6815_s0 }
   0x3   :  { %6851 = sst [smem:[#allocation4_spill]] %s6816_s1  ;;  %s5634_s1 = smov 48  }
   0x4   :  { %6852 = sst [smem:[#allocation5_spill]] %s6817_s6 }
   0x5   :  { %6853 = sst [smem:[#allocation6_spill]] %s6818_s5  ;;  %s5624_s5 = smov 104  }
   0x6   :  { %6854 = sst [smem:[#allocation7_spill]] %s6819_s8 }
   0x7   :  { %6855 = sst [smem:[#allocation8_spill]] %s6820_s9 }
   0x8   :  { %6856 = sst [smem:[#allocation9_spill]] %s6821_s2 }
   0x9   :  { %6857 = sst [smem:[#allocation10_spill]] %s6822_s7 }
   0xa   :  { %6858 = sst [smem:[#allocation11_spill]] %s6823_s11  ;;  %s5625_s11 = smov 72  }
   0xb   :  { %s6859_s9 = sld [smem:[#allocation2_spill]] }
   0xc   :  { %s6860_s6 = sld [smem:[#allocation3_spill]] }
   0xd   :  { %s6861_s30 = sld [smem:[#allocation4_spill]] }
   0xe   :  { %s6862_s0 = sld [smem:[#allocation5_spill]] }
   0xf   :  { %s6863_s7 = sld [smem:[#allocation6_spill]] }
  0x10   :  { %s6864_s4 = sld [smem:[#allocation7_spill]] }
  0x11   :  { %v95_v1 = vld [vmem:[%s6859_s9 + $0x38] sm:$0xff]  ;;  %v94_v2 = vld [vmem:[%s6859_s9 + $0x30] sm:$0xff]  ;;  %v93_v3 = vld [vmem:[%s6859_s9 + $0x28] sm:$0xff]  ;;  %s6865_s27 = sld [smem:[#allocation8_spill]] }
  0x12   :  { %5120 = vmatpush3.msra.mxu0 %v95_v1  ;;  %v92_v4 = vld [vmem:[%s6859_s9 + $0x20] sm:$0xff]  ;;  %v91_v5 = vld [vmem:[%s6859_s9 + $0x18] sm:$0xff]  ;;  %v90_v6 = vld [vmem:[%s6859_s9 + $0x10] sm:$0xff]  ;;  %s6866_s28 = sld [smem:[#allocation9_spill]] }
  0x13   :  { %5121 = vmatprep.subr.mxu0 %v5619_v0  ;;  %v89_v7 = vld [vmem:[%s6859_s9 + $0x8] sm:$0xff]  ;;  %v88_v8 = vld [vmem:[%s6859_s9] sm:$0xff]  ;;  %v77_v11 = vld [vmem:[%s6860_s6 + $0x10] sm:$0xff]  ;;  %s6867_s8 = sld [smem:[#allocation10_spill]]  ;;  %s5622_s9 = smov 112  }
  0x14   :  { %5122 = vmatpush3.msra.mxu0 %v94_v2  ;;  %v75_v9 = vld [vmem:[%s6860_s6] sm:$0xff]  ;;  %v76_v10 = vld [vmem:[%s6860_s6 + $0x8] sm:$0xff]  ;;  %v78_v12 = vld [vmem:[%s6860_s6 + $0x18] sm:$0xff] }
  0x15   :  { %5123 = vmatprep.subr.mxu0 %v5619_v0  ;;  %v79_v13 = vld [vmem:[%s6860_s6 + $0x20] sm:$0xff]  ;;  %v80_v14 = vld [vmem:[%s6860_s6 + $0x28] sm:$0xff]  ;;  %v81_v15 = vld [vmem:[%s6860_s6 + $0x30] sm:$0xff] }
  0x16   :  { %5124 = vmatpush3.msra.mxu0 %v93_v3  ;;  %v82_v16 = vld [vmem:[%s6860_s6 + $0x38] sm:$0xff]  ;;  %v83_v17 = vld [vmem:[%s6860_s6 + $0x40] sm:$0xff]  ;;  %v84_v18 = vld [vmem:[%s6860_s6 + $0x48] sm:$0xff] }
  0x17   :  { %5125 = vmatprep.subr.mxu0 %v5619_v0  ;;  %v85_v19 = vld [vmem:[%s6860_s6 + $0x50] sm:$0xff]  ;;  %v86_v20 = vld [vmem:[%s6860_s6 + $0x58] sm:$0xff]  ;;  %v87_v21 = vld [vmem:[%s6860_s6 + $0x60] sm:$0x3]  ;;  %s5621_s6 = smov 120  }
  0x18   :  { %5126 = vmatpush3.msra.mxu0 %v92_v4  ;;  %v351_v22 = vld [vmem:[%s6861_s30] sm:$0xff]  ;;  %v4840_v23 = vld [vmem:[%s6862_s0 + $0x18] sm:$0xff] }
  0x19   :  { %5127 = vmatprep.subr.mxu0 %v5619_v0  ;;  %5200 = vmatprep.mubr.msk.f32.mxu1 %vm367_vm2, %v351_v22  ;;  %v4790_v45 = vld [vmem:[%s6863_s7] ss:$0 sm:$0xff]  ;;  %s5623_s7 = smov 88  }
  0x1a   :  { %5128 = vmatpush3.msra.mxu0 %v91_v5 }
  0x1b   :  { %5129 = vmatprep.subr.mxu0 %v5619_v0 }
  0x1c   :  { %5130 = vmatpush3.msra.mxu0 %v90_v6 }
  0x1d   :  { %5131 = vmatprep.subr.mxu0 %v5619_v0 }
  0x1e   :  { %5132 = vmatpush3.msra.mxu0 %v89_v7 }
  0x1f   :  { %5133 = vmatprep.subr.mxu0 %v5619_v0 }
  0x20   :  { %5134 = vmatpush3.msra.mxu0 %v88_v8 }
  0x21   :  { %5136 = vmatmul.mubr.msk.f32.vlgmr.msra.gmra.mxu0 %vm103_vm1, %v75_v9  ;;  %5239 = vmatprep.subr.mxu0 %v5619_v0 }
  0x22   :  { %5138 = vmatprep.mubr.msk.f32.mxu0 %vm5620_vm0, %v5619_v0  ;;  %5240 = vmatpush3.msra.mxu0 %v4840_v23 }
  0x23   :  { %5249 = vmatprep.subr.mxu0 %v5619_v0 }
  0x25   :  { %5139 = vmatmul.mubr.msk.f32.gmra.mxu0 %vm103_vm1, %v76_v10 }
  0x26   :  { %5141 = vmatprep.mubr.msk.f32.mxu0 %vm5620_vm0, %v5619_v0 }
  0x29   :  { %5142 = vmatmul.mubr.msk.f32.gmra.mxu0 %vm103_vm1, %v77_v11 }
  0x2a   :  { %5144 = vmatprep.mubr.msk.f32.mxu0 %vm5620_vm0, %v5619_v0 }
  0x2d   :  { %5145 = vmatmul.mubr.msk.f32.gmra.mxu0 %vm103_vm1, %v78_v12 }
  0x2e   :  { %5147 = vmatprep.mubr.msk.f32.mxu0 %vm5620_vm0, %v5619_v0 }
  0x31   :  { %5148 = vmatmul.mubr.msk.f32.gmra.mxu0 %vm103_vm1, %v79_v13 }
  0x32   :  { %5150 = vmatprep.mubr.msk.f32.mxu0 %vm5620_vm0, %v5619_v0 }
  0x35   :  { %5151 = vmatmul.mubr.msk.f32.gmra.mxu0 %vm103_vm1, %v80_v14 }
  0x36   :  { %5153 = vmatprep.mubr.msk.f32.mxu0 %vm5620_vm0, %v5619_v0 }
  0x39   :  { %5154 = vmatmul.mubr.msk.f32.gmra.mxu0 %vm103_vm1, %v81_v15 }
  0x3a   :  { %5156 = vmatprep.mubr.msk.f32.mxu0 %vm5620_vm0, %v5619_v0 }
  0x3d   :  { %5157 = vmatmul.mubr.msk.f32.gmra.mxu0 %vm103_vm1, %v82_v16 }
  0x3e   :  { %5159 = vmatprep.mubr.msk.f32.mxu0 %vm5620_vm0, %v5619_v0 }
  0x41   :  { %5160 = vmatmul.mubr.msk.f32.gmra.mxu0 %vm103_vm1, %v83_v17 }
  0x42   :  { %5162 = vmatprep.mubr.msk.f32.mxu0 %vm5620_vm0, %v5619_v0 }
  0x45   :  { %5163 = vmatmul.mubr.msk.f32.gmra.mxu0 %vm103_vm1, %v84_v18 }
  0x46   :  { %5165 = vmatprep.mubr.msk.f32.mxu0 %vm5620_vm0, %v5619_v0 }
  0x49   :  { %5166 = vmatmul.mubr.msk.f32.gmra.mxu0 %vm103_vm1, %v85_v19 }
  0x4a   :  { %5168 = vmatprep.mubr.msk.f32.mxu0 %vm5620_vm0, %v5619_v0 }
  0x4d   :  { %5169 = vmatmul.mubr.msk.f32.gmra.mxu0 %vm103_vm1, %v86_v20 }
  0x4e   :  { %5171 = vmatprep.mubr.msk.f32.mxu0 %vm5620_vm0, %v5619_v0 }
  0x51   :  { %5172 = vmatmul.mubr.msk.f32.gmra.mxu0 %vm103_vm1, %v87_v21 }
  0x52   :  { %5241 = vmatprep.mubr.msk.f32.mxu0 %vm5620_vm0, %v5619_v0 }
  0xe1   :  { %v5887_v24 = vpop.f32.mrf.mxu0 }
  0xe2   :  { %v5925_v18 = vadd.f32 %v4790_v45, %v5887_v24 }
  0xe3   :  { %v5137_v25 = vpop.f32.mrf.mxu0 }
  0xe5   :  { %v214_v26 = vpop.f32.mrf.mxu0 }
  0xe6   :  { %v5921_v15 = vadd.f32 %v4790_v45, %v214_v26  ;;  %v286_v26 = vmin.f32 %v5925_v18, 0.0 }
  0xe7   :  { %v5140_v27 = vpop.f32.mrf.mxu0 }
  0xe8   :  { %v287_v21 = vmin.f32 %v5921_v15, 0.0  ;;  %vm274_vm15 = vcmp.gt.f32.partialorder %v5921_v15, 0.0 }
  0xe9   :  { %v219_v28 = vpop.f32.mrf.mxu0 }
  0xea   :  { %v5918_v12 = vadd.f32 %v4790_v45, %v219_v28 }
  0xeb   :  { %v5143_v29 = vpop.f32.mrf.mxu0 }
  0xec   :  { %v288_v19 = vmin.f32 %v5918_v12, 0.0  ;;  %v301_v29 = vmul.f32 1.442695, %v287_v21  ;;  %vm275_vm14 = vcmp.gt.f32.partialorder %v5918_v12, 0.0 }
  0xed   :  { %v224_v30 = vpop.f32.mrf.mxu0 }
  0xee   :  { %v5915_v9 = vadd.f32 %v4790_v45, %v224_v30  ;;  %v303_v27 = vmul.f32 1.442695, %v288_v19 }
  0xef   :  { %v5146_v31 = vpop.f32.mrf.mxu0 }
  0xf0   :  { %v289_v16 = vmin.f32 %v5915_v9, 0.0  ;;  %vm276_vm13 = vcmp.gt.f32.partialorder %v5915_v9, 0.0 }
  0xf1   :  { %v229_v32 = vpop.f32.mrf.mxu0 }
  0xf2   :  { %v5912_v6 = vadd.f32 %v4790_v45, %v229_v32  ;;  %v305_v22 = vmul.f32 1.442695, %v289_v16  ;;  %v299_v32 = vmul.f32 1.442695, %v286_v26  ;;  %v364_v16 = vld [vmem:[%s6861_s30 + $0x68] sm:$0xff] }
  0xf3   :  { %v5149_v33 = vpop.f32.mrf.mxu0 }
  0xf4   :  { %v290_v13 = vmin.f32 %v5912_v6, 0.0  ;;  %vm277_vm12 = vcmp.gt.f32.partialorder %v5912_v6, 0.0 }
  0xf5   :  { %v234_v34 = vpop.f32.mrf.mxu0 }
  0xf6   :  { %v5909_v2 = vadd.f32 %v4790_v45, %v234_v34  ;;  %v307_v20 = vmul.f32 1.442695, %v290_v13  ;;  %v361_v13 = vld [vmem:[%s6861_s30 + $0x50] sm:$0xff] }
  0xf7   :  { %v5152_v35 = vpop.f32.mrf.mxu0 }
  0xf8   :  { %v291_v10 = vmin.f32 %v5909_v2, 0.0  ;;  %vm278_vm11 = vcmp.gt.f32.partialorder %v5909_v2, 0.0 }
  0xf9   :  { %v239_v36 = vpop.f32.mrf.mxu0 }
  0xfa   :  { %v5906_v62 = vadd.f32 %v4790_v45, %v239_v36  ;;  %v309_v17 = vmul.f32 1.442695, %v291_v10  ;;  %v358_v10 = vld [vmem:[%s6861_s30 + $0x38] sm:$0xff] }
  0xfb   :  { %v5155_v37 = vpop.f32.mrf.mxu0 }
  0xfc   :  { %v292_v7 = vmin.f32 %v5906_v62, 0.0  ;;  %vm279_vm10 = vcmp.gt.f32.partialorder %v5906_v62, 0.0 }
  0xfd   :  { %v244_v38 = vpop.f32.mrf.mxu0 }
  0xfe   :  { %v5903_v56 = vadd.f32 %v4790_v45, %v244_v38  ;;  %v311_v14 = vmul.f32 1.442695, %v292_v7  ;;  %v355_v7 = vld [vmem:[%s6861_s30 + $0x20] sm:$0xff] }
  0xff   :  { %v5158_v39 = vpop.f32.mrf.mxu0 }
 0x100   :  { %v293_v3 = vmin.f32 %v5903_v56, 0.0  ;;  %vm280_vm9 = vcmp.gt.f32.partialorder %v5903_v56, 0.0 }
 0x101   :  { %v249_v40 = vpop.f32.mrf.mxu0 }
 0x102   :  { %v5900_v53 = vadd.f32 %v4790_v45, %v249_v40  ;;  %v313_v11 = vmul.f32 1.442695, %v293_v3  ;;  %v352_v3 = vld [vmem:[%s6861_s30 + $0x8] sm:$0xff] }
 0x103   :  { %v5161_v41 = vpop.f32.mrf.mxu0 }
 0x104   :  { %v294_v63 = vmin.f32 %v5900_v53, 0.0  ;;  %vm281_vm8 = vcmp.gt.f32.partialorder %v5900_v53, 0.0 }
 0x105   :  { %v254_v42 = vpop.f32.mrf.mxu0 }
 0x106   :  { %v5895_v49 = vadd.f32 %v4790_v45, %v254_v42  ;;  %v315_v8 = vmul.f32 1.442695, %v294_v63 }
 0x107   :  { %v5164_v43 = vpop.f32.mrf.mxu0 }
 0x108   :  { %v295_v57 = vmin.f32 %v5895_v49, 0.0  ;;  %vm282_vm7 = vcmp.gt.f32.partialorder %v5895_v49, 0.0 }
 0x109   :  { %v259_v44 = vpop.f32.mrf.mxu0 }
 0x10a   :  { %v5893_v46 = vadd.f32 %v4790_v45, %v259_v44  ;;  %v317_v4 = vmul.f32 1.442695, %v295_v57 }
 0x10b   :  { %v5167_v47 = vpop.f32.mrf.mxu0 }
 0x10c   :  { %v296_v51 = vmin.f32 %v5893_v46, 0.0  ;;  %vm283_vm6 = vcmp.gt.f32.partialorder %v5893_v46, 0.0 }
 0x10d   :  { %v264_v48 = vpop.f32.mrf.mxu0 }
 0x10e   :  { %v5897_v50 = vadd.f32 %v4790_v45, %v264_v48  ;;  %v319_v60 = vmul.f32 1.442695, %v296_v51 }
 0x10f   :  { %v5170_v52 = vpop.f32.mrf.mxu0 }
 0x110   :  { %v297_v54 = vmin.f32 %v5897_v50, 0.0  ;;  %vm284_vm5 = vcmp.gt.f32.partialorder %v5897_v50, 0.0 }
 0x111   :  { %v269_v55 = vpop.f32.mrf.mxu0 }
 0x112   :  { %v321_v58 = vmul.f32 1.442695, %v297_v54  ;;  %v270_v59 = vadd.f32 %v4790_v45, %v269_v55 }
 0x113   :  { %v5173_v61 = vpop.f32.mrf.mxu0 }
 0x114   :  { %v298_v1 = vmin.f32 %v270_v59, 0.0  ;;  %5553 = vpow2.f32 %v321_v58  ;;  %vm285_vm4 = vcmp.gt.f32.partialorder %v270_v59, 0.0 }
 0x115   :  { %5555 = vpow2.f32 %v319_v60 }
 0x116   :  { %v323_v5 = vmul.f32 1.442695, %v298_v1 }
 0x118   :  { %5557 = vpow2.f32 %v323_v5  ;;  %v572_v5 = vld [vmem:[%s6862_s0] sm:$0xff] }
 0x119   :  { %5559 = vpow2.f32 %v317_v4  ;;  %v353_v4 = vld [vmem:[%s6861_s30 + $0x10] sm:$0xff] }
 0x11a   :  { %5561 = vpow2.f32 %v315_v8  ;;  %v356_v8 = vld [vmem:[%s6861_s30 + $0x28] sm:$0xff] }
 0x11b   :  { %5563 = vpow2.f32 %v313_v11  ;;  %v359_v11 = vld [vmem:[%s6861_s30 + $0x40] sm:$0xff] }
 0x11c   :  { %5565 = vpow2.f32 %v311_v14  ;;  %v362_v14 = vld [vmem:[%s6861_s30 + $0x58] sm:$0xff] }
 0x11d   :  { %5567 = vpow2.f32 %v309_v17  ;;  %v365_v17 = vld [vmem:[%s6861_s30 + $0x70] sm:$0xff] }
 0x11e   :  { %5569 = vpow2.f32 %v307_v20  ;;  %v4836_v20 = vld [vmem:[%s6862_s0 + $0x8] sm:$0xff] }
 0x11f   :  { %5571 = vpow2.f32 %v305_v22  ;;  %v4844_v22 = vld [vmem:[%s6862_s0 + $0x28] sm:$0xff] }
 0x120   :  { %5573 = vpow2.f32 %v303_v27  ;;  %v4848_v27 = vld [vmem:[%s6862_s0 + $0x38] sm:$0xff] }
 0x121   :  { %v5554_v23 = vpop.eup %5553  ;;  %5575 = vpow2.f32 %v301_v29  ;;  %v4842_v29 = vld [vmem:[%s6862_s0 + $0x20] sm:$0xff] }
 0x122   :  { %v5556_v25 = vpop.eup %5555  ;;  %v4815_v30 = vadd.f32 -1.0, %v5554_v23  ;;  %5577 = vpow2.f32 %v299_v32  ;;  %v4846_v32 = vld [vmem:[%s6862_s0 + $0x30] sm:$0xff] }
 0x123   :  { %v4814_v34 = vadd.f32 -1.0, %v5556_v25  ;;  %v4838_v25 = vld [vmem:[%s6862_s0 + $0x10] sm:$0xff] }
 0x124   :  { %v349_v36 = vsel %vm284_vm5, %v5897_v50, %v4815_v30  ;;  %v4852_v30 = vld [vmem:[%s6862_s0 + $0x48] sm:$0xff] }
 0x125   :  { %v5558_v28 = vpop.eup %5557  ;;  %v348_v39 = vsel %vm283_vm6, %v5893_v46, %v4814_v34  ;;  %v4856_v34 = vld [vmem:[%s6862_s0 + $0x58] sm:$0xff] }
 0x126   :  { %v4816_v24 = vadd.f32 -1.0, %v5558_v28  ;;  %v5560_v31 = vpop.eup %5559 }
 0x127   :  { %v5562_v35 = vpop.eup %5561  ;;  %v4813_v37 = vadd.f32 -1.0, %v5560_v31 }
 0x128   :  { %v350_v33 = vsel %vm285_vm4, %v270_v59, %v4816_v24  ;;  %v5564_v38 = vpop.eup %5563  ;;  %v4812_v40 = vadd.f32 -1.0, %v5562_v35  ;;  %vm573_vm4 = vcmask 64512  }
 0x129   :  { %5174 = vmatprep.subr.msk.mxu1 %vm416_vm3, %v350_v33  ;;  %v5566_v41 = vpop.eup %5565  ;;  %v347_v42 = vsel %vm282_vm7, %v5895_v49, %v4813_v37  ;;  %v4811_v43 = vadd.f32 -1.0, %v5564_v38  ;;  %v4860_v38 = vld [vmem:[%s6862_s0 + $0x68] sm:$0xff]  ;;  %vm6847_vm7 = vcmask 517120  }
 0x12a   :  { %5175 = vmatpush3.msk.msra.mxu1 %vm416_vm3, %v350_v33  ;;  %v5568_v44 = vpop.eup %5567  ;;  %v346_v45 = vsel %vm281_vm8, %v5900_v53, %v4812_v40  ;;  %v4810_v47 = vadd.f32 -1.0, %v5566_v41  ;;  %vm273_vm3 = vcmp.gt.f32.partialorder %v5925_v18, 0.0  ;;  %v4854_v40 = vld [vmem:[%s6862_s0 + $0x50] sm:$0xff]  ;;  %vm2671_vm8 = vcmask 255168  }
 0x12b   :  { %5176 = vmatprep.subr.mxu1 %v349_v36  ;;  %v5570_v48 = vpop.eup %5569  ;;  %v345_v46 = vsel %vm280_vm9, %v5903_v56, %v4811_v43  ;;  %v4809_v50 = vadd.f32 -1.0, %v5568_v44  ;;  %v4858_v44 = vld [vmem:[%s6862_s0 + $0x60] sm:$0xff]  ;;  %vm2469_vm9 = vcmask 123968  }
 0x12c   :  { %5177 = vmatpush3.msra.mxu1 %v349_v36  ;;  %v5572_v51 = vpop.eup %5571  ;;  %v344_v49 = vsel %vm279_vm10, %v5906_v62, %v4810_v47  ;;  %v4808_v52 = vadd.f32 -1.0, %v5570_v48  ;;  %v4850_v36 = vld [vmem:[%s6862_s0 + $0x40] sm:$0xff]  ;;  %v4862_v48 = vld [vmem:[%s6862_s0 + $0x70] sm:$0xff]  ;;  %vm2772_vm10 = vcmask 320768  }
 0x12d   :  { %5178 = vmatprep.subr.mxu1 %v348_v39  ;;  %v5574_v54 = vpop.eup %5573  ;;  %v343_v53 = vsel %vm278_vm11, %v5909_v2, %v4809_v50  ;;  %v4807_v55 = vadd.f32 -1.0, %v5572_v51  ;;  %v1802_v50 = vld [vmem:[%s6864_s4 + $0x38] sm:$0xff]  ;;  %v1801_v51 = vld [vmem:[%s6864_s4 + $0x30] sm:$0xff]  ;;  %vm2570_vm11 = vcmask 189568  }
 0x12e   :  { %5179 = vmatpush3.msra.mxu1 %v348_v39  ;;  %v5576_v57 = vpop.eup %5575  ;;  %v342_v56 = vsel %vm277_vm12, %v5912_v6, %v4808_v52  ;;  %v4806_v58 = vadd.f32 -1.0, %v5574_v54  ;;  %v354_v6 = vld [vmem:[%s6861_s30 + $0x18] sm:$0xff]  ;;  %v1884_v52 = vld [vmem:[%s6865_s27 + $0x8] sm:$0xff]  ;;  %v1799_v54 = vld [vmem:[%s6864_s4 + $0x20] sm:$0xff]  ;;  %vm2974_vm12 = vcmask 451968  }
 0x12f   :  { %5180 = vmatprep.subr.mxu1 %v347_v42  ;;  %v5578_v59 = vpop.eup %5577  ;;  %v341_v60 = vsel %vm276_vm13, %v5915_v9, %v4807_v55  ;;  %v4805_v61 = vadd.f32 -1.0, %v5576_v57  ;;  %v357_v9 = vld [vmem:[%s6861_s30 + $0x30] sm:$0xff]  ;;  %v1798_v55 = vld [vmem:[%s6864_s4 + $0x18] sm:$0xff]  ;;  %vm2873_vm13 = vcmask 386368  }
 0x130   :  { %5181 = vmatpush3.msra.mxu1 %v347_v42  ;;  %v340_v62 = vsel %vm275_vm14, %v5918_v12, %v4806_v58  ;;  %v4804_v63 = vadd.f32 -1.0, %v5578_v59  ;;  %v360_v12 = vld [vmem:[%s6861_s30 + $0x48] sm:$0xff]  ;;  %v4864_v42 = vld [vmem:[%s6862_s0 + $0x78] sm:$0xff]  ;;  %v1797_v57 = vld [vmem:[%s6864_s4 + $0x10] sm:$0xff]  ;;  %vm3075_vm14 = vcmask 517568   ;;  %s5636_s0 = smov 16  }
 0x131   :  { %5182 = vmatprep.subr.mxu1 %v346_v45  ;;  %v339_v1 = vsel %vm274_vm15, %v5921_v15, %v4805_v61  ;;  %v363_v15 = vld [vmem:[%s6861_s30 + $0x60] sm:$0xff]  ;;  %vm2374_vm15 = vcmask 58368  }
 0x132   :  { %5183 = vmatpush3.msra.mxu1 %v346_v45  ;;  %v338_v2 = vsel %vm273_vm3, %v5925_v18, %v4804_v63  ;;  %v366_v18 = vld [vmem:[%s6861_s30 + $0x78] sm:$0xff]  ;;  %v1795_v58 = vld [vmem:[%s6864_s4] sm:$0xff] }
 0x133   :  { %5184 = vmatprep.subr.mxu1 %v345_v46  ;;  %v6166_v59 = vld [vmem:[%s6866_s28] sm:$0x3] }
 0x134   :  { %5185 = vmatpush3.msra.mxu1 %v345_v46  ;;  %v4834_v61 = vld [vmem:[%s6867_s8] ss:$0 sm:$0xff]  ;;  %s5633_s8 = smov 64  }
 0x135   :  { %5186 = vmatprep.subr.mxu1 %v344_v49 }
 0x136   :  { %5187 = vmatpush3.msra.mxu1 %v344_v49  ;;  %v1800_v49 = vld [vmem:[%s6864_s4 + $0x28] sm:$0xff] }
 0x137   :  { %5188 = vmatprep.subr.mxu1 %v343_v53 }
 0x138   :  { %5189 = vmatpush3.msra.mxu1 %v343_v53  ;;  %v1883_v53 = vld [vmem:[%s6865_s27] sm:$0xff] }
 0x139   :  { %5190 = vmatprep.subr.mxu1 %v342_v56 }
 0x13a   :  { %5191 = vmatpush3.msra.mxu1 %v342_v56  ;;  %v1796_v56 = vld [vmem:[%s6864_s4 + $0x8] sm:$0xff]  ;;  %s5626_s4 = smov 96  }
 0x13b   :  { %5192 = vmatprep.subr.mxu1 %v341_v60 }
 0x13c   :  { %5193 = vmatpush3.msra.mxu1 %v341_v60 }
 0x13d   :  { %5194 = vmatprep.subr.mxu1 %v340_v62 }
 0x13e   :  { %5195 = vmatpush3.msra.mxu1 %v340_v62 }
 0x13f   :  { %5196 = vmatprep.subr.mxu1 %v339_v1 }
 0x140   :  { %5197 = vmatpush3.msra.mxu1 %v339_v1 }
 0x141   :  { %5198 = vmatprep.subr.mxu1 %v338_v2 }
 0x142   :  { %5199 = vmatpush3.msra.mxu1 %v338_v2 }
 0x143   :  { %5201 = vmatmul.mubr.msk.f32.vlgmr.msra.gmra.mxu1 %vm367_vm2, %v352_v3  ;;  %5224 = vmatprep.subr.mxu1 %v5619_v0 }
 0x144   :  { %5203 = vmatprep.mubr.msk.f32.mxu1 %vm367_vm2, %v353_v4  ;;  %5225 = vmatpush3.msra.mxu1 %v572_v5 }
 0x145   :  { %5229 = vmatprep.subr.mxu1 %v5619_v0 }
 0x147   :  { %5204 = vmatmul.mubr.msk.f32.gmra.mxu1 %vm367_vm2, %v354_v6 }
 0x148   :  { %5206 = vmatprep.mubr.msk.f32.mxu1 %vm367_vm2, %v355_v7 }
 0x14b   :  { %5207 = vmatmul.mubr.msk.f32.gmra.mxu1 %vm367_vm2, %v356_v8 }
 0x14c   :  { %5209 = vmatprep.mubr.msk.f32.mxu1 %vm367_vm2, %v357_v9 }
 0x14f   :  { %5210 = vmatmul.mubr.msk.f32.gmra.mxu1 %vm367_vm2, %v358_v10 }
 0x150   :  { %5212 = vmatprep.mubr.msk.f32.mxu1 %vm367_vm2, %v359_v11 }
 0x153   :  { %5213 = vmatmul.mubr.msk.f32.gmra.mxu1 %vm367_vm2, %v360_v12 }
 0x154   :  { %5215 = vmatprep.mubr.msk.f32.mxu1 %vm367_vm2, %v361_v13 }
 0x157   :  { %5216 = vmatmul.mubr.msk.f32.gmra.mxu1 %vm367_vm2, %v362_v14 }
 0x158   :  { %5218 = vmatprep.mubr.msk.f32.mxu1 %vm367_vm2, %v363_v15 }
 0x15b   :  { %5219 = vmatmul.mubr.msk.f32.gmra.mxu1 %vm367_vm2, %v364_v16 }
 0x15c   :  { %5221 = vmatprep.mubr.msk.f32.mxu1 %vm367_vm2, %v365_v17 }
 0x15f   :  { %5222 = vmatmul.mubr.msk.f32.gmra.mxu1 %vm367_vm2, %v366_v18  ;;  %vm6848_vm2 = vcmask 130048  }
 0x160   :  { %5226 = vmatprep.mubr.msk.f32.mxu1 %vm5620_vm0, %v5619_v0 }
 0x203   :  { %v5202_v19 = vpop.f32.mrf.mxu1 }
 0x205   :  { %v486_v21 = vpop.f32.mrf.mxu1 }
 0x206   :  { %5227 = vmatmul.mubr.msk.f32.vlgmr.msra.gmra.mxu1 %vm573_vm4, %v486_v21 }
 0x207   :  { %5230 = vmatpush3.msra.mxu1 %v4836_v20  ;;  %v5205_v23 = vpop.f32.mrf.mxu1  ;;  %5231 = vmatprep.mubr.msk.f32.mxu1 %vm5620_vm0, %v5619_v0 }
 0x208   :  { %5234 = vmatprep.subr.mxu1 %v5619_v0  ;;  %5242 = vmatmul.mubr.msk.f32.vlgmr.msra.gmra.mxu0 %vm573_vm4, %v5205_v23 }
 0x209   :  { %v496_v26 = vpop.f32.mrf.mxu1  ;;  %5250 = vmatpush3.msra.mxu0 %v4844_v22  ;;  %5251 = vmatprep.mubr.msk.f32.mxu0 %vm5620_vm0, %v5619_v0 }
 0x20a   :  { %5232 = vmatmul.mubr.msk.f32.vlgmr.msra.gmra.mxu1 %vm573_vm4, %v5202_v19  ;;  %5259 = vmatprep.subr.mxu0 %v5619_v0 }
 0x20b   :  { %5235 = vmatpush3.msra.mxu1 %v4838_v25  ;;  %v5208_v28 = vpop.f32.mrf.mxu1  ;;  %5236 = vmatprep.mubr.msk.f32.mxu1 %vm5620_vm0, %v5619_v0 }
 0x20c   :  { %5244 = vmatprep.subr.mxu1 %v5619_v0  ;;  %5252 = vmatmul.mubr.msk.f32.vlgmr.msra.gmra.mxu0 %vm573_vm4, %v5208_v28 }
 0x20d   :  { %v506_v24 = vpop.f32.mrf.mxu1  ;;  %5260 = vmatpush3.msra.mxu0 %v4848_v27  ;;  %5261 = vmatprep.mubr.msk.f32.mxu0 %vm5620_vm0, %v5619_v0 }
 0x20e   :  { %5237 = vmatmul.mubr.msk.f32.vlgmr.msra.gmra.mxu1 %vm573_vm4, %v496_v26  ;;  %5269 = vmatprep.subr.mxu0 %v5619_v0 }
 0x20f   :  { %5245 = vmatpush3.msra.mxu1 %v4842_v29  ;;  %v5211_v31 = vpop.f32.mrf.mxu1  ;;  %5246 = vmatprep.mubr.msk.f32.mxu1 %vm5620_vm0, %v5619_v0 }
 0x210   :  { %5254 = vmatprep.subr.mxu1 %v5619_v0  ;;  %5262 = vmatmul.mubr.msk.f32.vlgmr.msra.gmra.mxu0 %vm573_vm4, %v5211_v31 }
 0x211   :  { %v516_v33 = vpop.f32.mrf.mxu1  ;;  %5270 = vmatpush3.msra.mxu0 %v4852_v30  ;;  %5271 = vmatprep.mubr.msk.f32.mxu0 %vm5620_vm0, %v5619_v0 }
 0x212   :  { %5247 = vmatmul.mubr.msk.f32.vlgmr.msra.gmra.mxu1 %vm573_vm4, %v506_v24  ;;  %5279 = vmatprep.subr.mxu0 %v5619_v0 }
 0x213   :  { %5255 = vmatpush3.msra.mxu1 %v4846_v32  ;;  %v5214_v35 = vpop.f32.mrf.mxu1  ;;  %5256 = vmatprep.mubr.msk.f32.mxu1 %vm5620_vm0, %v5619_v0 }
 0x214   :  { %5264 = vmatprep.subr.mxu1 %v5619_v0  ;;  %5272 = vmatmul.mubr.msk.f32.vlgmr.msra.gmra.mxu0 %vm573_vm4, %v5214_v35 }
 0x215   :  { %v526_v37 = vpop.f32.mrf.mxu1  ;;  %5280 = vmatpush3.msra.mxu0 %v4856_v34  ;;  %5281 = vmatprep.mubr.msk.f32.mxu0 %vm5620_vm0, %v5619_v0 }
 0x216   :  { %5257 = vmatmul.mubr.msk.f32.vlgmr.msra.gmra.mxu1 %vm573_vm4, %v516_v33  ;;  %5289 = vmatprep.subr.mxu0 %v5619_v0 }
 0x217   :  { %5265 = vmatpush3.msra.mxu1 %v4850_v36  ;;  %v5217_v39 = vpop.f32.mrf.mxu1  ;;  %5266 = vmatprep.mubr.msk.f32.mxu1 %vm5620_vm0, %v5619_v0 }
 0x218   :  { %5274 = vmatprep.subr.mxu1 %v5619_v0  ;;  %5282 = vmatmul.mubr.msk.f32.vlgmr.msra.gmra.mxu0 %vm573_vm4, %v5217_v39 }
 0x219   :  { %v536_v41 = vpop.f32.mrf.mxu1  ;;  %5290 = vmatpush3.msra.mxu0 %v4860_v38  ;;  %5291 = vmatprep.mubr.msk.f32.mxu0 %vm5620_vm0, %v5619_v0 }
 0x21a   :  { %5267 = vmatmul.mubr.msk.f32.vlgmr.msra.gmra.mxu1 %vm573_vm4, %v526_v37  ;;  %5299 = vmatprep.subr.mxu0 %v5619_v0 }
 0x21b   :  { %5275 = vmatpush3.msra.mxu1 %v4854_v40  ;;  %v5220_v43 = vpop.f32.mrf.mxu1  ;;  %5276 = vmatprep.mubr.msk.f32.mxu1 %vm5620_vm0, %v5619_v0 }
 0x21c   :  { %5284 = vmatprep.subr.mxu1 %v5619_v0  ;;  %5292 = vmatmul.mubr.msk.f32.vlgmr.msra.gmra.mxu0 %vm573_vm4, %v5220_v43 }
 0x21d   :  { %v546_v45 = vpop.f32.mrf.mxu1  ;;  %5300 = vmatpush3.msra.mxu0 %v4864_v42  ;;  %5301 = vmatprep.mubr.msk.f32.mxu0 %vm5620_vm0, %v5619_v0 }
 0x21e   :  { %5277 = vmatmul.mubr.msk.f32.vlgmr.msra.gmra.mxu1 %vm573_vm4, %v536_v41  ;;  %5323 = vmatprep.subr.mxu0 %v5619_v0 }
 0x21f   :  { %5285 = vmatpush3.msra.mxu1 %v4858_v44  ;;  %v5223_v47 = vpop.f32.mrf.mxu1  ;;  %5286 = vmatprep.mubr.msk.f32.mxu1 %vm5620_vm0, %v5619_v0 }
 0x220   :  { %5294 = vmatprep.subr.mxu1 %v5619_v0  ;;  %5302 = vmatmul.mubr.msk.f32.vlgmr.msra.gmra.mxu0 %vm573_vm4, %v5223_v47 }
 0x221   :  { %5327 = vmatprep.mubr.msk.f32.mxu0 %vm5620_vm0, %v5619_v0  ;;  %v556_v46 = vpop.f32.mrf.mxu1  ;;  %5324 = vmatpush3.msra.mxu0 %v1884_v52  ;;  %v4870_v52 = vld [vmem:[%s6865_s27 + $0x10] sm:$0xff] }
 0x222   :  { %5287 = vmatmul.mubr.msk.f32.vlgmr.msra.gmra.mxu1 %vm573_vm4, %v546_v45  ;;  %5325 = vmatprep.subr.mxu0 %v5619_v0 }
 0x223   :  { %5295 = vmatpush3.msra.mxu1 %v4862_v48  ;;  %5296 = vmatprep.mubr.msk.f32.mxu1 %vm5620_vm0, %v5619_v0 }
 0x224   :  { %5304 = vmatprep.subr.mxu1 %v5619_v0  ;;  %5326 = vmatpush3.msra.mxu0 %v1883_v53  ;;  %v4874_v53 = vld [vmem:[%s6865_s27 + $0x28] sm:$0xff] }
 0x225   :  { %5330 = vmatprep.subr.mxu0 %v5619_v0 }
 0x226   :  { %5297 = vmatmul.mubr.msk.f32.vlgmr.msra.gmra.mxu1 %vm573_vm4, %v556_v46 }
 0x227   :  { %5320 = vmatprep.mubr.msk.f32.mxu1 %vm5620_vm0, %v5619_v0  ;;  %5305 = vmatpush3.msra.mxu1 %v1802_v50 }
 0x228   :  { %5306 = vmatprep.subr.mxu1 %v5619_v0 }
 0x229   :  { %5307 = vmatpush3.msra.mxu1 %v1801_v51  ;;  %v4871_v51 = vld [vmem:[%s6865_s27 + $0x18] sm:$0xff] }
 0x22a   :  { %5308 = vmatprep.subr.mxu1 %v5619_v0 }
 0x22b   :  { %5309 = vmatpush3.msra.mxu1 %v1800_v49 }
 0x22c   :  { %5310 = vmatprep.subr.mxu1 %v5619_v0 }
 0x22d   :  { %5311 = vmatpush3.msra.mxu1 %v1799_v54 }
 0x22e   :  { %5312 = vmatprep.subr.mxu1 %v5619_v0 }
 0x22f   :  { %5313 = vmatpush3.msra.mxu1 %v1798_v55  ;;  %v4873_v55 = vld [vmem:[%s6865_s27 + $0x20] sm:$0xff] }
 0x230   :  { %5314 = vmatprep.subr.mxu1 %v5619_v0 }
 0x231   :  { %5315 = vmatpush3.msra.mxu1 %v1797_v57 }
 0x232   :  { %5316 = vmatprep.subr.mxu1 %v5619_v0 }
 0x233   :  { %5317 = vmatpush3.msra.mxu1 %v1796_v56  ;;  %v4877_v56 = vld [vmem:[%s6865_s27 + $0x38] sm:$0xff] }
 0x234   :  { %5318 = vmatprep.subr.mxu1 %v5619_v0 }
 0x235   :  { %5319 = vmatpush3.msra.mxu1 %v1795_v58  ;;  %v4876_v58 = vld [vmem:[%s6865_s27 + $0x30] sm:$0xff]  ;;  %s6868_s27 = sld [smem:[#allocation11_spill]] }
 0x236   :  { %5321 = vmatmul.mubr.msk.f32.vlgmr.msra.gmra.mxu1 %vm103_vm1, %v6166_v59  ;;  %5351 = vmatprep.subr.mxu1 %v5619_v0 }
 0x237   :  { %5367 = vmatprep.mubr.msk.f32.mxu1 %vm5620_vm0, %v5619_v0 }
 0x2c6   :  { %v643_v60 = vpop.f32.mrf.mxu1 }
 0x2c7   :  { %v647_v3 = vadd.f32 %v4834_v61, %v643_v60 }
 0x2c8   :  { %v5228_v62 = vpop.f32.mrf.mxu1  ;;  %v871_v63 = vpop.f32.mrf.mxu0 }
 0x2ca   :  { %v719_v1 = vpop.f32.mrf.mxu1  ;;  %v5243_v2 = vpop.f32.mrf.mxu0 }
 0x2cb   :  { %v723_v6 = vadd.f32 %v719_v1, %v647_v3  ;;  %v2203_v1 = vld [vmem:[%s6868_s27 + $0x30] sm:$0xff]  ;;  %v2202_v2 = vld [vmem:[%s6868_s27 + $0x28] sm:$0xff]  ;;  %v2201_v3 = vld [vmem:[%s6868_s27 + $0x20] sm:$0xff] }
 0x2cc   :  { %v5233_v4 = vpop.f32.mrf.mxu1  ;;  %v1023_v5 = vpop.f32.mrf.mxu0 }
 0x2cd   :  { %v2200_v4 = vld [vmem:[%s6868_s27 + $0x18] sm:$0xff] }
 0x2ce   :  { %v795_v7 = vpop.f32.mrf.mxu1  ;;  %v5253_v8 = vpop.f32.mrf.mxu0 }
 0x2cf   :  { %v799_v9 = vadd.f32 %v795_v7, %v723_v6  ;;  %v2198_v6 = vld [vmem:[%s6868_s27 + $0x8] sm:$0xff]  ;;  %v2197_v7 = vld [vmem:[%s6868_s27] sm:$0xff] }
 0x2d0   :  { %v5238_v10 = vpop.f32.mrf.mxu1  ;;  %v1175_v11 = vpop.f32.mrf.mxu0  ;;  %v4867_v8 = vld [vmem:[%s6824_s10] ss:$0 sm:$0xff] }
 0x2d1   :  { %v875_v12 = vadd.f32 %v871_v63, %v799_v9  ;;  %v2204_v63 = vld [vmem:[%s6868_s27 + $0x38] sm:$0xff] }
 0x2d2   :  { %v947_v13 = vpop.f32.mrf.mxu1  ;;  %v5263_v14 = vpop.f32.mrf.mxu0  ;;  %5352 = vmatpush3.msra.mxu1 %v2204_v63 }
 0x2d3   :  { %v951_v15 = vadd.f32 %v947_v13, %v875_v12  ;;  %5353 = vmatprep.subr.mxu1 %v5619_v0 }
 0x2d4   :  { %v5248_v16 = vpop.f32.mrf.mxu1  ;;  %v1327_v17 = vpop.f32.mrf.mxu0  ;;  %5354 = vmatpush3.msra.mxu1 %v2203_v1 }
 0x2d5   :  { %v1027_v18 = vadd.f32 %v1023_v5, %v951_v15  ;;  %5355 = vmatprep.subr.mxu1 %v5619_v0  ;;  %v2199_v5 = vld [vmem:[%s6868_s27 + $0x10] sm:$0xff] }
 0x2d6   :  { %v1099_v19 = vpop.f32.mrf.mxu1  ;;  %v5273_v20 = vpop.f32.mrf.mxu0  ;;  %5356 = vmatpush3.msra.mxu1 %v2202_v2 }
 0x2d7   :  { %v1103_v21 = vadd.f32 %v1099_v19, %v1027_v18  ;;  %5357 = vmatprep.subr.mxu1 %v5619_v0 }
 0x2d8   :  { %v5258_v22 = vpop.f32.mrf.mxu1  ;;  %v1479_v23 = vpop.f32.mrf.mxu0  ;;  %5358 = vmatpush3.msra.mxu1 %v2201_v3  ;;  %v2594_v3 = vld [vmem:[%s6829_s14 + $0x10] sm:$0xff] }
 0x2d9   :  { %v1179_v25 = vadd.f32 %v1175_v11, %v1103_v21  ;;  %5359 = vmatprep.subr.mxu1 %v5619_v0 }
 0x2da   :  { %v1251_v26 = vpop.f32.mrf.mxu1  ;;  %v5283_v27 = vpop.f32.mrf.mxu0  ;;  %5360 = vmatpush3.msra.mxu1 %v2200_v4 }
 0x2db   :  { %v1255_v28 = vadd.f32 %v1251_v26, %v1179_v25  ;;  %5361 = vmatprep.subr.mxu1 %v5619_v0 }
 0x2dc   :  { %v5268_v29 = vpop.f32.mrf.mxu1  ;;  %v1631_v24 = vpop.f32.mrf.mxu0  ;;  %5362 = vmatpush3.msra.mxu1 %v2199_v5 }
 0x2dd   :  { %v1331_v30 = vadd.f32 %v1327_v17, %v1255_v28  ;;  %5363 = vmatprep.subr.mxu1 %v5619_v0  ;;  %v2296_v28 = vld [vmem:[%s6825_s13 + $0x38] sm:$0xff]  ;;  %v2295_v29 = vld [vmem:[%s6825_s13 + $0x30] sm:$0xff] }
 0x2de   :  { %v1403_v31 = vpop.f32.mrf.mxu1  ;;  %v5293_v32 = vpop.f32.mrf.mxu0  ;;  %5364 = vmatpush3.msra.mxu1 %v2198_v6 }
 0x2df   :  { %v1407_v33 = vadd.f32 %v1403_v31, %v1331_v30  ;;  %5365 = vmatprep.subr.mxu1 %v5619_v0  ;;  %v2287_v31 = vld [vmem:[%s6827_s3] sm:$0x3]  ;;  %s5630_s3 = smov 24  }
 0x2e0   :  { %v5278_v34 = vpop.f32.mrf.mxu1  ;;  %v1783_v35 = vpop.f32.mrf.mxu0  ;;  %5366 = vmatpush3.msra.mxu1 %v2197_v7 }
 0x2e1   :  { %v1483_v36 = vadd.f32 %v1479_v23, %v1407_v33  ;;  %5389 = vmatprep.subr.mxu1 %v5619_v0 }
 0x2e2   :  { %v1555_v37 = vpop.f32.mrf.mxu1  ;;  %v5303_v38 = vpop.f32.mrf.mxu0 }
 0x2e3   :  { %v1559_v39 = vadd.f32 %v1555_v37, %v1483_v36 }
 0x2e4   :  { %v5288_v40 = vpop.f32.mrf.mxu1 }
 0x2e5   :  { %v1635_v41 = vadd.f32 %v1631_v24, %v1559_v39  ;;  %v4880_v24 = vld [vmem:[%s6826_s12] ss:$0 sm:$0xff] }
 0x2e6   :  { %v1707_v42 = vpop.f32.mrf.mxu1 }
 0x2e7   :  { %v1711_v43 = vadd.f32 %v1707_v42, %v1635_v41 }
 0x2e8   :  { %v5298_v44 = vpop.f32.mrf.mxu1 }
 0x2e9   :  { %v1787_v45 = vadd.f32 %v1783_v35, %v1711_v43  ;;  %v2294_v43 = vld [vmem:[%s6825_s13 + $0x28] sm:$0xff]  ;;  %v2293_v44 = vld [vmem:[%s6825_s13 + $0x20] sm:$0xff] }
 0x2eb   :  { %v1789_v47 = vmin.f32 %v1787_v45, 0.0  ;;  %vm1788_vm5 = vcmp.gt.f32.partialorder %v1787_v45, 0.0 }
 0x2ed   :  { %v1790_v48 = vmul.f32 1.442695, %v1789_v47  ;;  %v2291_v47 = vld [vmem:[%s6825_s13 + $0x10] sm:$0xff] }
 0x2ef   :  { %5579 = vpow2.f32 %v1790_v48  ;;  %v2290_v48 = vld [vmem:[%s6825_s13 + $0x8] sm:$0xff] }
 0x2f6   :  { %v1879_v61 = vpop.f32.mrf.mxu1 }
 0x2f7   :  { %v1880_v11 = vadd.f32 %v4867_v8, %v1879_v61 }
 0x2f8   :  { %v5322_v62 = vpop.f32.mrf.mxu1 }
 0x2fc   :  { %v5580_v46 = vpop.eup %5579 }
 0x2fd   :  { %v4866_v50 = vadd.f32 -1.0, %v5580_v46  ;;  %v2289_v46 = vld [vmem:[%s6825_s13] sm:$0xff] }
 0x2ff   :  { %v1793_v49 = vsel %vm1788_vm5, %v1787_v45, %v4866_v50  ;;  %v2292_v45 = vld [vmem:[%s6825_s13 + $0x18] sm:$0xff]  ;;  %v2394_v50 = vld [vmem:[%s6829_s14] sm:$0xff]  ;;  %s5627_s13 = smov 80  }
 0x300   :  { %5328 = vmatmul.mubr.msk.f32.vlgmr.msra.gmra.mxu0 %vm6848_vm2, %v1793_v49  ;;  %v1963_v54 = vrot.slane %v1793_v49, 2  ;;  %v2040_v57 = vrot.slane %v1793_v49, 4  ;;  %v2117_v60 = vrot.slane %v1793_v49, 6 }
 0x301   :  { %5331 = vmatpush3.msra.mxu0 %v4871_v51  ;;  %5334 = vmatprep.mubr.msk.f32.mxu0 %vm5620_vm0, %v5619_v0  ;;  %v2493_v51 = vld [vmem:[%s6829_s14 + $0x8] sm:$0xff] }
 0x302   :  { %5332 = vmatprep.subr.mxu0 %v5619_v0 }
 0x303   :  { %5333 = vmatpush3.msra.mxu0 %v4870_v52 }
 0x304   :  { %5337 = vmatprep.subr.mxu0 %v5619_v0  ;;  %5335 = vmatmul.mubr.msk.f32.vlgmr.msra.gmra.mxu0 %vm6848_vm2, %v1963_v54 }
 0x305   :  { %5338 = vmatpush3.msra.mxu0 %v4874_v53  ;;  %5341 = vmatprep.mubr.msk.f32.mxu0 %vm5620_vm0, %v5619_v0 }
 0x306   :  { %5339 = vmatprep.subr.mxu0 %v5619_v0 }
 0x307   :  { %5340 = vmatpush3.msra.mxu0 %v4873_v55 }
 0x308   :  { %5344 = vmatprep.subr.mxu0 %v5619_v0  ;;  %5342 = vmatmul.mubr.msk.f32.vlgmr.msra.gmra.mxu0 %vm6848_vm2, %v2040_v57 }
 0x309   :  { %5345 = vmatpush3.msra.mxu0 %v4877_v56  ;;  %5348 = vmatprep.mubr.msk.f32.mxu0 %vm5620_vm0, %v5619_v0 }
 0x30a   :  { %5346 = vmatprep.subr.mxu0 %v5619_v0 }
 0x30b   :  { %5347 = vmatpush3.msra.mxu0 %v4876_v58 }
 0x30c   :  { %5349 = vmatmul.mubr.msk.f32.vlgmr.msra.gmra.mxu0 %vm6848_vm2, %v2117_v60  ;;  %5370 = vmatprep.subr.mxu0 %v5619_v0 }
 0x30d   :  { %5386 = vmatprep.mubr.msk.f32.mxu0 %vm5620_vm0, %v5619_v0  ;;  %5371 = vmatpush3.msra.mxu0 %v2296_v28 }
 0x30e   :  { %5372 = vmatprep.subr.mxu0 %v5619_v0 }
 0x30f   :  { %5373 = vmatpush3.msra.mxu0 %v2295_v29 }
 0x310   :  { %5374 = vmatprep.subr.mxu0 %v5619_v0 }
 0x311   :  { %5375 = vmatpush3.msra.mxu0 %v2294_v43  ;;  %v3185_v43 = vld [vmem:[%s6832_s16 + $0x18] sm:$0xff] }
 0x312   :  { %5376 = vmatprep.subr.mxu0 %v5619_v0 }
 0x313   :  { %5377 = vmatpush3.msra.mxu0 %v2293_v44  ;;  %v3184_v44 = vld [vmem:[%s6832_s16 + $0x10] sm:$0xff] }
 0x314   :  { %5378 = vmatprep.subr.mxu0 %v5619_v0 }
 0x315   :  { %5379 = vmatpush3.msra.mxu0 %v2292_v45  ;;  %v3183_v45 = vld [vmem:[%s6832_s16 + $0x8] sm:$0xff] }
 0x316   :  { %5380 = vmatprep.subr.mxu0 %v5619_v0 }
 0x317   :  { %5381 = vmatpush3.msra.mxu0 %v2291_v47  ;;  %v3182_v47 = vld [vmem:[%s6832_s16] sm:$0xff] }
 0x318   :  { %5382 = vmatprep.subr.mxu0 %v5619_v0 }
 0x319   :  { %5383 = vmatpush3.msra.mxu0 %v2290_v48 }
 0x31a   :  { %5384 = vmatprep.subr.mxu0 %v5619_v0 }
 0x31b   :  { %5385 = vmatpush3.msra.mxu0 %v2289_v46 }
 0x31c   :  { %5387 = vmatmul.mubr.msk.f32.vlgmr.msra.gmra.mxu0 %vm103_vm1, %v6166_v59  ;;  %5394 = vmatprep.subr.mxu0 %v5619_v0 }
 0x31d   :  { %5396 = vmatprep.mubr.msk.f32.mxu0 %vm5620_vm0, %v5619_v0  ;;  %5395 = vmatpush3.msra.mxu0 %v2493_v51 }
 0x31e   :  { %5404 = vmatprep.subr.mxu0 %v5619_v0 }
 0x3c0   :  { %v1955_v9 = vpop.f32.mrf.mxu0 }
 0x3c1   :  { %v1959_v14 = vadd.f32 %v1955_v9, %v1880_v11 }
 0x3c2   :  { %v5329_v10 = vpop.f32.mrf.mxu0 }
 0x3c3   :  { %v2695_v10 = vld [vmem:[%s6829_s14 + $0x18] sm:$0xff] }
 0x3c4   :  { %v2032_v12 = vpop.f32.mrf.mxu0 }
 0x3c5   :  { %v2036_v16 = vadd.f32 %v2032_v12, %v1959_v14  ;;  %v2796_v12 = vld [vmem:[%s6829_s14 + $0x20] sm:$0xff]  ;;  %v2897_v14 = vld [vmem:[%s6829_s14 + $0x28] sm:$0xff] }
 0x3c6   :  { %v5336_v13 = vpop.f32.mrf.mxu0 }
 0x3c8   :  { %v2109_v15 = vpop.f32.mrf.mxu0 }
 0x3c9   :  { %v2113_v18 = vadd.f32 %v2109_v15, %v2036_v16 }
 0x3ca   :  { %v5343_v17 = vpop.f32.mrf.mxu0 }
 0x3cb   :  { %v2998_v17 = vld [vmem:[%s6829_s14 + $0x30] sm:$0xff] }
 0x3cc   :  { %v2186_v19 = vpop.f32.mrf.mxu0 }
 0x3cd   :  { %v2190_v20 = vadd.f32 %v2186_v19, %v2113_v18  ;;  %v3099_v18 = vld [vmem:[%s6829_s14 + $0x38] sm:$0xff]  ;;  %s5631_s14 = smov 8  }
 0x3ce   :  { %v5350_v21 = vpop.f32.mrf.mxu0 }
 0x3cf   :  { %v2192_v22 = vmin.f32 %v2190_v20, 0.0  ;;  %vm2191_vm6 = vcmp.gt.f32.partialorder %v2190_v20, 0.0 }
 0x3d1   :  { %v2193_v23 = vmul.f32 1.442695, %v2192_v22 }
 0x3d3   :  { %5581 = vpow2.f32 %v2193_v23 }
 0x3dc   :  { %v2370_v8 = vpop.f32.mrf.mxu0 }
 0x3de   :  { %v5388_v9 = vpop.f32.mrf.mxu0 }
 0x3e0   :  { %v5582_v25 = vpop.eup %5581 }
 0x3e1   :  { %v4879_v26 = vadd.f32 -1.0, %v5582_v25 }
 0x3e3   :  { %v2196_v27 = vsel %vm2191_vm6, %v2190_v20, %v4879_v26 }
 0x3e4   :  { %5368 = vmatmul.mubr.msk.f32.vlgmr.msra.gmra.mxu1 %vm103_vm1, %v2196_v27 }
 0x3e5   :  { %5391 = vmatprep.mubr.msk.f32.mxu1 %vm5620_vm0, %v5619_v0  ;;  %5390 = vmatpush3.msra.mxu1 %v2394_v50 }
 0x3e6   :  { %5399 = vmatprep.subr.mxu1 %v5619_v0 }
 0x4a4   :  { %v2281_v30 = vpop.f32.mrf.mxu1 }
 0x4a5   :  { %v6265_v32 = vadd.f32 %v4880_v24, %v2281_v30  ;;  %v4882_v30 = vld [vmem:[%s6831_s15] ss:$0 sm:$0xff]  ;;  %s5635_s15 = smov 32  }
 0x4a6   :  { %v5369_v33 = vpop.f32.mrf.mxu1 }
 0x4a7   :  { %v6268_v34 = vadd.f32 %v2287_v31, %v6265_v32  ;;  %2286 = vst.msk [vmem:[%s6828_s22] sm:$0x3] %vm6847_vm7, %v6265_v32  ;;  %v2470_v5 = vsel %vm2469_vm9, %v6265_v32, -inf  ;;  %v2375_v6 = vsel %vm2374_vm15, %v6265_v32, -inf  ;;  %v2571_v7 = vsel %vm2570_vm11, %v6265_v32, -inf }
 0x4a8   :  { %v2371_v31 = vadd.f32 %v4882_v30, %v2370_v8 }
 0x4a9   :  { %v2688_v35 = vsel %vm2671_vm8, %v6268_v34, -inf  ;;  %v2486_v36 = vsel %vm2469_vm9, %v6268_v34, -inf  ;;  %v2789_v37 = vsel %vm2772_vm10, %v6268_v34, -inf  ;;  %v2587_v38 = vsel %vm2570_vm11, %v6268_v34, -inf }
 0x4aa   :  { %2689 = vmax.xlane.f32.xlu1 %v2688_v35  ;;  %2487 = vmax.xlane.f32.xlu0 %v2486_v36  ;;  %v2991_v39 = vsel %vm2974_vm12, %v6268_v34, -inf  ;;  %v2890_v40 = vsel %vm2873_vm13, %v6268_v34, -inf  ;;  %v3092_v41 = vsel %vm3075_vm14, %v6268_v34, -inf  ;;  %v2387_v42 = vsel %vm2374_vm15, %v6268_v34, -inf  ;;  %v3189_v36 = vld [vmem:[%s6832_s16 + $0x38] sm:$0xff] }
 0x4ae   :  { %2790 = vmax.xlane.f32.xlu1 %v2789_v37  ;;  %2588 = vmax.xlane.f32.xlu0 %v2587_v38  ;;  %v3188_v38 = vld [vmem:[%s6832_s16 + $0x30] sm:$0xff] }
 0x4b2   :  { %2992 = vmax.xlane.f32.xlu1 %v2991_v39  ;;  %2891 = vmax.xlane.f32.xlu0 %v2890_v40  ;;  %v3187_v40 = vld [vmem:[%s6832_s16 + $0x28] sm:$0xff] }
 0x4b6   :  { %3093 = vmax.xlane.f32.xlu0 %v3092_v41  ;;  %2388 = vmax.xlane.f32.xlu1 %v2387_v42  ;;  %v3186_v42 = vld [vmem:[%s6832_s16 + $0x20] sm:$0xff] }
 0x533   :  { %v2690_v49 = vpop.xlane.xlu1 %2689  ;;  %v2488_v52 = vpop.xlane.xlu0 %2487 }
 0x534   :  { %vm2489_vm3 = vcmp.ge.f32.partialorder %v6268_v34, %v2488_v52  ;;  %vm2691_vm6 = vcmp.ge.f32.partialorder %v6268_v34, %v2690_v49 }
 0x535   :  { %v4886_v59 = vsel %vm2489_vm3, 1.0, %v5619_v0  ;;  %v4890_v58 = vsel %vm2691_vm6, 1.0, %v5619_v0 }
 0x536   :  { %2495 = vrot.lane.b32.xlu0 %v4886_v59, %s5621_s6 }
 0x537   :  { %v2791_v54 = vpop.xlane.xlu1 %2790  ;;  %v2589_v53 = vpop.xlane.xlu0 %2588 }
 0x538   :  { %vm2590_vm5 = vcmp.ge.f32.partialorder %v6268_v34, %v2589_v53  ;;  %vm2792_vm3 = vcmp.ge.f32.partialorder %v6268_v34, %v2791_v54 }
 0x539   :  { %v4888_v55 = vsel %vm2590_vm5, 1.0, %v5619_v0  ;;  %v4892_v63 = vsel %vm2792_vm3, 1.0, %v5619_v0 }
 0x53a   :  { %2596 = vrot.lane.b32.xlu1 %v4888_v55, %s5622_s9 }
 0x53b   :  { %v2993_v57 = vpop.xlane.xlu1 %2992  ;;  %v2892_v56 = vpop.xlane.xlu0 %2891 }
 0x53c   :  { %vm2893_vm7 = vcmp.ge.f32.partialorder %v6268_v34, %v2892_v56 }
 0x53d   :  { %v4894_v60 = vsel %vm2893_vm7, 1.0, %v5619_v0  ;;  %vm2994_vm7 = vcmp.ge.f32.partialorder %v6268_v34, %v2993_v57 }
 0x53e   :  { %2899 = vrot.lane.b32.xlu0 %v4894_v60, %s5623_s7  ;;  %2697 = vrot.lane.b32.xlu1 %v4890_v58, %s5624_s5  ;;  %v4896_v4 = vsel %vm2994_vm7, 1.0, %v5619_v0  ;;  %vm3533_vm7 = vcmask 1041920  }
 0x53f   :  { %v3094_v61 = vpop.xlane.xlu0 %3093  ;;  %v2389_v62 = vpop.xlane.xlu1 %2388 }
 0x540   :  { %vm3095_vm5 = vcmp.ge.f32.partialorder %v6268_v34, %v3094_v61  ;;  %vm2390_vm2 = vcmp.ge.f32.partialorder %v6268_v34, %v2389_v62 }
 0x541   :  { %v4898_v1 = vsel %vm3095_vm5, 1.0, %v5619_v0  ;;  %v4884_v2 = vsel %vm2390_vm2, 1.0, %v5619_v0 }
 0x542   :  { %2393 = vst.msk [vmem:[%s6830_s24] sm:$0x3] %vm2374_vm15, %v4884_v2  ;;  %3101 = vrot.lane.b32.xlu0 %v4898_v1, %s5625_s11  ;;  %2798 = vrot.lane.b32.xlu1 %v4892_v63, %s5626_s4 }
 0x543   :  { %2492 = vst.msk [vmem:[%s6830_s24] sm:$0x3] %vm2469_vm9, %v4886_v59  ;;  %5392 = vmatmul.mubr.msk.f32.vlgmr.msra.gmra.mxu1 %vm573_vm4, %v4884_v2 }
 0x544   :  { %2593 = vst.msk [vmem:[%s6830_s24] sm:$0x3] %vm2570_vm11, %v4888_v55  ;;  %5400 = vmatpush3.msra.mxu1 %v2594_v3  ;;  %5401 = vmatprep.mubr.msk.f32.mxu1 %vm5620_vm0, %v5619_v0 }
 0x545   :  { %2694 = vst.msk [vmem:[%s6830_s24] sm:$0x3] %vm2671_vm8, %v4890_v58  ;;  %5409 = vmatprep.subr.mxu1 %v5619_v0 }
 0x546   :  { %2795 = vst.msk [vmem:[%s6830_s24] sm:$0x3] %vm2772_vm10, %v4892_v63  ;;  %3000 = vrot.lane.b32.xlu1 %v4896_v4, %s5627_s13 }
 0x547   :  { %2896 = vst.msk [vmem:[%s6830_s24] sm:$0x3] %vm2873_vm13, %v4894_v60 }
 0x548   :  { %2997 = vst.msk [vmem:[%s6830_s24] sm:$0x3] %vm2974_vm12, %v4896_v4 }
 0x549   :  { %3098 = vst.msk [vmem:[%s6830_s24] sm:$0x3] %vm3075_vm14, %v4898_v1 }
 0x561   :  { %2471 = vmax.xlane.f32.xlu0 %v2470_v5 }
 0x56a   :  { %2376 = vmax.xlane.f32.xlu1 %v2375_v6 }
 0x56e   :  { %2572 = vmax.xlane.f32.xlu1 %v2571_v7 }
 0x5a8   :  { %v2496_v11 = vpop.permute.xlu0 %2495 }
 0x5a9   :  { %5397 = vmatmul.mubr.msk.f32.vlgmr.msra.gmra.mxu0 %vm573_vm4, %v2496_v11 }
 0x5aa   :  { %5405 = vmatpush3.msra.mxu0 %v2695_v10  ;;  %5406 = vmatprep.mubr.msk.f32.mxu0 %vm5620_vm0, %v5619_v0 }
 0x5ab   :  { %5414 = vmatprep.subr.mxu0 %v5619_v0 }
 0x5ac   :  { %v2597_v13 = vpop.permute.xlu1 %2596 }
 0x5ad   :  { %5402 = vmatmul.mubr.msk.f32.vlgmr.msra.gmra.mxu1 %vm573_vm4, %v2597_v13 }
 0x5ae   :  { %5410 = vmatpush3.msra.mxu1 %v2796_v12  ;;  %5411 = vmatprep.mubr.msk.f32.mxu1 %vm5620_vm0, %v5619_v0 }
 0x5af   :  { %5419 = vmatprep.subr.mxu1 %v5619_v0 }
 0x5b0   :  { %v2698_v15 = vpop.permute.xlu1 %2697  ;;  %v2900_v16 = vpop.permute.xlu0 %2899 }
 0x5b1   :  { %5407 = vmatmul.mubr.msk.f32.vlgmr.msra.gmra.mxu0 %vm573_vm4, %v2698_v15 }
 0x5b2   :  { %5415 = vmatpush3.msra.mxu0 %v2897_v14  ;;  %5416 = vmatprep.mubr.msk.f32.mxu0 %vm5620_vm0, %v5619_v0 }
 0x5b3   :  { %5424 = vmatprep.subr.mxu0 %v5619_v0 }
 0x5b4   :  { %v2799_v19 = vpop.permute.xlu1 %2798  ;;  %v3102_v20 = vpop.permute.xlu0 %3101 }
 0x5b5   :  { %5412 = vmatmul.mubr.msk.f32.vlgmr.msra.gmra.mxu1 %vm573_vm4, %v2799_v19  ;;  %5417 = vmatmul.mubr.msk.f32.vlgmr.msra.gmra.mxu0 %vm573_vm4, %v2900_v16  ;;  %v3271_v16 = vld [vmem:[%s6833_s18 + $0x8] sm:$0xff] }
 0x5b6   :  { %5420 = vmatpush3.msra.mxu1 %v2998_v17  ;;  %5425 = vmatpush3.msra.mxu0 %v3099_v18 }
 0x5b7   :  { %5421 = vmatprep.mubr.msk.f32.mxu1 %vm5620_vm0, %v5619_v0  ;;  %5426 = vmatprep.mubr.msk.f32.mxu0 %vm5620_vm0, %v5619_v0 }
 0x5b8   :  { %v3001_v21 = vpop.permute.xlu1 %3000  ;;  %5429 = vmatprep.subr.mxu1 %v5619_v0  ;;  %5448 = vmatprep.subr.mxu0 %v5619_v0 }
 0x5b9   :  { %5422 = vmatmul.mubr.msk.f32.vlgmr.msra.gmra.mxu1 %vm573_vm4, %v3001_v21  ;;  %5427 = vmatmul.mubr.msk.f32.vlgmr.msra.gmra.mxu0 %vm573_vm4, %v3102_v20  ;;  %v3270_v20 = vld [vmem:[%s6833_s18] sm:$0xff] }
 0x5ba   :  { %5445 = vmatprep.mubr.msk.f32.mxu1 %vm5620_vm0, %v5619_v0  ;;  %5452 = vmatprep.mubr.msk.f32.mxu0 %vm5620_vm0, %v5619_v0 }
 0x5bb   :  { %5430 = vmatpush3.msra.mxu1 %v3189_v36  ;;  %5449 = vmatpush3.msra.mxu0 %v3271_v16 }
 0x5bc   :  { %5431 = vmatprep.subr.mxu1 %v5619_v0  ;;  %5450 = vmatprep.subr.mxu0 %v5619_v0 }
 0x5bd   :  { %5432 = vmatpush3.msra.mxu1 %v3188_v38  ;;  %5451 = vmatpush3.msra.mxu0 %v3270_v20 }
 0x5be   :  { %5433 = vmatprep.subr.mxu1 %v5619_v0  ;;  %5455 = vmatprep.subr.mxu0 %v5619_v0 }
 0x5bf   :  { %5434 = vmatpush3.msra.mxu1 %v3187_v40 }
 0x5c0   :  { %5435 = vmatprep.subr.mxu1 %v5619_v0 }
 0x5c1   :  { %5436 = vmatpush3.msra.mxu1 %v3186_v42  ;;  %v2672_v42 = vsel %vm2671_vm8, %v6265_v32, -inf }
 0x5c2   :  { %5437 = vmatprep.subr.mxu1 %v5619_v0 }
 0x5c3   :  { %5438 = vmatpush3.msra.mxu1 %v3185_v43 }
 0x5c4   :  { %5439 = vmatprep.subr.mxu1 %v5619_v0 }
 0x5c5   :  { %5440 = vmatpush3.msra.mxu1 %v3184_v44 }
 0x5c6   :  { %5441 = vmatprep.subr.mxu1 %v5619_v0 }
 0x5c7   :  { %5442 = vmatpush3.msra.mxu1 %v3183_v45 }
 0x5c8   :  { %5443 = vmatprep.subr.mxu1 %v5619_v0 }
 0x5c9   :  { %5444 = vmatpush3.msra.mxu1 %v3182_v47 }
 0x5ca   :  { %5470 = vmatprep.subr.mxu1 %v5619_v0 }
 0x5ea   :  { %v2472_v22 = vpop.xlane.xlu0 %2471 }
 0x5eb   :  { %v2473_v23 = vsub.f32 %v6265_v32, %v2472_v22 }
 0x5ed   :  { %v2474_v25 = vmul.f32 1.442695, %v2473_v23 }
 0x5ef   :  { %5583 = vpow2.f32 %v2474_v25 }
 0x5f3   :  { %v2377_v26 = vpop.xlane.xlu1 %2376 }
 0x5f4   :  { %v2378_v33 = vsub.f32 %v6265_v32, %v2377_v26 }
 0x5f6   :  { %v2379_v39 = vmul.f32 1.442695, %v2378_v33  ;;  %v4903_v33 = vld [vmem:[%s6837_s19] ss:$0 sm:$0xff]  ;;  %s5628_s19 = smov 56  }
 0x5f7   :  { %v2573_v27 = vpop.xlane.xlu1 %2572 }
 0x5f8   :  { %v2574_v28 = vsub.f32 %v6265_v32, %v2573_v27 }
 0x5fa   :  { %v2575_v29 = vmul.f32 1.442695, %v2574_v28  ;;  %v4901_v28 = vld [vmem:[%s6835_s17] ss:$0 sm:$0xff] }
 0x5fc   :  { %v6438_v24 = vpop.eup %5583  ;;  %5585 = vpow2.f32 %v2575_v29 }
 0x5fd   :  { %2477 = vrot.lane.b32.xlu0 %v6438_v24, %s5621_s6  ;;  %5587 = vpow2.f32 %v2379_v39 }
 0x603   :  { %v2464_v34 = vpop.f32.mrf.mxu1 }
 0x604   :  { %v2468_v35 = vadd.f32 %v2464_v34, %v2371_v31  ;;  %v6519_v31 = vld [vmem:[%s6836_s20] sm:$0xff]  ;;  %s5629_s20 = smov 40  }
 0x605   :  { %v5393_v37 = vpop.f32.mrf.mxu1 }
 0x609   :  { %v6457_v41 = vpop.eup %5585 }
 0x60a   :  { %2578 = vrot.lane.b32.xlu1 %v6457_v41, %s5622_s9  ;;  %v5588_v48 = vpop.eup %5587 }
 0x60b   :  { %v2381_v46 = vsel %vm2374_vm15, %v5588_v48, 0.0 }
 0x61c   :  { %2382 = vadd.xlane.f32.xlu0 %v2381_v46 }
 0x669   :  { %v2565_v50 = vpop.f32.mrf.mxu0 }
 0x66a   :  { %v2569_v54 = vadd.f32 %v2565_v50, %v2468_v35 }
 0x66b   :  { %v5398_v51 = vpop.f32.mrf.mxu0 }
 0x66d   :  { %v2666_v49 = vpop.f32.mrf.mxu1 }
 0x66e   :  { %v2670_v57 = vadd.f32 %v2666_v49, %v2569_v54 }
 0x66f   :  { %v2478_v52 = vpop.permute.xlu0 %2477  ;;  %v5403_v59 = vpop.f32.mrf.mxu1 }
 0x670   :  { %v2480_v53 = vsel %vm2374_vm15, %v2478_v52, 0.0  ;;  %v6604_v59 = vld [vmem:[%s6838_s21] ss:$0 sm:$0xff] }
 0x671   :  { %2481 = vadd.xlane.f32.xlu1 %v2480_v53  ;;  %v2767_v55 = vpop.f32.mrf.mxu0 }
 0x672   :  { %v2771_v58 = vadd.f32 %v2767_v55, %v2670_v57 }
 0x673   :  { %v5408_v56 = vpop.f32.mrf.mxu0 }
 0x675   :  { %v2868_v60 = vpop.f32.mrf.mxu1  ;;  %v2969_v61 = vpop.f32.mrf.mxu0 }
 0x676   :  { %v2872_v62 = vadd.f32 %v2868_v60, %v2771_v58 }
 0x677   :  { %v5413_v63 = vpop.f32.mrf.mxu1  ;;  %v5418_v1 = vpop.f32.mrf.mxu0 }
 0x678   :  { %v2973_v2 = vadd.f32 %v2969_v61, %v2872_v62  ;;  %v2773_v62 = vsel %vm2772_vm10, %v6265_v32, -inf }
 0x679   :  { %v3070_v3 = vpop.f32.mrf.mxu1  ;;  %v3171_v4 = vpop.f32.mrf.mxu0 }
 0x67a   :  { %v3074_v5 = vadd.f32 %v3070_v3, %v2973_v2 }
 0x67b   :  { %v5423_v6 = vpop.f32.mrf.mxu1  ;;  %v5428_v7 = vpop.f32.mrf.mxu0 }
 0x67c   :  { %v3175_v8 = vadd.f32 %v3171_v4, %v3074_v5  ;;  %v2579_v9 = vpop.permute.xlu1 %2578  ;;  %v5632_v5 = vmov 1983009808   ;;  %v3526_v7 = vlaneseq }
 0x67d   :  { %v2581_v10 = vsel %vm2374_vm15, %v2579_v9, 0.0  ;;  %v3524_v6 = vunpack.c.l.s4 %v5632_v5 }
 0x67e   :  { %v3177_v11 = vmin.f32 %v3175_v8, 0.0  ;;  %2582 = vadd.xlane.f32.xlu0 %v2581_v10  ;;  %vm3176_vm2 = vcmp.gt.f32.partialorder %v3175_v8, 0.0 }
 0x67f   :  { %v3525_v10 = vunpack.c.0.s8 %v3524_v6 }
 0x680   :  { %v3178_v12 = vmul.f32 1.442695, %v3177_v11  ;;  %v3527_v11 = vshrl.u32 %v3526_v7, 7 }
 0x682   :  { %5589 = vpow2.f32 %v3178_v12 }
 0x68f   :  { %v5590_v13 = vpop.eup %5589 }
 0x690   :  { %v4900_v14 = vadd.f32 -1.0, %v5590_v13 }
 0x692   :  { %v3181_v15 = vsel %vm3176_vm2, %v3175_v8, %v4900_v14 }
 0x693   :  { %5446 = vmatmul.mubr.msk.f32.vlgmr.msra.gmra.mxu1 %vm103_vm1, %v3181_v15  ;;  %vm6869_vm1 = vcmask 130048   ;;  %v6633_v15 = vsub.s32 %v3525_v10, %v3527_v11 }
 0x694   :  { %5472 = vmatprep.mubr.msk.f32.mxu1 %vm5620_vm0, %v5619_v0  ;;  %5471 = vmatpush3.msra.mxu1 %v6519_v31 }
 0x695   :  { %5480 = vmatprep.subr.mxu1 %v5619_v0 }
 0x6a5   :  { %v2383_v17 = vpop.xlane.xlu0 %2382 }
 0x6a6   :  { %5591 = vrcp.f32 %v2383_v17 }
 0x6b3   :  { %v5592_v18 = vpop.eup %5591 }
 0x6b4   :  { %v2385_v19 = vmul.f32 %v5592_v18, %v5588_v48 }
 0x6b6   :  { %2386 = vst.msk [vmem:[%s6834_s23] sm:$0x3] %vm2374_vm15, %v2385_v19 }
 0x6fa   :  { %v2482_v21 = vpop.xlane.xlu1 %2481 }
 0x6fb   :  { %5593 = vrcp.f32 %v2482_v21 }
 0x707   :  { %v2583_v22 = vpop.xlane.xlu0 %2582 }
 0x708   :  { %v5594_v23 = vpop.eup %5593  ;;  %5595 = vrcp.f32 %v2583_v22 }
 0x709   :  { %v2484_v25 = vmul.f32 %v5594_v23, %v6438_v24 }
 0x70b   :  { %2485 = vst.msk [vmem:[%s6834_s23] sm:$0x3] %vm2469_vm9, %v2484_v25 }
 0x715   :  { %v5596_v26 = vpop.eup %5595 }
 0x716   :  { %v2585_v27 = vmul.f32 %v5596_v26, %v6457_v41 }
 0x718   :  { %2586 = vst.msk [vmem:[%s6834_s23] sm:$0x3] %vm2570_vm11, %v2585_v27  ;;  %vm6870_vm11 = vcmask 517120  }
 0x719   :  { %vm6871_vm6 = vmmov %vm6870_vm11 }
 0x71a   :  { %vm6872_vm3 = vmmov %vm6871_vm6 }
 0x71b   :  { %vm6873_vm5 = vmmov %vm6872_vm3 }
 0x753   :  { %v3266_v29 = vpop.f32.mrf.mxu1 }
 0x754   :  { %v3267_v30 = vadd.f32 %v4901_v28, %v3266_v29 }
 0x755   :  { %v5447_v24 = vpop.f32.mrf.mxu1 }
 0x756   :  { %5453 = vmatmul.mubr.msk.f32.vlgmr.msra.gmra.mxu0 %vm6869_vm1, %v3267_v30  ;;  %v2874_v30 = vsel %vm2873_vm13, %v6265_v32, -inf }
 0x757   :  { %5457 = vmatprep.mubr.msk.f32.mxu0 %vm5620_vm0, %v5619_v0  ;;  %5456 = vmatpush3.msra.mxu0 %v6519_v31 }
 0x758   :  { %5460 = vmatprep.subr.mxu0 %v5619_v0 }
 0x816   :  { %v3348_v34 = vpop.f32.mrf.mxu0 }
 0x817   :  { %v3349_v35 = vadd.f32 %v4903_v33, %v3348_v34 }
 0x818   :  { %v5454_v36 = vpop.f32.mrf.mxu0 }
 0x819   :  { %v3353_v37 = vmin.f32 %v3349_v35, 0.0  ;;  %vm3352_vm9 = vcmp.gt.f32.partialorder %v3349_v35, 0.0 }
 0x81b   :  { %v3354_v38 = vmul.f32 1.442695, %v3353_v37  ;;  %v2975_v37 = vsel %vm2974_vm12, %v6265_v32, -inf }
 0x81d   :  { %5597 = vpow2.f32 %v3354_v38 }
 0x82a   :  { %v5598_v39 = vpop.eup %5597 }
 0x82b   :  { %v4905_v40 = vadd.f32 -1.0, %v5598_v39 }
 0x82d   :  { %v6528_v41 = vsel %vm3352_vm9, %v3349_v35, %v4905_v40 }
 0x82e   :  { %3803 = vrot.lane.b32.xlu1 %v6528_v41, %s5623_s7  ;;  %3626 = vrot.lane.b32.xlu0 %v6528_v41, %s5624_s5 }
 0x82f   :  { %5458 = vmatmul.mubr.msk.f32.vlgmr.msra.gmra.mxu0 %vm573_vm4, %v6528_v41 }
 0x830   :  { %5461 = vmatpush3.msra.mxu0 %v6519_v31  ;;  %5462 = vmatprep.mubr.msk.f32.mxu0 %vm5620_vm0, %v5619_v0 }
 0x831   :  { %5465 = vmatprep.subr.mxu0 %v5619_v0 }
 0x832   :  { %4157 = vrot.lane.b32.xlu1 %v6528_v41, %s5628_s19  ;;  %3980 = vrot.lane.b32.xlu0 %v6528_v41, %s5625_s11 }
 0x836   :  { %4334 = vrot.lane.b32.xlu1 %v6528_v41, %s5629_s20  ;;  %3543 = vrot.lane.b32.xlu0 %v6528_v41, %s5622_s9 }
 0x83a   :  { %4511 = vrot.lane.b32.xlu1 %v6528_v41, %s5630_s3  ;;  %3720 = vrot.lane.b32.xlu0 %v6528_v41, %s5626_s4 }
 0x83e   :  { %3448 = vrot.lane.b32.xlu1 %v6528_v41, %s5621_s6 }
 0x842   :  { %4688 = vrot.lane.b32.xlu1 %v6528_v41, %s5631_s14 }
 0x866   :  { %2673 = vmax.xlane.f32.xlu1 %v2672_v42 }
 0x877   :  { %3897 = vrot.lane.b32.xlu1 %v6528_v41, %s5627_s13 }
 0x8a0   :  { %v3804_v43 = vpop.permute.xlu1 %3803  ;;  %v3627_v44 = vpop.permute.xlu0 %3626 }
 0x8a1   :  { %5473 = vmatmul.mubr.msk.f32.vlgmr.msra.gmra.mxu1 %vm573_vm4, %v3627_v44 }
 0x8a2   :  { %5481 = vmatpush3.msra.mxu1 %v6519_v31  ;;  %5482 = vmatprep.mubr.msk.f32.mxu1 %vm5620_vm0, %v5619_v0 }
 0x8a3   :  { %5490 = vmatprep.subr.mxu1 %v5619_v0 }
 0x8a4   :  { %v4158_v45 = vpop.permute.xlu1 %4157  ;;  %v3981_v47 = vpop.permute.xlu0 %3980 }
 0x8a5   :  { %5483 = vmatmul.mubr.msk.f32.vlgmr.msra.gmra.mxu1 %vm573_vm4, %v3804_v43 }
 0x8a6   :  { %5491 = vmatpush3.msra.mxu1 %v6519_v31  ;;  %5492 = vmatprep.mubr.msk.f32.mxu1 %vm5620_vm0, %v5619_v0 }
 0x8a7   :  { %5500 = vmatprep.subr.mxu1 %v5619_v0 }
 0x8a8   :  { %v4335_v48 = vpop.permute.xlu1 %4334  ;;  %v3544_v51 = vpop.permute.xlu0 %3543 }
 0x8a9   :  { %5493 = vmatmul.mubr.msk.f32.vlgmr.msra.gmra.mxu1 %vm573_vm4, %v3981_v47 }
 0x8aa   :  { %5501 = vmatpush3.msra.mxu1 %v6519_v31  ;;  %5502 = vmatprep.mubr.msk.f32.mxu1 %vm5620_vm0, %v5619_v0 }
 0x8ab   :  { %5510 = vmatprep.subr.mxu1 %v5619_v0 }
 0x8ac   :  { %v4512_v46 = vpop.permute.xlu1 %4511  ;;  %v3721_v49 = vpop.permute.xlu0 %3720 }
 0x8ad   :  { %5503 = vmatmul.mubr.msk.f32.vlgmr.msra.gmra.mxu1 %vm573_vm4, %v4158_v45  ;;  %v3076_v45 = vsel %vm3075_vm14, %v6265_v32, -inf }
 0x8ae   :  { %5511 = vmatpush3.msra.mxu1 %v6519_v31  ;;  %5512 = vmatprep.mubr.msk.f32.mxu1 %vm5620_vm0, %v5619_v0 }
 0x8af   :  { %5520 = vmatprep.subr.mxu1 %v5619_v0 }
 0x8b0   :  { %v3449_v50 = vpop.permute.xlu1 %3448 }
 0x8b1   :  { %5463 = vmatmul.mubr.msk.f32.vlgmr.msra.gmra.mxu0 %vm573_vm4, %v3449_v50  ;;  %5513 = vmatmul.mubr.msk.f32.vlgmr.msra.gmra.mxu1 %vm573_vm4, %v4335_v48 }
 0x8b2   :  { %5466 = vmatpush3.msra.mxu0 %v6519_v31  ;;  %5467 = vmatprep.mubr.msk.f32.mxu0 %vm5620_vm0, %v5619_v0 }
 0x8b3   :  { %5521 = vmatpush3.msra.mxu1 %v6519_v31  ;;  %5522 = vmatprep.mubr.msk.f32.mxu1 %vm5620_vm0, %v5619_v0 }
 0x8b4   :  { %5475 = vmatprep.subr.mxu0 %v5619_v0  ;;  %5530 = vmatprep.subr.mxu1 %v5619_v0  ;;  %v4689_v52 = vpop.permute.xlu1 %4688 }
 0x8b5   :  { %5468 = vmatmul.mubr.msk.f32.vlgmr.msra.gmra.mxu0 %vm573_vm4, %v3544_v51  ;;  %5523 = vmatmul.mubr.msk.f32.vlgmr.msra.gmra.mxu1 %vm573_vm4, %v4512_v46 }
 0x8b6   :  { %5476 = vmatpush3.msra.mxu0 %v6519_v31  ;;  %5477 = vmatprep.mubr.msk.f32.mxu0 %vm5620_vm0, %v5619_v0 }
 0x8b7   :  { %5531 = vmatpush3.msra.mxu1 %v6519_v31  ;;  %5532 = vmatprep.mubr.msk.f32.mxu1 %vm5620_vm0, %v5619_v0 }
 0x8b8   :  { %5485 = vmatprep.subr.mxu0 %v5619_v0 }
 0x8b9   :  { %5478 = vmatmul.mubr.msk.f32.vlgmr.msra.gmra.mxu0 %vm573_vm4, %v3721_v49  ;;  %5533 = vmatmul.mubr.msk.f32.vlgmr.msra.gmra.mxu1 %vm573_vm4, %v4689_v52 }
 0x8ba   :  { %5486 = vmatpush3.msra.mxu0 %v6519_v31  ;;  %5487 = vmatprep.mubr.msk.f32.mxu0 %vm5620_vm0, %v5619_v0 }
 0x8bb   :  { %5495 = vmatprep.subr.mxu0 %v5619_v0 }
 0x8ef   :  { %v3435_v54 = vpop.f32.mrf.mxu0  ;;  %v2674_v53 = vpop.xlane.xlu1 %2673 }
 0x8f0   :  { %v3436_v55 = vadd.f32 %v6604_v59, %v3435_v54  ;;  %v2675_v57 = vsub.f32 %v6265_v32, %v2674_v53 }
 0x8f1   :  { %v5459_v56 = vpop.f32.mrf.mxu0 }
 0x8f2   :  { %3439 = vst.msk [vmem:[%s6839_s25] sm:$0x3] %vm6870_vm11, %v3436_v55  ;;  %v2676_v58 = vmul.f32 1.442695, %v2675_v57 }
 0x8f3   :  { %v3898_v60 = vpop.permute.xlu1 %3897 }
 0x8f4   :  { %5599 = vpow2.f32 %v2676_v58  ;;  %5488 = vmatmul.mubr.msk.f32.vlgmr.msra.gmra.mxu0 %vm573_vm4, %v3898_v60 }
 0x8f5   :  { %5496 = vmatpush3.msra.mxu0 %v6519_v31  ;;  %5497 = vmatprep.mubr.msk.f32.mxu0 %vm5620_vm0, %v5619_v0 }
 0x8f6   :  { %5505 = vmatprep.subr.mxu0 %v5619_v0 }
 0x901   :  { %v6617_v61 = vpop.eup %5599 }
 0x902   :  { %2679 = vrot.lane.b32.xlu1 %v6617_v61, %s5624_s5 }
 0x926   :  { %2774 = vmax.xlane.f32.xlu1 %v2773_v62 }
 0x961   :  { %v6623_v63 = vpop.f32.mrf.mxu1 }
 0x963   :  { %v5474_v1 = vpop.f32.mrf.mxu1 }
 0x965   :  { %v6625_v2 = vpop.f32.mrf.mxu1 }
 0x967   :  { %v5484_v3 = vpop.f32.mrf.mxu1 }
 0x969   :  { %v6627_v4 = vpop.f32.mrf.mxu1 }
 0x96b   :  { %v5494_v8 = vpop.f32.mrf.mxu1 }
 0x96d   :  { %v6629_v9 = vpop.f32.mrf.mxu1 }
 0x96f   :  { %v5504_v12 = vpop.f32.mrf.mxu1 }
 0x971   :  { %v3518_v13 = vpop.f32.mrf.mxu0  ;;  %v6631_v14 = vpop.f32.mrf.mxu1 }
 0x972   :  { %v6636_v16 = vadd.f32 %v6604_v59, %v3518_v13 }
 0x973   :  { %v5464_v17 = vpop.f32.mrf.mxu0  ;;  %v5514_v18 = vpop.f32.mrf.mxu1 }
 0x974   :  { %v3529_v19 = vrot.slane %v6636_v16, %v6633_v15  ;;  %v2680_v20 = vpop.permute.xlu1 %2679 }
 0x975   :  { %v3613_v21 = vpop.f32.mrf.mxu0  ;;  %v6640_v22 = vpop.f32.mrf.mxu1  ;;  %v2682_v23 = vsel %vm2374_vm15, %v2680_v20, 0.0 }
 0x976   :  { %v3614_v25 = vadd.f32 %v6604_v59, %v3613_v21  ;;  %2683 = vadd.xlane.f32.xlu0 %v2682_v23  ;;  %v3697_v23 = vadd.f32 %v6604_v59, %v6623_v63 }
 0x977   :  { %v5469_v26 = vpop.f32.mrf.mxu0  ;;  %v5524_v27 = vpop.f32.mrf.mxu1 }
 0x978   :  { %3617 = vst.msk [vmem:[%s6839_s25 + $0x2] sm:$0x3] %vm6871_vm6, %v3614_v25 }
 0x979   :  { %v3790_v28 = vpop.f32.mrf.mxu0  ;;  %v4758_v29 = vpop.f32.mrf.mxu1 }
 0x97a   :  { %v3791_v24 = vadd.f32 %v6604_v59, %v3790_v28  ;;  %v6652_v33 = vadd.f32 %v6604_v59, %v4758_v29  ;;  %2875 = vmax.xlane.f32.xlu0 %v2874_v30  ;;  %v3707_v29 = vrot.slane %v3697_v23, %v6633_v15  ;;  %v3874_v30 = vadd.f32 %v6604_v59, %v6625_v2 }
 0x97b   :  { %v5479_v34 = vpop.f32.mrf.mxu0  ;;  %v5534_v35 = vpop.f32.mrf.mxu1 }
 0x97c   :  { %3794 = vst.msk [vmem:[%s6839_s25 + $0x4] sm:$0x3] %vm6872_vm3, %v3791_v24  ;;  %v4769_v36 = vrot.slane %v6652_v33, %v6633_v15  ;;  %v3884_v35 = vrot.slane %v3874_v30, %v6633_v15 }
 0x97e   :  { %2976 = vmax.xlane.f32.xlu0 %v2975_v37  ;;  %v4051_v37 = vadd.f32 %v6604_v59, %v6627_v4  ;;  %v4582_v4 = vadd.f32 %v6604_v59, %v6640_v22 }
 0x980   :  { %v4061_v2 = vrot.slane %v4051_v37, %v6633_v15 }
 0x994   :  { %4074 = vrot.lane.b32.xlu0 %v6528_v41, %s5633_s8 }
 0x998   :  { %4251 = vrot.lane.b32.xlu0 %v6528_v41, %s5634_s1 }
 0x99c   :  { %4428 = vrot.lane.b32.xlu0 %v6528_v41, %s5635_s15 }
 0x9a0   :  { %4605 = vrot.lane.b32.xlu0 %v6528_v41, %s5636_s0 }
 0x9af   :  { %v2775_v38 = vpop.xlane.xlu1 %2774 }
 0x9b0   :  { %v2776_v39 = vsub.f32 %v6265_v32, %v2775_v38  ;;  %v4228_v38 = vadd.f32 %v6604_v59, %v6629_v9 }
 0x9b2   :  { %v2777_v40 = vmul.f32 1.442695, %v2776_v39  ;;  %v4238_v39 = vrot.slane %v4228_v38, %v6633_v15 }
 0x9b4   :  { %5601 = vpow2.f32 %v2777_v40  ;;  %v3967_v42 = vpop.f32.mrf.mxu0  ;;  %v4405_v40 = vadd.f32 %v6604_v59, %v6631_v14 }
 0x9b5   :  { %v3968_v43 = vadd.f32 %v6604_v59, %v3967_v42 }
 0x9b6   :  { %v5489_v44 = vpop.f32.mrf.mxu0  ;;  %v4415_v42 = vrot.slane %v4405_v40, %v6633_v15 }
 0x9b7   :  { %3971 = vst.msk [vmem:[%s6839_s25 + $0x6] sm:$0x3] %vm6873_vm5, %v3968_v43  ;;  %v4592_v43 = vrot.slane %v4582_v4, %v6633_v15 }
 0x9bf   :  { %3077 = vmax.xlane.f32.xlu0 %v3076_v45 }
 0x9c1   :  { %v5602_v47 = vpop.eup %5601 }
 0x9c2   :  { %2780 = vrot.lane.b32.xlu1 %v5602_v47, %s5626_s4 }
 0x9ff   :  { %v2684_v41 = vpop.xlane.xlu0 %2683 }
 0xa00   :  { %5603 = vrcp.f32 %v2684_v41 }
 0xa03   :  { %v2876_v48 = vpop.xlane.xlu0 %2875 }
 0xa04   :  { %v2877_v56 = vsub.f32 %v6265_v32, %v2876_v48 }
 0xa06   :  { %v2878_v58 = vmul.f32 1.442695, %v2877_v56 }
 0xa07   :  { %v2977_v46 = vpop.xlane.xlu0 %2976 }
 0xa08   :  { %v2978_v60 = vsub.f32 %v6265_v32, %v2977_v46  ;;  %5605 = vpow2.f32 %v2878_v58 }
 0xa0b   :  { %v4075_v50 = vpop.permute.xlu0 %4074 }
 0xa0c   :  { %5498 = vmatmul.mubr.msk.f32.vlgmr.msra.gmra.mxu0 %vm573_vm4, %v4075_v50 }
 0xa0d   :  { %v5604_v51 = vpop.eup %5603  ;;  %5506 = vmatpush3.msra.mxu0 %v6519_v31  ;;  %5507 = vmatprep.mubr.msk.f32.mxu0 %vm5620_vm0, %v5619_v0 }
 0xa0e   :  { %v2686_v49 = vmul.f32 %v5604_v51, %v6617_v61  ;;  %5515 = vmatprep.subr.mxu0 %v5619_v0  ;;  %v2979_v61 = vmul.f32 1.442695, %v2978_v60 }
 0xa0f   :  { %v4252_v52 = vpop.permute.xlu0 %4251 }
 0xa10   :  { %2687 = vst.msk [vmem:[%s6834_s23] sm:$0x3] %vm2671_vm8, %v2686_v49  ;;  %5508 = vmatmul.mubr.msk.f32.vlgmr.msra.gmra.mxu0 %vm573_vm4, %v4252_v52  ;;  %5607 = vpow2.f32 %v2979_v61 }
 0xa11   :  { %5516 = vmatpush3.msra.mxu0 %v6519_v31  ;;  %5517 = vmatprep.mubr.msk.f32.mxu0 %vm5620_vm0, %v5619_v0 }
 0xa12   :  { %5525 = vmatprep.subr.mxu0 %v5619_v0 }
 0xa13   :  { %v4429_v54 = vpop.permute.xlu0 %4428 }
 0xa14   :  { %5518 = vmatmul.mubr.msk.f32.vlgmr.msra.gmra.mxu0 %vm573_vm4, %v4429_v54 }
 0xa15   :  { %5526 = vmatpush3.msra.mxu0 %v6519_v31  ;;  %5527 = vmatprep.mubr.msk.f32.mxu0 %vm5620_vm0, %v5619_v0  ;;  %v6699_v62 = vpop.eup %5605  ;;  %vm6874_vm0 = vmmov %vm6872_vm3 }
 0xa16   :  { %vm6876_vm8 = vmmov %vm6874_vm0 }
 0xa17   :  { %v4606_v53 = vpop.permute.xlu0 %4605 }
 0xa18   :  { %5528 = vmatmul.mubr.msk.f32.vlgmr.msra.gmra.mxu0 %vm573_vm4, %v4606_v53  ;;  %vm6875_vm4 = vmmov %vm6874_vm0 }
 0xa1d   :  { %v6703_v0 = vpop.eup %5607 }
 0xa34   :  { %v2781_v55 = vpop.permute.xlu1 %2780 }
 0xa35   :  { %v2783_v57 = vsel %vm2374_vm15, %v2781_v55, 0.0 }
 0xa36   :  { %2784 = vadd.xlane.f32.xlu0 %v2783_v57 }
 0xa48   :  { %v3078_v31 = vpop.xlane.xlu0 %3077 }
 0xa49   :  { %v3079_v3 = vsub.f32 %v6265_v32, %v3078_v31 }
 0xa4b   :  { %v3080_v6 = vmul.f32 1.442695, %v3079_v3 }
 0xa4c   :  { %2881 = vrot.lane.b32.xlu0 %v6699_v62, %s5623_s7 }
 0xa50   :  { %2982 = vrot.lane.b32.xlu0 %v6703_v0, %s5627_s13 }
 0xabf   :  { %v2785_v1 = vpop.xlane.xlu0 %2784 }
 0xac0   :  { %5609 = vrcp.f32 %v2785_v1 }
 0xac1   :  { %5611 = vpow2.f32 %v3080_v6 }
 0xac3   :  { %v2882_v5 = vpop.permute.xlu0 %2881 }
 0xac4   :  { %v2884_v7 = vsel %vm2374_vm15, %v2882_v5, 0.0 }
 0xac5   :  { %2885 = vadd.xlane.f32.xlu1 %v2884_v7 }
 0xac7   :  { %v2983_v8 = vpop.permute.xlu0 %2982 }
 0xac8   :  { %v2985_v10 = vsel %vm2374_vm15, %v2983_v8, 0.0 }
 0xac9   :  { %2986 = vadd.xlane.f32.xlu0 %v2985_v10 }
 0xacc   :  { %v4144_v11 = vpop.f32.mrf.mxu0 }
 0xacd   :  { %v5610_v12 = vpop.eup %5609  ;;  %v4145_v13 = vadd.f32 %v6604_v59, %v4144_v11 }
 0xace   :  { %v2787_v17 = vmul.f32 %v5610_v12, %v5602_v47  ;;  %v5499_v18 = vpop.f32.mrf.mxu0  ;;  %v5612_v26 = vpop.eup %5611 }
 0xacf   :  { %4148 = vst.msk [vmem:[%s6839_s25 + $0x8] sm:$0x3] %vm6874_vm0, %v4145_v13 }
 0xad0   :  { %2788 = vst.msk [vmem:[%s6834_s23] sm:$0x3] %vm2772_vm10, %v2787_v17  ;;  %v4321_v32 = vpop.f32.mrf.mxu0  ;;  %vm6877_vm10 = vmmov %vm6874_vm0 }
 0xad1   :  { %v4322_v20 = vadd.f32 %v6604_v59, %v4321_v32 }
 0xad2   :  { %v5509_v21 = vpop.f32.mrf.mxu0 }
 0xad3   :  { %4325 = vst.msk [vmem:[%s6839_s25 + $0xa] sm:$0x3] %vm6875_vm4, %v4322_v20 }
 0xad4   :  { %v4498_v25 = vpop.f32.mrf.mxu0 }
 0xad5   :  { %v4499_v27 = vadd.f32 %v6604_v59, %v4498_v25 }
 0xad6   :  { %3083 = vrot.lane.b32.xlu1 %v5612_v26, %s5625_s11  ;;  %v5519_v28 = vpop.f32.mrf.mxu0 }
 0xad7   :  { %4502 = vst.msk [vmem:[%s6839_s25 + $0xc] sm:$0x3] %vm6876_vm8, %v4499_v27 }
 0xad8   :  { %v4675_v24 = vpop.f32.mrf.mxu0 }
 0xad9   :  { %v4676_v63 = vadd.f32 %v6604_v59, %v4675_v24 }
 0xada   :  { %3708 = vrot.lane.b32.xlu1 %v3707_v29, %s5633_s8  ;;  %v5529_v34 = vpop.f32.mrf.mxu0 }
 0xadb   :  { %4679 = vst.msk [vmem:[%s6839_s25 + $0xe] sm:$0x3] %vm6877_vm10, %v4676_v63 }
 0xade   :  { %3885 = vrot.lane.b32.xlu1 %v3884_v35, %s5633_s8 }
 0xae2   :  { %4062 = vrot.lane.b32.xlu1 %v4061_v2, %s5633_s8 }
 0xae6   :  { %4239 = vrot.lane.b32.xlu1 %v4238_v39, %s5633_s8 }
 0xaea   :  { %4416 = vrot.lane.b32.xlu1 %v4415_v42, %s5633_s8 }
 0xaee   :  { %4593 = vrot.lane.b32.xlu1 %v4592_v43, %s5633_s8 }
 0xb4e   :  { %v2886_v9 = vpop.xlane.xlu1 %2885 }
 0xb4f   :  { %5613 = vrcp.f32 %v2886_v9 }
 0xb52   :  { %v3084_v44 = vpop.permute.xlu1 %3083  ;;  %v2987_v45 = vpop.xlane.xlu0 %2986 }
 0xb53   :  { %5615 = vrcp.f32 %v2987_v45  ;;  %v3086_v14 = vsel %vm2374_vm15, %v3084_v44, 0.0 }
 0xb54   :  { %3087 = vadd.xlane.f32.xlu0 %v3086_v14 }
 0xb56   :  { %v3709_v47 = vpop.permute.xlu1 %3708 }
 0xb57   :  { %3711 = vst.msk [vmem:[%s6839_s25 + $0x2] sm:$0x3] %vm3533_vm7, %v3709_v47 }
 0xb5a   :  { %v3886_v59 = vpop.permute.xlu1 %3885 }
 0xb5b   :  { %3888 = vst.msk [vmem:[%s6839_s25 + $0x4] sm:$0x3] %vm3533_vm7, %v3886_v59 }
 0xb5c   :  { %v5614_v22 = vpop.eup %5613 }
 0xb5d   :  { %v2888_v41 = vmul.f32 %v5614_v22, %v6699_v62 }
 0xb5e   :  { %v4063_v48 = vpop.permute.xlu1 %4062 }
 0xb5f   :  { %2889 = vst.msk [vmem:[%s6834_s23] sm:$0x3] %vm2873_vm13, %v2888_v41 }
 0xb60   :  { %4065 = vst.msk [vmem:[%s6839_s25 + $0x6] sm:$0x3] %vm3533_vm7, %v4063_v48  ;;  %v5616_v46 = vpop.eup %5615 }
 0xb61   :  { %v2989_v50 = vmul.f32 %v5616_v46, %v6703_v0 }
 0xb62   :  { %v4240_v51 = vpop.permute.xlu1 %4239 }
 0xb63   :  { %2990 = vst.msk [vmem:[%s6834_s23] sm:$0x3] %vm2974_vm12, %v2989_v50 }
 0xb64   :  { %4242 = vst.msk [vmem:[%s6839_s25 + $0x8] sm:$0x3] %vm3533_vm7, %v4240_v51 }
 0xb66   :  { %v4417_v49 = vpop.permute.xlu1 %4416 }
 0xb67   :  { %4419 = vst.msk [vmem:[%s6839_s25 + $0xa] sm:$0x3] %vm3533_vm7, %v4417_v49 }
 0xb6a   :  { %v4594_v52 = vpop.permute.xlu1 %4593  ;;  %3530 = vrot.lane.b32.xlu0 %v3529_v19, %s5633_s8 }
 0xb6b   :  { %4596 = vst.msk [vmem:[%s6839_s25 + $0xc] sm:$0x3] %vm3533_vm7, %v4594_v52 }
 0xb6e   :  { %4770 = vrot.lane.b32.xlu0 %v4769_v36, %s5633_s8 }
 0xbdd   :  { %v3088_v54 = vpop.xlane.xlu0 %3087 }
 0xbde   :  { %5617 = vrcp.f32 %v3088_v54 }
 0xbe1   :  { %v3531_v53 = vpop.permute.xlu0 %3530 }
 0xbe2   :  { %3534 = vst.msk [vmem:[%s6839_s25] sm:$0x3] %vm3533_vm7, %v3531_v53 }
 0xbe5   :  { %v4771_v16 = vpop.permute.xlu0 %4770 }
 0xbe6   :  { %4773 = vst.msk [vmem:[%s6839_s25 + $0xe] sm:$0x3] %vm3533_vm7, %v4771_v16 }
 0xbeb   :  { %v5618_v19 = vpop.eup %5617 }
 0xbec   :  { %v3090_v55 = vmul.f32 %v5618_v19, %v5612_v26 }
 0xbee   :  { %3091 = vst.msk [vmem:[%s6834_s23] sm:$0x3] %vm3075_vm14, %v3090_v55 }

</bundles_post_ra>
